<compile_context>
chip_gen: v7x
topology: tpu7x:2x2x1
jax: 0.10.0
libtpu: 0.0.40
codegen_flags: <defaults>
</compile_context>

<pallas_src>
import jax
import jax.numpy as jnp
from jax import lax
from jax.experimental import pallas as pl
from jax.experimental.pallas import tpu as pltpu


# ---------------------------------------------------------------------------
# Fused 5-layer encoder kernel (one grid step == one batch element)
# ---------------------------------------------------------------------------
def make_kernel(geoms):
    """geoms: tuple of (H, W, Cin, Cout) per layer (static Python ints)."""
    n = len(geoms)

    def kernel(*args):
        x_ref = args[0]                                   # (2, H0//2, W0*C0)
        w_refs = [args[1 + 2 * i] for i in range(n)]      # (4, (W+2)*Cin, Wo*Cout)
        b_refs = [args[2 + 2 * i] for i in range(n)]      # (1, Wo*Cout)
        o_ref = args[1 + 2 * n]                           # (Hf, Wf*Cf)
        pb_refs = list(args[2 + 2 * n:])                  # per-layer padded scratch

        # Zero the padded buffers (borders / pad columns must be 0 each step).
        for pb in pb_refs:
            pb[...] = jnp.zeros_like(pb)

        # Fill layer-1 padded buffer from the row-parity-split input:
        #   even input rows h -> padded row hp=h+1 (odd parity), r = h//2
        #   odd  input rows h -> padded row hp=h+1 (even parity), r = (h+1)//2
        H0, W0, C0, _ = geoms[0]
        iw0 = W0 * C0
        pb_refs[0][1, 0:H0 // 2, 0:iw0] = x_ref[0]
        pb_refs[0][0, 1:H0 // 2 + 1, 0:iw0] = x_ref[1]

        act = None
        for l, (H, W, Cin, Cout) in enumerate(geoms):
            Ho, Wo = H // 2, W // 2
            N = Wo * Cout
            pb = pb_refs[l]

            # conv as 4 GEMMs (one per kernel row kh) on the MXU
            acc = None
            for kh in range(4):
                rows = pb[kh % 2, (kh // 2):(kh // 2) + Ho, :]   # (Ho, (W+2)*Cin)
                t = jnp.dot(rows, w_refs[l][kh],
                            preferred_element_type=jnp.float32)  # (Ho, Wo*Cout)
                acc = t if acc is None else acc + t

            act = jnp.maximum(acc + b_refs[l][...], 0.0)          # bias + ReLU

            if l + 1 < n:
                # Scatter output rows into the next layer's padded buffer
                # (row hp = ho + 1, parity-split; columns are already in the
                # (w, c)-flattened interior layout, lane offset 0).
                nb = pb_refs[l + 1]
                for ho in range(Ho):
                    hp = ho + 1
                    nb[hp % 2, (hp // 2):(hp // 2) + 1, 0:N] = act[ho:ho + 1, :]

        o_ref[...] = act.astype(o_ref.dtype)

    return kernel


# ---------------------------------------------------------------------------
# One-time parameter prep: PyTorch (Cout,Cin,4,4) -> banded GEMM weights
# ---------------------------------------------------------------------------
def prepare_params(params, spatial):
    H = W = spatial
    wexps, bexps, geoms = [], [], []
    for w, b in params:
        Cout, Cin, kh, kw = w.shape
        assert (kh, kw) == (4, 4) and H % 2 == 0 and W % 2 == 0
        Ho, Wo, Wp = H // 2, W // 2, W + 2

        # wexp[kh, row(wp,c), wo*Cout+co] = w[co, c, kh, wp-2*wo] (0 if out of band)
        w_t = jnp.transpose(w, (2, 3, 1, 0))                    # (4, 4, Cin, Cout)
        wp_i = jnp.arange(Wp)[:, None]
        wo_i = jnp.arange(Wo)[None, :]
        kwi = wp_i - 2 * wo_i                                   # (Wp, Wo)
        valid = (kwi >= 0) & (kwi <= 3)
        g = w_t[:, jnp.clip(kwi, 0, 3)]                         # (4, Wp, Wo, Cin, Cout)
        g = jnp.where(valid[None, :, :, None, None], g, 0.0)
        g = jnp.transpose(g, (0, 1, 3, 2, 4)).reshape(4, Wp * Cin, Wo * Cout)
        # Reorder rows so interior columns (wp=1..W) come first, pad cols last
        # (matches the lane-aligned scratch layout used inside the kernel).
        g = jnp.concatenate(
            [g[:, Cin:(W + 1) * Cin], g[:, :Cin], g[:, (W + 1) * Cin:]], axis=1)

        wexps.append(g.astype(jnp.float32))
        bexps.append(jnp.tile(b, (Wo,)).reshape(1, Wo * Cout).astype(jnp.float32))
        geoms.append((H, W, Cin, Cout))
        H, W = Ho, Wo
    return wexps, bexps, tuple(geoms)


# ---------------------------------------------------------------------------
# Forward wrapper
# ---------------------------------------------------------------------------
def make_forward(geoms):
    geoms = tuple(geoms)
    H0, W0, C0, _ = geoms[0]
    Hf, Wf = geoms[-1][0] // 2, geoms[-1][1] // 2
    Cf = geoms[-1][3]
    kernel = make_kernel(geoms)

    @jax.jit
    def forward(x_nchw, wexps, bexps):
        B = x_nchw.shape[0]
        # NCHW -> row-parity-split, (w,c)-flattened layout: (B, 2, H/2, W*C)
        x_nhwc = jnp.transpose(x_nchw, (0, 2, 3, 1))
        x_par = x_nhwc.reshape(B, H0 // 2, 2, W0 * C0).transpose(0, 2, 1, 3)

        in_specs = [pl.BlockSpec((None, 2, H0 // 2, W0 * C0),
                                 lambda b: (b, 0, 0, 0))]
        inputs = [x_par]
        for we, be in zip(wexps, bexps):
            in_specs.append(pl.BlockSpec(tuple(we.shape), lambda b: (0, 0, 0)))
            in_specs.append(pl.BlockSpec(tuple(be.shape), lambda b: (0, 0)))
            inputs.extend([we, be])

        out = pl.pallas_call(
            kernel,
            out_shape=jax.ShapeDtypeStruct((B, Hf, Wf * Cf), jnp.float32),
            grid_spec=pltpu.PrefetchScalarGridSpec(
                num_scalar_prefetch=0,
                grid=(B,),
                in_specs=in_specs,
                out_specs=pl.BlockSpec((None, Hf, Wf * Cf), lambda b: (b, 0, 0)),
                scratch_shapes=[
                    pltpu.VMEM((2, gh // 2 + 1, (gw + 2) * gc), jnp.float32)
                    for (gh, gw, gc, _) in geoms
                ],
            ),
            compiler_params=pltpu.CompilerParams(
                dimension_semantics=("parallel",)),
        )(*inputs)

        # (B, Hf, Wf*Cf) -> NCHW (tiny op; for spatial=32 it is a pure reshape)
        return jnp.transpose(out.reshape(B, Hf, Wf, Cf), (0, 3, 1, 2))

    return forward


# ---------------------------------------------------------------------------
# Deterministic parameter init (shapes follow aeEncoder.__init__)
# ---------------------------------------------------------------------------
def init_params(key, capacity, channel):
    c = capacity
    layer_io = [(channel, c), (c, c * 2), (c * 2, c * 4), (c * 4, c * 8),
                (c * 8, c * 16)]
    params = []
    for cin, cout in layer_io:
        key, kw, kb = jax.random.split(key, 3)
        fan_in = cin * 4 * 4
        bound = 1.0 / jnp.sqrt(fan_in)
        w = jax.random.uniform(kw, (cout, cin, 4, 4), jnp.float32, -bound, bound)
        b = jax.random.uniform(kb, (cout,), jnp.float32, -bound, bound)
        params.append((w, b))
    return params


# ---------------------------------------------------------------------------
# Pure-JAX reference (lax conv) for the correctness check
# ---------------------------------------------------------------------------
def ae_encoder_reference(x_nchw, params):
    x = x_nchw
    for w, b in params:
        y = lax.conv_general_dilated(
            x, w, window_strides=(2, 2), padding=((1, 1), (1, 1)),
            dimension_numbers=("NCHW", "OIHW", "NCHW"))
        x = jnp.maximum(y + b[None, :, None, None], 0.0)
    return x


if __name__ == "__main__":
    capacity = 8
    channel = 4
    batch = 2
    spatial = 32  # 32 -> 16 -> 8 -> 4 -> 2 -> 1 through five stride-2 convs

    key = jax.random.PRNGKey(0)
    key, kx = jax.random.split(key)
    x = jax.random.normal(kx, (batch, channel, spatial, spatial), jnp.float32)
    params = init_params(key, capacity, channel)

    # one-time weight layout prep (outside the jitted forward path)
    wexps, bexps, geoms = prepare_params(params, spatial)
    forward = make_forward(geoms)

    out = jax.block_until_ready(forward(x, wexps, bexps))
    ref = jax.block_until_ready(ae_encoder_reference(x, params))

    assert out.shape == (batch, capacity * 16, 1, 1), out.shape
    assert jnp.allclose(out, ref, rtol=1e-4, atol=1e-4), float(
        jnp.max(jnp.abs(out - ref)))

    print("KERNEL_OK")
</pallas_src>

<mosaic_0001>
module attributes {stable_mosaic.version = 11 : i64} {
  func.func @kernel(%arg0: i32, %arg1: memref<1x2x16x128xf32, #tpu.memory_space<vmem>>, %arg2: memref<4x136x128xf32, #tpu.memory_space<vmem>>, %arg3: memref<1x128xf32, #tpu.memory_space<vmem>>, %arg4: memref<4x144x128xf32, #tpu.memory_space<vmem>>, %arg5: memref<1x128xf32, #tpu.memory_space<vmem>>, %arg6: memref<4x160x128xf32, #tpu.memory_space<vmem>>, %arg7: memref<1x128xf32, #tpu.memory_space<vmem>>, %arg8: memref<4x192x128xf32, #tpu.memory_space<vmem>>, %arg9: memref<1x128xf32, #tpu.memory_space<vmem>>, %arg10: memref<4x256x128xf32, #tpu.memory_space<vmem>>, %arg11: memref<1x128xf32, #tpu.memory_space<vmem>>, %arg12: memref<1x1x128xf32, #tpu.memory_space<vmem>>, %arg13: memref<2x17x136xf32, #tpu.memory_space<vmem>>, %arg14: memref<2x9x144xf32, #tpu.memory_space<vmem>>, %arg15: memref<2x5x160xf32, #tpu.memory_space<vmem>>, %arg16: memref<2x3x192xf32, #tpu.memory_space<vmem>>, %arg17: memref<2x2x256xf32, #tpu.memory_space<vmem>>) attributes {dimension_semantics = [#tpu.dimension_semantics<parallel>], iteration_bounds = array<i64: 2>, scalar_prefetch = 0 : i64, scratch_operands = 5 : i64, tpu.core_type = #tpu.core_type<tc>, window_params = [{transform_indices = @transform_0, window_bounds = array<i64: 1, 2, 16, 128>}, {pipeline_mode = #tpu.pipeline_mode<synchronous>, transform_indices = @transform_1, window_bounds = array<i64: 4, 136, 128>}, {pipeline_mode = #tpu.pipeline_mode<synchronous>, transform_indices = @transform_2, window_bounds = array<i64: 1, 128>}, {pipeline_mode = #tpu.pipeline_mode<synchronous>, transform_indices = @transform_3, window_bounds = array<i64: 4, 144, 128>}, {pipeline_mode = #tpu.pipeline_mode<synchronous>, transform_indices = @transform_4, window_bounds = array<i64: 1, 128>}, {pipeline_mode = #tpu.pipeline_mode<synchronous>, transform_indices = @transform_5, window_bounds = array<i64: 4, 160, 128>}, {pipeline_mode = #tpu.pipeline_mode<synchronous>, transform_indices = @transform_6, window_bounds = array<i64: 1, 128>}, {pipeline_mode = #tpu.pipeline_mode<synchronous>, transform_indices = @transform_7, window_bounds = array<i64: 4, 192, 128>}, {pipeline_mode = #tpu.pipeline_mode<synchronous>, transform_indices = @transform_8, window_bounds = array<i64: 1, 128>}, {pipeline_mode = #tpu.pipeline_mode<synchronous>, transform_indices = @transform_9, window_bounds = array<i64: 4, 256, 128>}, {pipeline_mode = #tpu.pipeline_mode<synchronous>, transform_indices = @transform_10, window_bounds = array<i64: 1, 128>}, {transform_indices = @transform_11, window_bounds = array<i64: 1, 1, 128>}]} {
    %cst = arith.constant 0.000000e+00 : f32
    %0 = vector.broadcast %cst : f32 to vector<2x17x136xf32>
    %c0 = arith.constant 0 : index
    %c0_0 = arith.constant 0 : index
    %c0_1 = arith.constant 0 : index
    %1 = vector.load %arg13[%c0, %c0_0, %c0_1] : memref<2x17x136xf32, #tpu.memory_space<vmem>>, vector<2x17x136xf32>
    tpu.vector_store %arg13[%c0, %c0_0, %c0_1], %0 {strides = array<i32>} : memref<2x17x136xf32, #tpu.memory_space<vmem>>, vector<2x17x136xf32>,
    %cst_2 = arith.constant 0.000000e+00 : f32
    %2 = vector.broadcast %cst_2 : f32 to vector<2x9x144xf32>
    %c0_3 = arith.constant 0 : index
    %c0_4 = arith.constant 0 : index
    %c0_5 = arith.constant 0 : index
    %3 = vector.load %arg14[%c0_3, %c0_4, %c0_5] : memref<2x9x144xf32, #tpu.memory_space<vmem>>, vector<2x9x144xf32>
    tpu.vector_store %arg14[%c0_3, %c0_4, %c0_5], %2 {strides = array<i32>} : memref<2x9x144xf32, #tpu.memory_space<vmem>>, vector<2x9x144xf32>,
    %cst_6 = arith.constant 0.000000e+00 : f32
    %4 = vector.broadcast %cst_6 : f32 to vector<2x5x160xf32>
    %c0_7 = arith.constant 0 : index
    %c0_8 = arith.constant 0 : index
    %c0_9 = arith.constant 0 : index
    %5 = vector.load %arg15[%c0_7, %c0_8, %c0_9] : memref<2x5x160xf32, #tpu.memory_space<vmem>>, vector<2x5x160xf32>
    tpu.vector_store %arg15[%c0_7, %c0_8, %c0_9], %4 {strides = array<i32>} : memref<2x5x160xf32, #tpu.memory_space<vmem>>, vector<2x5x160xf32>,
    %cst_10 = arith.constant 0.000000e+00 : f32
    %6 = vector.broadcast %cst_10 : f32 to vector<2x3x192xf32>
    %c0_11 = arith.constant 0 : index
    %c0_12 = arith.constant 0 : index
    %c0_13 = arith.constant 0 : index
    %7 = vector.load %arg16[%c0_11, %c0_12, %c0_13] : memref<2x3x192xf32, #tpu.memory_space<vmem>>, vector<2x3x192xf32>
    tpu.vector_store %arg16[%c0_11, %c0_12, %c0_13], %6 {strides = array<i32>} : memref<2x3x192xf32, #tpu.memory_space<vmem>>, vector<2x3x192xf32>,
    %cst_14 = arith.constant 0.000000e+00 : f32
    %8 = vector.broadcast %cst_14 : f32 to vector<2x2x256xf32>
    %c0_15 = arith.constant 0 : index
    %c0_16 = arith.constant 0 : index
    %c0_17 = arith.constant 0 : index
    %9 = vector.load %arg17[%c0_15, %c0_16, %c0_17] : memref<2x2x256xf32, #tpu.memory_space<vmem>>, vector<2x2x256xf32>
    tpu.vector_store %arg17[%c0_15, %c0_16, %c0_17], %8 {strides = array<i32>} : memref<2x2x256xf32, #tpu.memory_space<vmem>>, vector<2x2x256xf32>,
    %c0_18 = arith.constant 0 : index
    %c0_19 = arith.constant 0 : index
    %c0_20 = arith.constant 0 : index
    %c0_21 = arith.constant 0 : index
    %10 = vector.load %arg1[%c0_18, %c0_19, %c0_20, %c0_21] : memref<1x2x16x128xf32, #tpu.memory_space<vmem>>, vector<1x1x16x128xf32>
    %11 = vector.shape_cast %10 : vector<1x1x16x128xf32> to vector<16x128xf32>
    %c1 = arith.constant 1 : index
    %c0_22 = arith.constant 0 : index
    %c0_23 = arith.constant 0 : index
    %12 = vector.load %arg13[%c1, %c0_22, %c0_23] : memref<2x17x136xf32, #tpu.memory_space<vmem>>, vector<1x16x128xf32>
    %13 = vector.shape_cast %12 : vector<1x16x128xf32> to vector<16x128xf32>
    %14 = vector.shape_cast %11 : vector<16x128xf32> to vector<1x16x128xf32>
    tpu.vector_store %arg13[%c1, %c0_22, %c0_23], %14 {strides = array<i32>} : memref<2x17x136xf32, #tpu.memory_space<vmem>>, vector<1x16x128xf32>,
    %c0_24 = arith.constant 0 : index
    %c1_25 = arith.constant 1 : index
    %c0_26 = arith.constant 0 : index
    %c0_27 = arith.constant 0 : index
    %15 = vector.load %arg1[%c0_24, %c1_25, %c0_26, %c0_27] : memref<1x2x16x128xf32, #tpu.memory_space<vmem>>, vector<1x1x16x128xf32>
    %16 = vector.shape_cast %15 : vector<1x1x16x128xf32> to vector<16x128xf32>
    %c0_28 = arith.constant 0 : index
    %c1_29 = arith.constant 1 : index
    %c0_30 = arith.constant 0 : index
    %17 = vector.load %arg13[%c0_28, %c1_29, %c0_30] : memref<2x17x136xf32, #tpu.memory_space<vmem>>, vector<1x16x128xf32>
    %18 = vector.shape_cast %17 : vector<1x16x128xf32> to vector<16x128xf32>
    %19 = vector.shape_cast %16 : vector<16x128xf32> to vector<1x16x128xf32>
    tpu.vector_store %arg13[%c0_28, %c1_29, %c0_30], %19 {strides = array<i32>} : memref<2x17x136xf32, #tpu.memory_space<vmem>>, vector<1x16x128xf32>,
    %c0_31 = arith.constant 0 : index
    %c0_32 = arith.constant 0 : index
    %c0_33 = arith.constant 0 : index
    %20 = vector.load %arg13[%c0_31, %c0_32, %c0_33] : memref<2x17x136xf32, #tpu.memory_space<vmem>>, vector<1x16x136xf32>
    %21 = vector.shape_cast %20 : vector<1x16x136xf32> to vector<16x136xf32>
    %c0_34 = arith.constant 0 : index
    %c0_35 = arith.constant 0 : index
    %c0_36 = arith.constant 0 : index
    %22 = vector.load %arg2[%c0_34, %c0_35, %c0_36] : memref<4x136x128xf32, #tpu.memory_space<vmem>>, vector<1x136x128xf32>
    %23 = vector.shape_cast %22 : vector<1x136x128xf32> to vector<136x128xf32>
    %cst_37 = arith.constant dense<0.000000e+00> : vector<16x128xf32>
    %24 = tpu.matmul %21, %23, %cst_37 {dimension_numbers = #tpu.dot_dimension_numbers<[1], [0], [0], [1], [0, 0, 1, 1], [], []>} : vector<16x136xf32>, vector<136x128xf32>, vector<16x128xf32> -> vector<16x128xf32>
    %c1_38 = arith.constant 1 : index
    %c0_39 = arith.constant 0 : index
    %c0_40 = arith.constant 0 : index
    %25 = vector.load %arg13[%c1_38, %c0_39, %c0_40] : memref<2x17x136xf32, #tpu.memory_space<vmem>>, vector<1x16x136xf32>
    %26 = vector.shape_cast %25 : vector<1x16x136xf32> to vector<16x136xf32>
    %c1_41 = arith.constant 1 : index
    %c0_42 = arith.constant 0 : index
    %c0_43 = arith.constant 0 : index
    %27 = vector.load %arg2[%c1_41, %c0_42, %c0_43] : memref<4x136x128xf32, #tpu.memory_space<vmem>>, vector<1x136x128xf32>
    %28 = vector.shape_cast %27 : vector<1x136x128xf32> to vector<136x128xf32>
    %cst_44 = arith.constant dense<0.000000e+00> : vector<16x128xf32>
    %29 = tpu.matmul %26, %28, %cst_44 {dimension_numbers = #tpu.dot_dimension_numbers<[1], [0], [0], [1], [0, 0, 1, 1], [], []>} : vector<16x136xf32>, vector<136x128xf32>, vector<16x128xf32> -> vector<16x128xf32>
    %30 = arith.addf %24, %29 : vector<16x128xf32>
    %c0_45 = arith.constant 0 : index
    %c1_46 = arith.constant 1 : index
    %c0_47 = arith.constant 0 : index
    %31 = vector.load %arg13[%c0_45, %c1_46, %c0_47] : memref<2x17x136xf32, #tpu.memory_space<vmem>>, vector<1x16x136xf32>
    %32 = vector.shape_cast %31 : vector<1x16x136xf32> to vector<16x136xf32>
    %c2 = arith.constant 2 : index
    %c0_48 = arith.constant 0 : index
    %c0_49 = arith.constant 0 : index
    %33 = vector.load %arg2[%c2, %c0_48, %c0_49] : memref<4x136x128xf32, #tpu.memory_space<vmem>>, vector<1x136x128xf32>
    %34 = vector.shape_cast %33 : vector<1x136x128xf32> to vector<136x128xf32>
    %cst_50 = arith.constant dense<0.000000e+00> : vector<16x128xf32>
    %35 = tpu.matmul %32, %34, %cst_50 {dimension_numbers = #tpu.dot_dimension_numbers<[1], [0], [0], [1], [0, 0, 1, 1], [], []>} : vector<16x136xf32>, vector<136x128xf32>, vector<16x128xf32> -> vector<16x128xf32>
    %36 = arith.addf %30, %35 : vector<16x128xf32>
    %c1_51 = arith.constant 1 : index
    %c1_52 = arith.constant 1 : index
    %c0_53 = arith.constant 0 : index
    %37 = vector.load %arg13[%c1_51, %c1_52, %c0_53] : memref<2x17x136xf32, #tpu.memory_space<vmem>>, vector<1x16x136xf32>
    %38 = vector.shape_cast %37 : vector<1x16x136xf32> to vector<16x136xf32>
    %c3 = arith.constant 3 : index
    %c0_54 = arith.constant 0 : index
    %c0_55 = arith.constant 0 : index
    %39 = vector.load %arg2[%c3, %c0_54, %c0_55] : memref<4x136x128xf32, #tpu.memory_space<vmem>>, vector<1x136x128xf32>
    %40 = vector.shape_cast %39 : vector<1x136x128xf32> to vector<136x128xf32>
    %cst_56 = arith.constant dense<0.000000e+00> : vector<16x128xf32>
    %41 = tpu.matmul %38, %40, %cst_56 {dimension_numbers = #tpu.dot_dimension_numbers<[1], [0], [0], [1], [0, 0, 1, 1], [], []>} : vector<16x136xf32>, vector<136x128xf32>, vector<16x128xf32> -> vector<16x128xf32>
    %42 = arith.addf %36, %41 : vector<16x128xf32>
    %c0_57 = arith.constant 0 : index
    %c0_58 = arith.constant 0 : index
    %43 = vector.load %arg3[%c0_57, %c0_58] : memref<1x128xf32, #tpu.memory_space<vmem>>, vector<1x128xf32>
    %44 = vector.broadcast %43 : vector<1x128xf32> to vector<16x128xf32>
    %45 = arith.addf %42, %44 : vector<16x128xf32>
    %cst_59 = arith.constant 0.000000e+00 : f32
    %46 = vector.broadcast %cst_59 : f32 to vector<16x128xf32>
    %47 = arith.maximumf %45, %46 : vector<16x128xf32>
    %48 = vector.extract_strided_slice %47 {offsets = [0, 0], sizes = [1, 128], strides = [1, 1]} : vector<16x128xf32> to vector<1x128xf32>
    %c1_60 = arith.constant 1 : index
    %c0_61 = arith.constant 0 : index
    %c0_62 = arith.constant 0 : index
    %49 = vector.load %arg14[%c1_60, %c0_61, %c0_62] : memref<2x9x144xf32, #tpu.memory_space<vmem>>, vector<1x1x128xf32>
    %50 = vector.shape_cast %49 : vector<1x1x128xf32> to vector<1x128xf32>
    %51 = vector.shape_cast %48 : vector<1x128xf32> to vector<1x1x128xf32>
    tpu.vector_store %arg14[%c1_60, %c0_61, %c0_62], %51 {strides = array<i32>} : memref<2x9x144xf32, #tpu.memory_space<vmem>>, vector<1x1x128xf32>,
    %52 = vector.extract_strided_slice %47 {offsets = [1, 0], sizes = [1, 128], strides = [1, 1]} : vector<16x128xf32> to vector<1x128xf32>
    %c0_63 = arith.constant 0 : index
    %c1_64 = arith.constant 1 : index
    %c0_65 = arith.constant 0 : index
    %53 = vector.load %arg14[%c0_63, %c1_64, %c0_65] : memref<2x9x144xf32, #tpu.memory_space<vmem>>, vector<1x1x128xf32>
    %54 = vector.shape_cast %53 : vector<1x1x128xf32> to vector<1x128xf32>
    %55 = vector.shape_cast %52 : vector<1x128xf32> to vector<1x1x128xf32>
    tpu.vector_store %arg14[%c0_63, %c1_64, %c0_65], %55 {strides = array<i32>} : memref<2x9x144xf32, #tpu.memory_space<vmem>>, vector<1x1x128xf32>,
    %56 = vector.extract_strided_slice %47 {offsets = [2, 0], sizes = [1, 128], strides = [1, 1]} : vector<16x128xf32> to vector<1x128xf32>
    %c1_66 = arith.constant 1 : index
    %c1_67 = arith.constant 1 : index
    %c0_68 = arith.constant 0 : index
    %57 = vector.load %arg14[%c1_66, %c1_67, %c0_68] : memref<2x9x144xf32, #tpu.memory_space<vmem>>, vector<1x1x128xf32>
    %58 = vector.shape_cast %57 : vector<1x1x128xf32> to vector<1x128xf32>
    %59 = vector.shape_cast %56 : vector<1x128xf32> to vector<1x1x128xf32>
    tpu.vector_store %arg14[%c1_66, %c1_67, %c0_68], %59 {strides = array<i32>} : memref<2x9x144xf32, #tpu.memory_space<vmem>>, vector<1x1x128xf32>,
    %60 = vector.extract_strided_slice %47 {offsets = [3, 0], sizes = [1, 128], strides = [1, 1]} : vector<16x128xf32> to vector<1x128xf32>
    %c0_69 = arith.constant 0 : index
    %c2_70 = arith.constant 2 : index
    %c0_71 = arith.constant 0 : index
    %61 = vector.load %arg14[%c0_69, %c2_70, %c0_71] : memref<2x9x144xf32, #tpu.memory_space<vmem>>, vector<1x1x128xf32>
    %62 = vector.shape_cast %61 : vector<1x1x128xf32> to vector<1x128xf32>
    %63 = vector.shape_cast %60 : vector<1x128xf32> to vector<1x1x128xf32>
    tpu.vector_store %arg14[%c0_69, %c2_70, %c0_71], %63 {strides = array<i32>} : memref<2x9x144xf32, #tpu.memory_space<vmem>>, vector<1x1x128xf32>,
    %64 = vector.extract_strided_slice %47 {offsets = [4, 0], sizes = [1, 128], strides = [1, 1]} : vector<16x128xf32> to vector<1x128xf32>
    %c1_72 = arith.constant 1 : index
    %c2_73 = arith.constant 2 : index
    %c0_74 = arith.constant 0 : index
    %65 = vector.load %arg14[%c1_72, %c2_73, %c0_74] : memref<2x9x144xf32, #tpu.memory_space<vmem>>, vector<1x1x128xf32>
    %66 = vector.shape_cast %65 : vector<1x1x128xf32> to vector<1x128xf32>
    %67 = vector.shape_cast %64 : vector<1x128xf32> to vector<1x1x128xf32>
    tpu.vector_store %arg14[%c1_72, %c2_73, %c0_74], %67 {strides = array<i32>} : memref<2x9x144xf32, #tpu.memory_space<vmem>>, vector<1x1x128xf32>,
    %68 = vector.extract_strided_slice %47 {offsets = [5, 0], sizes = [1, 128], strides = [1, 1]} : vector<16x128xf32> to vector<1x128xf32>
    %c0_75 = arith.constant 0 : index
    %c3_76 = arith.constant 3 : index
    %c0_77 = arith.constant 0 : index
    %69 = vector.load %arg14[%c0_75, %c3_76, %c0_77] : memref<2x9x144xf32, #tpu.memory_space<vmem>>, vector<1x1x128xf32>
    %70 = vector.shape_cast %69 : vector<1x1x128xf32> to vector<1x128xf32>
    %71 = vector.shape_cast %68 : vector<1x128xf32> to vector<1x1x128xf32>
    tpu.vector_store %arg14[%c0_75, %c3_76, %c0_77], %71 {strides = array<i32>} : memref<2x9x144xf32, #tpu.memory_space<vmem>>, vector<1x1x128xf32>,
    %72 = vector.extract_strided_slice %47 {offsets = [6, 0], sizes = [1, 128], strides = [1, 1]} : vector<16x128xf32> to vector<1x128xf32>
    %c1_78 = arith.constant 1 : index
    %c3_79 = arith.constant 3 : index
    %c0_80 = arith.constant 0 : index
    %73 = vector.load %arg14[%c1_78, %c3_79, %c0_80] : memref<2x9x144xf32, #tpu.memory_space<vmem>>, vector<1x1x128xf32>
    %74 = vector.shape_cast %73 : vector<1x1x128xf32> to vector<1x128xf32>
    %75 = vector.shape_cast %72 : vector<1x128xf32> to vector<1x1x128xf32>
    tpu.vector_store %arg14[%c1_78, %c3_79, %c0_80], %75 {strides = array<i32>} : memref<2x9x144xf32, #tpu.memory_space<vmem>>, vector<1x1x128xf32>,
    %76 = vector.extract_strided_slice %47 {offsets = [7, 0], sizes = [1, 128], strides = [1, 1]} : vector<16x128xf32> to vector<1x128xf32>
    %c0_81 = arith.constant 0 : index
    %c4 = arith.constant 4 : index
    %c0_82 = arith.constant 0 : index
    %77 = vector.load %arg14[%c0_81, %c4, %c0_82] : memref<2x9x144xf32, #tpu.memory_space<vmem>>, vector<1x1x128xf32>
    %78 = vector.shape_cast %77 : vector<1x1x128xf32> to vector<1x128xf32>
    %79 = vector.shape_cast %76 : vector<1x128xf32> to vector<1x1x128xf32>
    tpu.vector_store %arg14[%c0_81, %c4, %c0_82], %79 {strides = array<i32>} : memref<2x9x144xf32, #tpu.memory_space<vmem>>, vector<1x1x128xf32>,
    %80 = vector.extract_strided_slice %47 {offsets = [8, 0], sizes = [1, 128], strides = [1, 1]} : vector<16x128xf32> to vector<1x128xf32>
    %c1_83 = arith.constant 1 : index
    %c4_84 = arith.constant 4 : index
    %c0_85 = arith.constant 0 : index
    %81 = vector.load %arg14[%c1_83, %c4_84, %c0_85] : memref<2x9x144xf32, #tpu.memory_space<vmem>>, vector<1x1x128xf32>
    %82 = vector.shape_cast %81 : vector<1x1x128xf32> to vector<1x128xf32>
    %83 = vector.shape_cast %80 : vector<1x128xf32> to vector<1x1x128xf32>
    tpu.vector_store %arg14[%c1_83, %c4_84, %c0_85], %83 {strides = array<i32>} : memref<2x9x144xf32, #tpu.memory_space<vmem>>, vector<1x1x128xf32>,
    %84 = vector.extract_strided_slice %47 {offsets = [9, 0], sizes = [1, 128], strides = [1, 1]} : vector<16x128xf32> to vector<1x128xf32>
    %c0_86 = arith.constant 0 : index
    %c5 = arith.constant 5 : index
    %c0_87 = arith.constant 0 : index
    %85 = vector.load %arg14[%c0_86, %c5, %c0_87] : memref<2x9x144xf32, #tpu.memory_space<vmem>>, vector<1x1x128xf32>
    %86 = vector.shape_cast %85 : vector<1x1x128xf32> to vector<1x128xf32>
    %87 = vector.shape_cast %84 : vector<1x128xf32> to vector<1x1x128xf32>
    tpu.vector_store %arg14[%c0_86, %c5, %c0_87], %87 {strides = array<i32>} : memref<2x9x144xf32, #tpu.memory_space<vmem>>, vector<1x1x128xf32>,
    %88 = vector.extract_strided_slice %47 {offsets = [10, 0], sizes = [1, 128], strides = [1, 1]} : vector<16x128xf32> to vector<1x128xf32>
    %c1_88 = arith.constant 1 : index
    %c5_89 = arith.constant 5 : index
    %c0_90 = arith.constant 0 : index
    %89 = vector.load %arg14[%c1_88, %c5_89, %c0_90] : memref<2x9x144xf32, #tpu.memory_space<vmem>>, vector<1x1x128xf32>
    %90 = vector.shape_cast %89 : vector<1x1x128xf32> to vector<1x128xf32>
    %91 = vector.shape_cast %88 : vector<1x128xf32> to vector<1x1x128xf32>
    tpu.vector_store %arg14[%c1_88, %c5_89, %c0_90], %91 {strides = array<i32>} : memref<2x9x144xf32, #tpu.memory_space<vmem>>, vector<1x1x128xf32>,
    %92 = vector.extract_strided_slice %47 {offsets = [11, 0], sizes = [1, 128], strides = [1, 1]} : vector<16x128xf32> to vector<1x128xf32>
    %c0_91 = arith.constant 0 : index
    %c6 = arith.constant 6 : index
    %c0_92 = arith.constant 0 : index
    %93 = vector.load %arg14[%c0_91, %c6, %c0_92] : memref<2x9x144xf32, #tpu.memory_space<vmem>>, vector<1x1x128xf32>
    %94 = vector.shape_cast %93 : vector<1x1x128xf32> to vector<1x128xf32>
    %95 = vector.shape_cast %92 : vector<1x128xf32> to vector<1x1x128xf32>
    tpu.vector_store %arg14[%c0_91, %c6, %c0_92], %95 {strides = array<i32>} : memref<2x9x144xf32, #tpu.memory_space<vmem>>, vector<1x1x128xf32>,
    %96 = vector.extract_strided_slice %47 {offsets = [12, 0], sizes = [1, 128], strides = [1, 1]} : vector<16x128xf32> to vector<1x128xf32>
    %c1_93 = arith.constant 1 : index
    %c6_94 = arith.constant 6 : index
    %c0_95 = arith.constant 0 : index
    %97 = vector.load %arg14[%c1_93, %c6_94, %c0_95] : memref<2x9x144xf32, #tpu.memory_space<vmem>>, vector<1x1x128xf32>
    %98 = vector.shape_cast %97 : vector<1x1x128xf32> to vector<1x128xf32>
    %99 = vector.shape_cast %96 : vector<1x128xf32> to vector<1x1x128xf32>
    tpu.vector_store %arg14[%c1_93, %c6_94, %c0_95], %99 {strides = array<i32>} : memref<2x9x144xf32, #tpu.memory_space<vmem>>, vector<1x1x128xf32>,
    %100 = vector.extract_strided_slice %47 {offsets = [13, 0], sizes = [1, 128], strides = [1, 1]} : vector<16x128xf32> to vector<1x128xf32>
    %c0_96 = arith.constant 0 : index
    %c7 = arith.constant 7 : index
    %c0_97 = arith.constant 0 : index
    %101 = vector.load %arg14[%c0_96, %c7, %c0_97] : memref<2x9x144xf32, #tpu.memory_space<vmem>>, vector<1x1x128xf32>
    %102 = vector.shape_cast %101 : vector<1x1x128xf32> to vector<1x128xf32>
    %103 = vector.shape_cast %100 : vector<1x128xf32> to vector<1x1x128xf32>
    tpu.vector_store %arg14[%c0_96, %c7, %c0_97], %103 {strides = array<i32>} : memref<2x9x144xf32, #tpu.memory_space<vmem>>, vector<1x1x128xf32>,
    %104 = vector.extract_strided_slice %47 {offsets = [14, 0], sizes = [1, 128], strides = [1, 1]} : vector<16x128xf32> to vector<1x128xf32>
    %c1_98 = arith.constant 1 : index
    %c7_99 = arith.constant 7 : index
    %c0_100 = arith.constant 0 : index
    %105 = vector.load %arg14[%c1_98, %c7_99, %c0_100] : memref<2x9x144xf32, #tpu.memory_space<vmem>>, vector<1x1x128xf32>
    %106 = vector.shape_cast %105 : vector<1x1x128xf32> to vector<1x128xf32>
    %107 = vector.shape_cast %104 : vector<1x128xf32> to vector<1x1x128xf32>
    tpu.vector_store %arg14[%c1_98, %c7_99, %c0_100], %107 {strides = array<i32>} : memref<2x9x144xf32, #tpu.memory_space<vmem>>, vector<1x1x128xf32>,
    %108 = vector.extract_strided_slice %47 {offsets = [15, 0], sizes = [1, 128], strides = [1, 1]} : vector<16x128xf32> to vector<1x128xf32>
    %c0_101 = arith.constant 0 : index
    %c8 = arith.constant 8 : index
    %c0_102 = arith.constant 0 : index
    %109 = vector.load %arg14[%c0_101, %c8, %c0_102] : memref<2x9x144xf32, #tpu.memory_space<vmem>>, vector<1x1x128xf32>
    %110 = vector.shape_cast %109 : vector<1x1x128xf32> to vector<1x128xf32>
    %111 = vector.shape_cast %108 : vector<1x128xf32> to vector<1x1x128xf32>
    tpu.vector_store %arg14[%c0_101, %c8, %c0_102], %111 {strides = array<i32>} : memref<2x9x144xf32, #tpu.memory_space<vmem>>, vector<1x1x128xf32>,
    %c0_103 = arith.constant 0 : index
    %c0_104 = arith.constant 0 : index
    %c0_105 = arith.constant 0 : index
    %112 = vector.load %arg14[%c0_103, %c0_104, %c0_105] : memref<2x9x144xf32, #tpu.memory_space<vmem>>, vector<1x8x144xf32>
    %113 = vector.shape_cast %112 : vector<1x8x144xf32> to vector<8x144xf32>
    %c0_106 = arith.constant 0 : index
    %c0_107 = arith.constant 0 : index
    %c0_108 = arith.constant 0 : index
    %114 = vector.load %arg4[%c0_106, %c0_107, %c0_108] : memref<4x144x128xf32, #tpu.memory_space<vmem>>, vector<1x144x128xf32>
    %115 = vector.shape_cast %114 : vector<1x144x128xf32> to vector<144x128xf32>
    %cst_109 = arith.constant dense<0.000000e+00> : vector<8x128xf32>
    %116 = tpu.matmul %113, %115, %cst_109 {dimension_numbers = #tpu.dot_dimension_numbers<[1], [0], [0], [1], [0, 0, 1, 1], [], []>} : vector<8x144xf32>, vector<144x128xf32>, vector<8x128xf32> -> vector<8x128xf32>
    %c1_110 = arith.constant 1 : index
    %c0_111 = arith.constant 0 : index
    %c0_112 = arith.constant 0 : index
    %117 = vector.load %arg14[%c1_110, %c0_111, %c0_112] : memref<2x9x144xf32, #tpu.memory_space<vmem>>, vector<1x8x144xf32>
    %118 = vector.shape_cast %117 : vector<1x8x144xf32> to vector<8x144xf32>
    %c1_113 = arith.constant 1 : index
    %c0_114 = arith.constant 0 : index
    %c0_115 = arith.constant 0 : index
    %119 = vector.load %arg4[%c1_113, %c0_114, %c0_115] : memref<4x144x128xf32, #tpu.memory_space<vmem>>, vector<1x144x128xf32>
    %120 = vector.shape_cast %119 : vector<1x144x128xf32> to vector<144x128xf32>
    %cst_116 = arith.constant dense<0.000000e+00> : vector<8x128xf32>
    %121 = tpu.matmul %118, %120, %cst_116 {dimension_numbers = #tpu.dot_dimension_numbers<[1], [0], [0], [1], [0, 0, 1, 1], [], []>} : vector<8x144xf32>, vector<144x128xf32>, vector<8x128xf32> -> vector<8x128xf32>
    %122 = arith.addf %116, %121 : vector<8x128xf32>
    %c0_117 = arith.constant 0 : index
    %c1_118 = arith.constant 1 : index
    %c0_119 = arith.constant 0 : index
    %123 = vector.load %arg14[%c0_117, %c1_118, %c0_119] : memref<2x9x144xf32, #tpu.memory_space<vmem>>, vector<1x8x144xf32>
    %124 = vector.shape_cast %123 : vector<1x8x144xf32> to vector<8x144xf32>
    %c2_120 = arith.constant 2 : index
    %c0_121 = arith.constant 0 : index
    %c0_122 = arith.constant 0 : index
    %125 = vector.load %arg4[%c2_120, %c0_121, %c0_122] : memref<4x144x128xf32, #tpu.memory_space<vmem>>, vector<1x144x128xf32>
    %126 = vector.shape_cast %125 : vector<1x144x128xf32> to vector<144x128xf32>
    %cst_123 = arith.constant dense<0.000000e+00> : vector<8x128xf32>
    %127 = tpu.matmul %124, %126, %cst_123 {dimension_numbers = #tpu.dot_dimension_numbers<[1], [0], [0], [1], [0, 0, 1, 1], [], []>} : vector<8x144xf32>, vector<144x128xf32>, vector<8x128xf32> -> vector<8x128xf32>
    %128 = arith.addf %122, %127 : vector<8x128xf32>
    %c1_124 = arith.constant 1 : index
    %c1_125 = arith.constant 1 : index
    %c0_126 = arith.constant 0 : index
    %129 = vector.load %arg14[%c1_124, %c1_125, %c0_126] : memref<2x9x144xf32, #tpu.memory_space<vmem>>, vector<1x8x144xf32>
    %130 = vector.shape_cast %129 : vector<1x8x144xf32> to vector<8x144xf32>
    %c3_127 = arith.constant 3 : index
    %c0_128 = arith.constant 0 : index
    %c0_129 = arith.constant 0 : index
    %131 = vector.load %arg4[%c3_127, %c0_128, %c0_129] : memref<4x144x128xf32, #tpu.memory_space<vmem>>, vector<1x144x128xf32>
    %132 = vector.shape_cast %131 : vector<1x144x128xf32> to vector<144x128xf32>
    %cst_130 = arith.constant dense<0.000000e+00> : vector<8x128xf32>
    %133 = tpu.matmul %130, %132, %cst_130 {dimension_numbers = #tpu.dot_dimension_numbers<[1], [0], [0], [1], [0, 0, 1, 1], [], []>} : vector<8x144xf32>, vector<144x128xf32>, vector<8x128xf32> -> vector<8x128xf32>
    %134 = arith.addf %128, %133 : vector<8x128xf32>
    %c0_131 = arith.constant 0 : index
    %c0_132 = arith.constant 0 : index
    %135 = vector.load %arg5[%c0_131, %c0_132] : memref<1x128xf32, #tpu.memory_space<vmem>>, vector<1x128xf32>
    %136 = vector.broadcast %135 : vector<1x128xf32> to vector<8x128xf32>
    %137 = arith.addf %134, %136 : vector<8x128xf32>
    %cst_133 = arith.constant 0.000000e+00 : f32
    %138 = vector.broadcast %cst_133 : f32 to vector<8x128xf32>
    %139 = arith.maximumf %137, %138 : vector<8x128xf32>
    %140 = vector.extract_strided_slice %139 {offsets = [0, 0], sizes = [1, 128], strides = [1, 1]} : vector<8x128xf32> to vector<1x128xf32>
    %c1_134 = arith.constant 1 : index
    %c0_135 = arith.constant 0 : index
    %c0_136 = arith.constant 0 : index
    %141 = vector.load %arg15[%c1_134, %c0_135, %c0_136] : memref<2x5x160xf32, #tpu.memory_space<vmem>>, vector<1x1x128xf32>
    %142 = vector.shape_cast %141 : vector<1x1x128xf32> to vector<1x128xf32>
    %143 = vector.shape_cast %140 : vector<1x128xf32> to vector<1x1x128xf32>
    tpu.vector_store %arg15[%c1_134, %c0_135, %c0_136], %143 {strides = array<i32>} : memref<2x5x160xf32, #tpu.memory_space<vmem>>, vector<1x1x128xf32>,
    %144 = vector.extract_strided_slice %139 {offsets = [1, 0], sizes = [1, 128], strides = [1, 1]} : vector<8x128xf32> to vector<1x128xf32>
    %c0_137 = arith.constant 0 : index
    %c1_138 = arith.constant 1 : index
    %c0_139 = arith.constant 0 : index
    %145 = vector.load %arg15[%c0_137, %c1_138, %c0_139] : memref<2x5x160xf32, #tpu.memory_space<vmem>>, vector<1x1x128xf32>
    %146 = vector.shape_cast %145 : vector<1x1x128xf32> to vector<1x128xf32>
    %147 = vector.shape_cast %144 : vector<1x128xf32> to vector<1x1x128xf32>
    tpu.vector_store %arg15[%c0_137, %c1_138, %c0_139], %147 {strides = array<i32>} : memref<2x5x160xf32, #tpu.memory_space<vmem>>, vector<1x1x128xf32>,
    %148 = vector.extract_strided_slice %139 {offsets = [2, 0], sizes = [1, 128], strides = [1, 1]} : vector<8x128xf32> to vector<1x128xf32>
    %c1_140 = arith.constant 1 : index
    %c1_141 = arith.constant 1 : index
    %c0_142 = arith.constant 0 : index
    %149 = vector.load %arg15[%c1_140, %c1_141, %c0_142] : memref<2x5x160xf32, #tpu.memory_space<vmem>>, vector<1x1x128xf32>
    %150 = vector.shape_cast %149 : vector<1x1x128xf32> to vector<1x128xf32>
    %151 = vector.shape_cast %148 : vector<1x128xf32> to vector<1x1x128xf32>
    tpu.vector_store %arg15[%c1_140, %c1_141, %c0_142], %151 {strides = array<i32>} : memref<2x5x160xf32, #tpu.memory_space<vmem>>, vector<1x1x128xf32>,
    %152 = vector.extract_strided_slice %139 {offsets = [3, 0], sizes = [1, 128], strides = [1, 1]} : vector<8x128xf32> to vector<1x128xf32>
    %c0_143 = arith.constant 0 : index
    %c2_144 = arith.constant 2 : index
    %c0_145 = arith.constant 0 : index
    %153 = vector.load %arg15[%c0_143, %c2_144, %c0_145] : memref<2x5x160xf32, #tpu.memory_space<vmem>>, vector<1x1x128xf32>
    %154 = vector.shape_cast %153 : vector<1x1x128xf32> to vector<1x128xf32>
    %155 = vector.shape_cast %152 : vector<1x128xf32> to vector<1x1x128xf32>
    tpu.vector_store %arg15[%c0_143, %c2_144, %c0_145], %155 {strides = array<i32>} : memref<2x5x160xf32, #tpu.memory_space<vmem>>, vector<1x1x128xf32>,
    %156 = vector.extract_strided_slice %139 {offsets = [4, 0], sizes = [1, 128], strides = [1, 1]} : vector<8x128xf32> to vector<1x128xf32>
    %c1_146 = arith.constant 1 : index
    %c2_147 = arith.constant 2 : index
    %c0_148 = arith.constant 0 : index
    %157 = vector.load %arg15[%c1_146, %c2_147, %c0_148] : memref<2x5x160xf32, #tpu.memory_space<vmem>>, vector<1x1x128xf32>
    %158 = vector.shape_cast %157 : vector<1x1x128xf32> to vector<1x128xf32>
    %159 = vector.shape_cast %156 : vector<1x128xf32> to vector<1x1x128xf32>
    tpu.vector_store %arg15[%c1_146, %c2_147, %c0_148], %159 {strides = array<i32>} : memref<2x5x160xf32, #tpu.memory_space<vmem>>, vector<1x1x128xf32>,
    %160 = vector.extract_strided_slice %139 {offsets = [5, 0], sizes = [1, 128], strides = [1, 1]} : vector<8x128xf32> to vector<1x128xf32>
    %c0_149 = arith.constant 0 : index
    %c3_150 = arith.constant 3 : index
    %c0_151 = arith.constant 0 : index
    %161 = vector.load %arg15[%c0_149, %c3_150, %c0_151] : memref<2x5x160xf32, #tpu.memory_space<vmem>>, vector<1x1x128xf32>
    %162 = vector.shape_cast %161 : vector<1x1x128xf32> to vector<1x128xf32>
    %163 = vector.shape_cast %160 : vector<1x128xf32> to vector<1x1x128xf32>
    tpu.vector_store %arg15[%c0_149, %c3_150, %c0_151], %163 {strides = array<i32>} : memref<2x5x160xf32, #tpu.memory_space<vmem>>, vector<1x1x128xf32>,
    %164 = vector.extract_strided_slice %139 {offsets = [6, 0], sizes = [1, 128], strides = [1, 1]} : vector<8x128xf32> to vector<1x128xf32>
    %c1_152 = arith.constant 1 : index
    %c3_153 = arith.constant 3 : index
    %c0_154 = arith.constant 0 : index
    %165 = vector.load %arg15[%c1_152, %c3_153, %c0_154] : memref<2x5x160xf32, #tpu.memory_space<vmem>>, vector<1x1x128xf32>
    %166 = vector.shape_cast %165 : vector<1x1x128xf32> to vector<1x128xf32>
    %167 = vector.shape_cast %164 : vector<1x128xf32> to vector<1x1x128xf32>
    tpu.vector_store %arg15[%c1_152, %c3_153, %c0_154], %167 {strides = array<i32>} : memref<2x5x160xf32, #tpu.memory_space<vmem>>, vector<1x1x128xf32>,
    %168 = vector.extract_strided_slice %139 {offsets = [7, 0], sizes = [1, 128], strides = [1, 1]} : vector<8x128xf32> to vector<1x128xf32>
    %c0_155 = arith.constant 0 : index
    %c4_156 = arith.constant 4 : index
    %c0_157 = arith.constant 0 : index
    %169 = vector.load %arg15[%c0_155, %c4_156, %c0_157] : memref<2x5x160xf32, #tpu.memory_space<vmem>>, vector<1x1x128xf32>
    %170 = vector.shape_cast %169 : vector<1x1x128xf32> to vector<1x128xf32>
    %171 = vector.shape_cast %168 : vector<1x128xf32> to vector<1x1x128xf32>
    tpu.vector_store %arg15[%c0_155, %c4_156, %c0_157], %171 {strides = array<i32>} : memref<2x5x160xf32, #tpu.memory_space<vmem>>, vector<1x1x128xf32>,
    %c0_158 = arith.constant 0 : index
    %c0_159 = arith.constant 0 : index
    %c0_160 = arith.constant 0 : index
    %172 = vector.load %arg15[%c0_158, %c0_159, %c0_160] : memref<2x5x160xf32, #tpu.memory_space<vmem>>, vector<1x4x160xf32>
    %173 = vector.shape_cast %172 : vector<1x4x160xf32> to vector<4x160xf32>
    %c0_161 = arith.constant 0 : index
    %c0_162 = arith.constant 0 : index
    %c0_163 = arith.constant 0 : index
    %174 = vector.load %arg6[%c0_161, %c0_162, %c0_163] : memref<4x160x128xf32, #tpu.memory_space<vmem>>, vector<1x160x128xf32>
    %175 = vector.shape_cast %174 : vector<1x160x128xf32> to vector<160x128xf32>
    %cst_164 = arith.constant dense<0.000000e+00> : vector<4x128xf32>
    %176 = tpu.matmul %173, %175, %cst_164 {dimension_numbers = #tpu.dot_dimension_numbers<[1], [0], [0], [1], [0, 0, 1, 1], [], []>} : vector<4x160xf32>, vector<160x128xf32>, vector<4x128xf32> -> vector<4x128xf32>
    %c1_165 = arith.constant 1 : index
    %c0_166 = arith.constant 0 : index
    %c0_167 = arith.constant 0 : index
    %177 = vector.load %arg15[%c1_165, %c0_166, %c0_167] : memref<2x5x160xf32, #tpu.memory_space<vmem>>, vector<1x4x160xf32>
    %178 = vector.shape_cast %177 : vector<1x4x160xf32> to vector<4x160xf32>
    %c1_168 = arith.constant 1 : index
    %c0_169 = arith.constant 0 : index
    %c0_170 = arith.constant 0 : index
    %179 = vector.load %arg6[%c1_168, %c0_169, %c0_170] : memref<4x160x128xf32, #tpu.memory_space<vmem>>, vector<1x160x128xf32>
    %180 = vector.shape_cast %179 : vector<1x160x128xf32> to vector<160x128xf32>
    %cst_171 = arith.constant dense<0.000000e+00> : vector<4x128xf32>
    %181 = tpu.matmul %178, %180, %cst_171 {dimension_numbers = #tpu.dot_dimension_numbers<[1], [0], [0], [1], [0, 0, 1, 1], [], []>} : vector<4x160xf32>, vector<160x128xf32>, vector<4x128xf32> -> vector<4x128xf32>
    %182 = arith.addf %176, %181 : vector<4x128xf32>
    %c0_172 = arith.constant 0 : index
    %c1_173 = arith.constant 1 : index
    %c0_174 = arith.constant 0 : index
    %183 = vector.load %arg15[%c0_172, %c1_173, %c0_174] : memref<2x5x160xf32, #tpu.memory_space<vmem>>, vector<1x4x160xf32>
    %184 = vector.shape_cast %183 : vector<1x4x160xf32> to vector<4x160xf32>
    %c2_175 = arith.constant 2 : index
    %c0_176 = arith.constant 0 : index
    %c0_177 = arith.constant 0 : index
    %185 = vector.load %arg6[%c2_175, %c0_176, %c0_177] : memref<4x160x128xf32, #tpu.memory_space<vmem>>, vector<1x160x128xf32>
    %186 = vector.shape_cast %185 : vector<1x160x128xf32> to vector<160x128xf32>
    %cst_178 = arith.constant dense<0.000000e+00> : vector<4x128xf32>
    %187 = tpu.matmul %184, %186, %cst_178 {dimension_numbers = #tpu.dot_dimension_numbers<[1], [0], [0], [1], [0, 0, 1, 1], [], []>} : vector<4x160xf32>, vector<160x128xf32>, vector<4x128xf32> -> vector<4x128xf32>
    %188 = arith.addf %182, %187 : vector<4x128xf32>
    %c1_179 = arith.constant 1 : index
    %c1_180 = arith.constant 1 : index
    %c0_181 = arith.constant 0 : index
    %189 = vector.load %arg15[%c1_179, %c1_180, %c0_181] : memref<2x5x160xf32, #tpu.memory_space<vmem>>, vector<1x4x160xf32>
    %190 = vector.shape_cast %189 : vector<1x4x160xf32> to vector<4x160xf32>
    %c3_182 = arith.constant 3 : index
    %c0_183 = arith.constant 0 : index
    %c0_184 = arith.constant 0 : index
    %191 = vector.load %arg6[%c3_182, %c0_183, %c0_184] : memref<4x160x128xf32, #tpu.memory_space<vmem>>, vector<1x160x128xf32>
    %192 = vector.shape_cast %191 : vector<1x160x128xf32> to vector<160x128xf32>
    %cst_185 = arith.constant dense<0.000000e+00> : vector<4x128xf32>
    %193 = tpu.matmul %190, %192, %cst_185 {dimension_numbers = #tpu.dot_dimension_numbers<[1], [0], [0], [1], [0, 0, 1, 1], [], []>} : vector<4x160xf32>, vector<160x128xf32>, vector<4x128xf32> -> vector<4x128xf32>
    %194 = arith.addf %188, %193 : vector<4x128xf32>
    %c0_186 = arith.constant 0 : index
    %c0_187 = arith.constant 0 : index
    %195 = vector.load %arg7[%c0_186, %c0_187] : memref<1x128xf32, #tpu.memory_space<vmem>>, vector<1x128xf32>
    %196 = vector.broadcast %195 : vector<1x128xf32> to vector<4x128xf32>
    %197 = arith.addf %194, %196 : vector<4x128xf32>
    %cst_188 = arith.constant 0.000000e+00 : f32
    %198 = vector.broadcast %cst_188 : f32 to vector<4x128xf32>
    %199 = arith.maximumf %197, %198 : vector<4x128xf32>
    %200 = vector.extract_strided_slice %199 {offsets = [0, 0], sizes = [1, 128], strides = [1, 1]} : vector<4x128xf32> to vector<1x128xf32>
    %c1_189 = arith.constant 1 : index
    %c0_190 = arith.constant 0 : index
    %c0_191 = arith.constant 0 : index
    %201 = vector.load %arg16[%c1_189, %c0_190, %c0_191] : memref<2x3x192xf32, #tpu.memory_space<vmem>>, vector<1x1x128xf32>
    %202 = vector.shape_cast %201 : vector<1x1x128xf32> to vector<1x128xf32>
    %203 = vector.shape_cast %200 : vector<1x128xf32> to vector<1x1x128xf32>
    tpu.vector_store %arg16[%c1_189, %c0_190, %c0_191], %203 {strides = array<i32>} : memref<2x3x192xf32, #tpu.memory_space<vmem>>, vector<1x1x128xf32>,
    %204 = vector.extract_strided_slice %199 {offsets = [1, 0], sizes = [1, 128], strides = [1, 1]} : vector<4x128xf32> to vector<1x128xf32>
    %c0_192 = arith.constant 0 : index
    %c1_193 = arith.constant 1 : index
    %c0_194 = arith.constant 0 : index
    %205 = vector.load %arg16[%c0_192, %c1_193, %c0_194] : memref<2x3x192xf32, #tpu.memory_space<vmem>>, vector<1x1x128xf32>
    %206 = vector.shape_cast %205 : vector<1x1x128xf32> to vector<1x128xf32>
    %207 = vector.shape_cast %204 : vector<1x128xf32> to vector<1x1x128xf32>
    tpu.vector_store %arg16[%c0_192, %c1_193, %c0_194], %207 {strides = array<i32>} : memref<2x3x192xf32, #tpu.memory_space<vmem>>, vector<1x1x128xf32>,
    %208 = vector.extract_strided_slice %199 {offsets = [2, 0], sizes = [1, 128], strides = [1, 1]} : vector<4x128xf32> to vector<1x128xf32>
    %c1_195 = arith.constant 1 : index
    %c1_196 = arith.constant 1 : index
    %c0_197 = arith.constant 0 : index
    %209 = vector.load %arg16[%c1_195, %c1_196, %c0_197] : memref<2x3x192xf32, #tpu.memory_space<vmem>>, vector<1x1x128xf32>
    %210 = vector.shape_cast %209 : vector<1x1x128xf32> to vector<1x128xf32>
    %211 = vector.shape_cast %208 : vector<1x128xf32> to vector<1x1x128xf32>
    tpu.vector_store %arg16[%c1_195, %c1_196, %c0_197], %211 {strides = array<i32>} : memref<2x3x192xf32, #tpu.memory_space<vmem>>, vector<1x1x128xf32>,
    %212 = vector.extract_strided_slice %199 {offsets = [3, 0], sizes = [1, 128], strides = [1, 1]} : vector<4x128xf32> to vector<1x128xf32>
    %c0_198 = arith.constant 0 : index
    %c2_199 = arith.constant 2 : index
    %c0_200 = arith.constant 0 : index
    %213 = vector.load %arg16[%c0_198, %c2_199, %c0_200] : memref<2x3x192xf32, #tpu.memory_space<vmem>>, vector<1x1x128xf32>
    %214 = vector.shape_cast %213 : vector<1x1x128xf32> to vector<1x128xf32>
    %215 = vector.shape_cast %212 : vector<1x128xf32> to vector<1x1x128xf32>
    tpu.vector_store %arg16[%c0_198, %c2_199, %c0_200], %215 {strides = array<i32>} : memref<2x3x192xf32, #tpu.memory_space<vmem>>, vector<1x1x128xf32>,
    %c0_201 = arith.constant 0 : index
    %c0_202 = arith.constant 0 : index
    %c0_203 = arith.constant 0 : index
    %216 = vector.load %arg16[%c0_201, %c0_202, %c0_203] : memref<2x3x192xf32, #tpu.memory_space<vmem>>, vector<1x2x192xf32>
    %217 = vector.shape_cast %216 : vector<1x2x192xf32> to vector<2x192xf32>
    %c0_204 = arith.constant 0 : index
    %c0_205 = arith.constant 0 : index
    %c0_206 = arith.constant 0 : index
    %218 = vector.load %arg8[%c0_204, %c0_205, %c0_206] : memref<4x192x128xf32, #tpu.memory_space<vmem>>, vector<1x192x128xf32>
    %219 = vector.shape_cast %218 : vector<1x192x128xf32> to vector<192x128xf32>
    %cst_207 = arith.constant dense<0.000000e+00> : vector<2x128xf32>
    %220 = tpu.matmul %217, %219, %cst_207 {dimension_numbers = #tpu.dot_dimension_numbers<[1], [0], [0], [1], [0, 0, 1, 1], [], []>} : vector<2x192xf32>, vector<192x128xf32>, vector<2x128xf32> -> vector<2x128xf32>
    %c1_208 = arith.constant 1 : index
    %c0_209 = arith.constant 0 : index
    %c0_210 = arith.constant 0 : index
    %221 = vector.load %arg16[%c1_208, %c0_209, %c0_210] : memref<2x3x192xf32, #tpu.memory_space<vmem>>, vector<1x2x192xf32>
    %222 = vector.shape_cast %221 : vector<1x2x192xf32> to vector<2x192xf32>
    %c1_211 = arith.constant 1 : index
    %c0_212 = arith.constant 0 : index
    %c0_213 = arith.constant 0 : index
    %223 = vector.load %arg8[%c1_211, %c0_212, %c0_213] : memref<4x192x128xf32, #tpu.memory_space<vmem>>, vector<1x192x128xf32>
    %224 = vector.shape_cast %223 : vector<1x192x128xf32> to vector<192x128xf32>
    %cst_214 = arith.constant dense<0.000000e+00> : vector<2x128xf32>
    %225 = tpu.matmul %222, %224, %cst_214 {dimension_numbers = #tpu.dot_dimension_numbers<[1], [0], [0], [1], [0, 0, 1, 1], [], []>} : vector<2x192xf32>, vector<192x128xf32>, vector<2x128xf32> -> vector<2x128xf32>
    %226 = arith.addf %220, %225 : vector<2x128xf32>
    %c0_215 = arith.constant 0 : index
    %c1_216 = arith.constant 1 : index
    %c0_217 = arith.constant 0 : index
    %227 = vector.load %arg16[%c0_215, %c1_216, %c0_217] : memref<2x3x192xf32, #tpu.memory_space<vmem>>, vector<1x2x192xf32>
    %228 = vector.shape_cast %227 : vector<1x2x192xf32> to vector<2x192xf32>
    %c2_218 = arith.constant 2 : index
    %c0_219 = arith.constant 0 : index
    %c0_220 = arith.constant 0 : index
    %229 = vector.load %arg8[%c2_218, %c0_219, %c0_220] : memref<4x192x128xf32, #tpu.memory_space<vmem>>, vector<1x192x128xf32>
    %230 = vector.shape_cast %229 : vector<1x192x128xf32> to vector<192x128xf32>
    %cst_221 = arith.constant dense<0.000000e+00> : vector<2x128xf32>
    %231 = tpu.matmul %228, %230, %cst_221 {dimension_numbers = #tpu.dot_dimension_numbers<[1], [0], [0], [1], [0, 0, 1, 1], [], []>} : vector<2x192xf32>, vector<192x128xf32>, vector<2x128xf32> -> vector<2x128xf32>
    %232 = arith.addf %226, %231 : vector<2x128xf32>
    %c1_222 = arith.constant 1 : index
    %c1_223 = arith.constant 1 : index
    %c0_224 = arith.constant 0 : index
    %233 = vector.load %arg16[%c1_222, %c1_223, %c0_224] : memref<2x3x192xf32, #tpu.memory_space<vmem>>, vector<1x2x192xf32>
    %234 = vector.shape_cast %233 : vector<1x2x192xf32> to vector<2x192xf32>
    %c3_225 = arith.constant 3 : index
    %c0_226 = arith.constant 0 : index
    %c0_227 = arith.constant 0 : index
    %235 = vector.load %arg8[%c3_225, %c0_226, %c0_227] : memref<4x192x128xf32, #tpu.memory_space<vmem>>, vector<1x192x128xf32>
    %236 = vector.shape_cast %235 : vector<1x192x128xf32> to vector<192x128xf32>
    %cst_228 = arith.constant dense<0.000000e+00> : vector<2x128xf32>
    %237 = tpu.matmul %234, %236, %cst_228 {dimension_numbers = #tpu.dot_dimension_numbers<[1], [0], [0], [1], [0, 0, 1, 1], [], []>} : vector<2x192xf32>, vector<192x128xf32>, vector<2x128xf32> -> vector<2x128xf32>
    %238 = arith.addf %232, %237 : vector<2x128xf32>
    %c0_229 = arith.constant 0 : index
    %c0_230 = arith.constant 0 : index
    %239 = vector.load %arg9[%c0_229, %c0_230] : memref<1x128xf32, #tpu.memory_space<vmem>>, vector<1x128xf32>
    %240 = vector.broadcast %239 : vector<1x128xf32> to vector<2x128xf32>
    %241 = arith.addf %238, %240 : vector<2x128xf32>
    %cst_231 = arith.constant 0.000000e+00 : f32
    %242 = vector.broadcast %cst_231 : f32 to vector<2x128xf32>
    %243 = arith.maximumf %241, %242 : vector<2x128xf32>
    %244 = vector.extract_strided_slice %243 {offsets = [0, 0], sizes = [1, 128], strides = [1, 1]} : vector<2x128xf32> to vector<1x128xf32>
    %c1_232 = arith.constant 1 : index
    %c0_233 = arith.constant 0 : index
    %c0_234 = arith.constant 0 : index
    %245 = vector.load %arg17[%c1_232, %c0_233, %c0_234] : memref<2x2x256xf32, #tpu.memory_space<vmem>>, vector<1x1x128xf32>
    %246 = vector.shape_cast %245 : vector<1x1x128xf32> to vector<1x128xf32>
    %247 = vector.shape_cast %244 : vector<1x128xf32> to vector<1x1x128xf32>
    tpu.vector_store %arg17[%c1_232, %c0_233, %c0_234], %247 {strides = array<i32>} : memref<2x2x256xf32, #tpu.memory_space<vmem>>, vector<1x1x128xf32>,
    %248 = vector.extract_strided_slice %243 {offsets = [1, 0], sizes = [1, 128], strides = [1, 1]} : vector<2x128xf32> to vector<1x128xf32>
    %c0_235 = arith.constant 0 : index
    %c1_236 = arith.constant 1 : index
    %c0_237 = arith.constant 0 : index
    %249 = vector.load %arg17[%c0_235, %c1_236, %c0_237] : memref<2x2x256xf32, #tpu.memory_space<vmem>>, vector<1x1x128xf32>
    %250 = vector.shape_cast %249 : vector<1x1x128xf32> to vector<1x128xf32>
    %251 = vector.shape_cast %248 : vector<1x128xf32> to vector<1x1x128xf32>
    tpu.vector_store %arg17[%c0_235, %c1_236, %c0_237], %251 {strides = array<i32>} : memref<2x2x256xf32, #tpu.memory_space<vmem>>, vector<1x1x128xf32>,
    %c0_238 = arith.constant 0 : index
    %c0_239 = arith.constant 0 : index
    %c0_240 = arith.constant 0 : index
    %252 = vector.load %arg17[%c0_238, %c0_239, %c0_240] : memref<2x2x256xf32, #tpu.memory_space<vmem>>, vector<1x1x256xf32>
    %253 = vector.shape_cast %252 : vector<1x1x256xf32> to vector<1x256xf32>
    %c0_241 = arith.constant 0 : index
    %c0_242 = arith.constant 0 : index
    %c0_243 = arith.constant 0 : index
    %254 = vector.load %arg10[%c0_241, %c0_242, %c0_243] : memref<4x256x128xf32, #tpu.memory_space<vmem>>, vector<1x256x128xf32>
    %255 = vector.shape_cast %254 : vector<1x256x128xf32> to vector<256x128xf32>
    %cst_244 = arith.constant dense<0.000000e+00> : vector<1x128xf32>
    %256 = tpu.matmul %253, %255, %cst_244 {dimension_numbers = #tpu.dot_dimension_numbers<[1], [0], [0], [1], [0, 0, 1, 1], [], []>} : vector<1x256xf32>, vector<256x128xf32>, vector<1x128xf32> -> vector<1x128xf32>
    %c1_245 = arith.constant 1 : index
    %c0_246 = arith.constant 0 : index
    %c0_247 = arith.constant 0 : index
    %257 = vector.load %arg17[%c1_245, %c0_246, %c0_247] : memref<2x2x256xf32, #tpu.memory_space<vmem>>, vector<1x1x256xf32>
    %258 = vector.shape_cast %257 : vector<1x1x256xf32> to vector<1x256xf32>
    %c1_248 = arith.constant 1 : index
    %c0_249 = arith.constant 0 : index
    %c0_250 = arith.constant 0 : index
    %259 = vector.load %arg10[%c1_248, %c0_249, %c0_250] : memref<4x256x128xf32, #tpu.memory_space<vmem>>, vector<1x256x128xf32>
    %260 = vector.shape_cast %259 : vector<1x256x128xf32> to vector<256x128xf32>
    %cst_251 = arith.constant dense<0.000000e+00> : vector<1x128xf32>
    %261 = tpu.matmul %258, %260, %cst_251 {dimension_numbers = #tpu.dot_dimension_numbers<[1], [0], [0], [1], [0, 0, 1, 1], [], []>} : vector<1x256xf32>, vector<256x128xf32>, vector<1x128xf32> -> vector<1x128xf32>
    %262 = arith.addf %256, %261 : vector<1x128xf32>
    %c0_252 = arith.constant 0 : index
    %c1_253 = arith.constant 1 : index
    %c0_254 = arith.constant 0 : index
    %263 = vector.load %arg17[%c0_252, %c1_253, %c0_254] : memref<2x2x256xf32, #tpu.memory_space<vmem>>, vector<1x1x256xf32>
    %264 = vector.shape_cast %263 : vector<1x1x256xf32> to vector<1x256xf32>
    %c2_255 = arith.constant 2 : index
    %c0_256 = arith.constant 0 : index
    %c0_257 = arith.constant 0 : index
    %265 = vector.load %arg10[%c2_255, %c0_256, %c0_257] : memref<4x256x128xf32, #tpu.memory_space<vmem>>, vector<1x256x128xf32>
    %266 = vector.shape_cast %265 : vector<1x256x128xf32> to vector<256x128xf32>
    %cst_258 = arith.constant dense<0.000000e+00> : vector<1x128xf32>
    %267 = tpu.matmul %264, %266, %cst_258 {dimension_numbers = #tpu.dot_dimension_numbers<[1], [0], [0], [1], [0, 0, 1, 1], [], []>} : vector<1x256xf32>, vector<256x128xf32>, vector<1x128xf32> -> vector<1x128xf32>
    %268 = arith.addf %262, %267 : vector<1x128xf32>
    %c1_259 = arith.constant 1 : index
    %c1_260 = arith.constant 1 : index
    %c0_261 = arith.constant 0 : index
    %269 = vector.load %arg17[%c1_259, %c1_260, %c0_261] : memref<2x2x256xf32, #tpu.memory_space<vmem>>, vector<1x1x256xf32>
    %270 = vector.shape_cast %269 : vector<1x1x256xf32> to vector<1x256xf32>
    %c3_262 = arith.constant 3 : index
    %c0_263 = arith.constant 0 : index
    %c0_264 = arith.constant 0 : index
    %271 = vector.load %arg10[%c3_262, %c0_263, %c0_264] : memref<4x256x128xf32, #tpu.memory_space<vmem>>, vector<1x256x128xf32>
    %272 = vector.shape_cast %271 : vector<1x256x128xf32> to vector<256x128xf32>
    %cst_265 = arith.constant dense<0.000000e+00> : vector<1x128xf32>
    %273 = tpu.matmul %270, %272, %cst_265 {dimension_numbers = #tpu.dot_dimension_numbers<[1], [0], [0], [1], [0, 0, 1, 1], [], []>} : vector<1x256xf32>, vector<256x128xf32>, vector<1x128xf32> -> vector<1x128xf32>
    %274 = arith.addf %268, %273 : vector<1x128xf32>
    %c0_266 = arith.constant 0 : index
    %c0_267 = arith.constant 0 : index
    %275 = vector.load %arg11[%c0_266, %c0_267] : memref<1x128xf32, #tpu.memory_space<vmem>>, vector<1x128xf32>
    %276 = arith.addf %274, %275 : vector<1x128xf32>
    %cst_268 = arith.constant 0.000000e+00 : f32
    %277 = vector.broadcast %cst_268 : f32 to vector<1x128xf32>
    %278 = arith.maximumf %276, %277 : vector<1x128xf32>
    %c0_269 = arith.constant 0 : index
    %c0_270 = arith.constant 0 : index
    %c0_271 = arith.constant 0 : index
    %279 = vector.load %arg12[%c0_269, %c0_270, %c0_271] : memref<1x1x128xf32, #tpu.memory_space<vmem>>, vector<1x1x128xf32>
    %280 = vector.shape_cast %279 : vector<1x1x128xf32> to vector<1x128xf32>
    %281 = vector.shape_cast %278 : vector<1x128xf32> to vector<1x1x128xf32>
    tpu.vector_store %arg12[%c0_269, %c0_270, %c0_271], %281 {strides = array<i32>} : memref<1x1x128xf32, #tpu.memory_space<vmem>>, vector<1x1x128xf32>,
    return
  }
  func.func @transform_0(%arg0: i32) -> (i32, i32, i32, i32) {
    %c0_i32 = arith.constant 0 : i32
    %c0_i32_0 = arith.constant 0 : i32
    %c0_i32_1 = arith.constant 0 : i32
    %c0_i32_2 = arith.constant 0 : i32
    return %arg0, %c0_i32, %c0_i32_0, %c0_i32_1 : i32, i32, i32, i32
  }
  func.func @transform_1(%arg0: i32) -> (i32, i32, i32) {
    %c0_i32 = arith.constant 0 : i32
    %c0_i32_0 = arith.constant 0 : i32
    %c0_i32_1 = arith.constant 0 : i32
    %c0_i32_2 = arith.constant 0 : i32
    return %c0_i32, %c0_i32_0, %c0_i32_1 : i32, i32, i32
  }
  func.func @transform_2(%arg0: i32) -> (i32, i32) {
    %c0_i32 = arith.constant 0 : i32
    %c0_i32_0 = arith.constant 0 : i32
    %c0_i32_1 = arith.constant 0 : i32
    return %c0_i32, %c0_i32_0 : i32, i32
  }
  func.func @transform_3(%arg0: i32) -> (i32, i32, i32) {
    %c0_i32 = arith.constant 0 : i32
    %c0_i32_0 = arith.constant 0 : i32
    %c0_i32_1 = arith.constant 0 : i32
    %c0_i32_2 = arith.constant 0 : i32
    return %c0_i32, %c0_i32_0, %c0_i32_1 : i32, i32, i32
  }
  func.func @transform_4(%arg0: i32) -> (i32, i32) {
    %c0_i32 = arith.constant 0 : i32
    %c0_i32_0 = arith.constant 0 : i32
    %c0_i32_1 = arith.constant 0 : i32
    return %c0_i32, %c0_i32_0 : i32, i32
  }
  func.func @transform_5(%arg0: i32) -> (i32, i32, i32) {
    %c0_i32 = arith.constant 0 : i32
    %c0_i32_0 = arith.constant 0 : i32
    %c0_i32_1 = arith.constant 0 : i32
    %c0_i32_2 = arith.constant 0 : i32
    return %c0_i32, %c0_i32_0, %c0_i32_1 : i32, i32, i32
  }
  func.func @transform_6(%arg0: i32) -> (i32, i32) {
    %c0_i32 = arith.constant 0 : i32
    %c0_i32_0 = arith.constant 0 : i32
    %c0_i32_1 = arith.constant 0 : i32
    return %c0_i32, %c0_i32_0 : i32, i32
  }
  func.func @transform_7(%arg0: i32) -> (i32, i32, i32) {
    %c0_i32 = arith.constant 0 : i32
    %c0_i32_0 = arith.constant 0 : i32
    %c0_i32_1 = arith.constant 0 : i32
    %c0_i32_2 = arith.constant 0 : i32
    return %c0_i32, %c0_i32_0, %c0_i32_1 : i32, i32, i32
  }
  func.func @transform_8(%arg0: i32) -> (i32, i32) {
    %c0_i32 = arith.constant 0 : i32
    %c0_i32_0 = arith.constant 0 : i32
    %c0_i32_1 = arith.constant 0 : i32
    return %c0_i32, %c0_i32_0 : i32, i32
  }
  func.func @transform_9(%arg0: i32) -> (i32, i32, i32) {
    %c0_i32 = arith.constant 0 : i32
    %c0_i32_0 = arith.constant 0 : i32
    %c0_i32_1 = arith.constant 0 : i32
    %c0_i32_2 = arith.constant 0 : i32
    return %c0_i32, %c0_i32_0, %c0_i32_1 : i32, i32, i32
  }
  func.func @transform_10(%arg0: i32) -> (i32, i32) {
    %c0_i32 = arith.constant 0 : i32
    %c0_i32_0 = arith.constant 0 : i32
    %c0_i32_1 = arith.constant 0 : i32
    return %c0_i32, %c0_i32_0 : i32, i32
  }
  func.func @transform_11(%arg0: i32) -> (i32, i32, i32) {
    %c0_i32 = arith.constant 0 : i32
    %c0_i32_0 = arith.constant 0 : i32
    %c0_i32_1 = arith.constant 0 : i32
    return %arg0, %c0_i32, %c0_i32_0 : i32, i32, i32
  }
}

</mosaic_0001>

<bundles_post_ra>
// kernel: forward.1
= control target key start
LH: loop header
LB: loop body
LE: loop exit
PB: predicated region body
PF: predicated region fallthrough
CT: control target
= control target key end

     0   :  { %16 = vsyncpa [#allocation8], 0  ;;  %s5783_s0 = inlined_call_operand.vmem [shape: f32[2,2,16,128], index: 0, kind: input, shape index: {}]   ;;  %s5784_s1 = inlined_call_operand.vmem [shape: f32[4,136,128], index: 1, kind: input, shape index: {}]   ;;  %s5785_s2 = inlined_call_operand.vmem [shape: f32[1,128], index: 2, kind: input, shape index: {}]   ;;  %s5786_s3 = inlined_call_operand.vmem [shape: f32[4,144,128], index: 3, kind: input, shape index: {}]   ;;  %s5787_s4 = inlined_call_operand.vmem [shape: f32[1,128], index: 4, kind: input, shape index: {}]   ;;  %s5788_s5 = inlined_call_operand.vmem [shape: f32[4,160,128], index: 5, kind: input, shape index: {}]   ;;  %s5789_s6 = inlined_call_operand.vmem [shape: f32[1,128], index: 6, kind: input, shape index: {}]   ;;  %s5790_s7 = inlined_call_operand.vmem [shape: f32[4,192,128], index: 7, kind: input, shape index: {}]   ;;  %s5791_s8 = inlined_call_operand.vmem [shape: f32[1,128], index: 8, kind: input, shape index: {}]   ;;  %s5792_s9 = inlined_call_operand.vmem [shape: f32[4,256,128], index: 9, kind: input, shape index: {}]   ;;  %s5793_s10 = inlined_call_operand.vmem [shape: f32[1,128], index: 10, kind: input, shape index: {}]   ;;  %s5794_s11 = inlined_call_operand.hbm [shape: f32[2,1,128], index: 11, kind: output, shape index: {}]  }
   0x1   :  { %18 = vsyncpa [#allocation8 + $0x1], 0  ;;  %s4052_s17 = smov 0   ;;  %s4054_s18 = smov 0  }
   0x2   :  { %s4056_s19 = smov 0   ;;  %s4058_s20 = smov 0  }
   0x3 LB: > { %5796 = sst [smem:[#allocation10_spill]] %s3982_s19  ;;  %s4073_s21 = sadd.s32 4294967295, %s3986_s20   ;;  %s3986_s20 = sphi %s4058_s20, %s5804_s20   ;;  %s3982_s19 = sphi %s4056_s19, %s5801_s19   ;;  %s3978_s18 = sphi %s4054_s18, %s5803_s18   ;;  %s3974_s17 = sphi %s4052_s17, %s5802_s17  }
   0x4   : > { %s2769_s22 = sadd.s32 4294967294, %s3986_s20   ;;  %s4077_s23 = sadd.s32 1, %s3986_s20  }
   0x5   : > { %s267_s24 = sadd.s32 1, %s3982_s19  ;;  %s264_s25 = ssub.s32 %s3986_s20, %s4077_s23 }
   0x6   : > { %p277_p0 = scmp.ne.s32.totalorder %s3982_s19, %s3978_s18  ;;  %p265_p1 = scmp.eq.s32.totalorder %s264_s25, 0 }
   0x7   : > { %p278_p2 = scmp.eq.s32.totalorder %s4073_s21, 1  ;;  %p283_p3 = scmp.ne.s32.totalorder %s3978_s18, %s3974_s17 }
   0x8   : > { %p284_p4 = scmp.eq.s32.totalorder %s2769_s22, 1  ;;  %p2772_p7 = scmp.ge.s32.totalorder %s3986_s20, 1 }
   0x9   : > { %s4088_s26 = scalar_select %p265_p1, %s3982_s19, %s267_s24  }
   0xa   : > { %p4090_p5 = por %p278_p2, %p277_p0  ;;  %p4094_p6 = por %p284_p4, %p283_p3 }
   0xb   : > { %5797 = sst [smem:[#allocation11_spill]] %s4088_s26  ;;  %p340_p8 = scmp.lt.s32.totalorder %s3986_s20, 3 }
   0xd   : > { %p341_p9 = pnand %p2772_p7, %p340_p8 }
   0xe   : > { %v2777_v0 = vld [vmem:[%s5784_s1 + $0x88] sm:$0xff] (!%p341_p9)  ;;  %v2778_v1 = vld [vmem:[%s5784_s1 + $0x90] sm:$0xff] (!%p341_p9)  ;;  %v444_v2 = vld [vmem:[%s5784_s1] sm:$0xff] (!%p341_p9)  ;;  %vm385_vm0 = vcmask (!%p341_p9), 64512   ;;  %v3988_v3 = vmov (!%p341_p9), 0.0|0.0   ;;  %v3989_v8 = vmov (!%p341_p9), 0.0  }
   0xf   : > { %344 = sbr.rel (%p341_p9) target bundleno = 1411 (0x583), region = 64  ;;  %3282 = vmatprep.subr.bf16.mxu0 (!%p341_p9), %v3988_v3  ;;  %v3283_v4 = vpack.c.bf16 (!%p341_p9), %v2778_v1, %v2777_v0  ;;  %3306 = vmatprep.subr.bf16.mxu1 (!%p341_p9), %v3988_v3  ;;  %v445_v5 = vld [vmem:[%s5784_s1 + $0x8] sm:$0xff] (!%p341_p9)  ;;  %v2779_v6 = vld [vmem:[%s5784_s1 + $0x98] sm:$0xff] (!%p341_p9)  ;;  %v2780_v7 = vld [vmem:[%s5784_s1 + $0xa0] sm:$0xff] (!%p341_p9)  ;;  %384 = vst [vmem:[#allocation2] sm:$0xff] (!%p341_p9), %v3989_v8  ;;  %p379_p10 = scmp.lt.s32.totalorder (!%p341_p9), %s4073_s21, 1 }
  0x10   : > { %389 = vst [vmem:[#allocation2 + $0x20] sm:$0x1] (!%p341_p9), %v3989_v8  ;;  %396 = vst [vmem:[#allocation2 + $0x50] sm:$0x1] (!%p341_p9), %v3989_v8  ;;  %v3307_v9 = vpack.c.bf16 (!%p341_p9), %v445_v5, %v444_v2  ;;  %v446_v10 = vld [vmem:[%s5784_s1 + $0x10] sm:$0xff] (!%p341_p9)  ;;  %v447_v11 = vld [vmem:[%s5784_s1 + $0x18] sm:$0xff] (!%p341_p9)  ;;  %v3286_v12 = vpack.c.bf16 (!%p341_p9), %v2780_v7, %v2779_v6 }
  0x11   : > { %398 = vst [vmem:[#allocation3] sm:$0xff] (!%p341_p9), %v3989_v8  ;;  %401 = vst [vmem:[#allocation3 + $0x10] sm:$0x1] (!%p341_p9), %v3989_v8  ;;  %vm390_vm1 = vcmask (!%p341_p9), 57344   ;;  %3284 = vmatpush1.bf16.msra.mxu0 (!%p341_p9), %v3283_v4  ;;  %v3310_v13 = vpack.c.bf16 (!%p341_p9), %v447_v11, %v446_v10  ;;  %v2781_v14 = vld [vmem:[%s5784_s1 + $0xa8] sm:$0xff] (!%p341_p9)  ;;  %v2782_v15 = vld [vmem:[%s5784_s1 + $0xb0] sm:$0xff] (!%p341_p9) }
  0x12   : > { %404 = vst [vmem:[#allocation3 + $0x20] sm:$0xff] (!%p341_p9), %v3989_v8  ;;  %406 = vst [vmem:[#allocation3 + $0x30] sm:$0x1] (!%p341_p9), %v3989_v8  ;;  %3308 = vmatpush1.bf16.msra.mxu1 (!%p341_p9), %v3307_v9  ;;  %3285 = vmatprep.subr.bf16.mxu0 (!%p341_p9), %v3988_v3  ;;  %v448_v16 = vld [vmem:[%s5784_s1 + $0x20] sm:$0xff] (!%p341_p9)  ;;  %v449_v17 = vld [vmem:[%s5784_s1 + $0x28] sm:$0xff] (!%p341_p9)  ;;  %v3289_v18 = vpack.c.bf16 (!%p341_p9), %v2782_v15, %v2781_v14  ;;  %vm430_vm2 = vcmask (!%p341_p9), 1040384  }
  0x13   : > { %408 = vst [vmem:[#allocation4] sm:$0x1f] (!%p341_p9), %v3989_v8  ;;  %411 = vst [vmem:[#allocation4 + $0x10] sm:$0x1f] (!%p341_p9), %v3989_v8  ;;  %3309 = vmatprep.subr.bf16.mxu1 (!%p341_p9), %v3988_v3  ;;  %v3313_v19 = vpack.c.bf16 (!%p341_p9), %v449_v17, %v448_v16  ;;  %v2783_v20 = vld [vmem:[%s5784_s1 + $0xb8] sm:$0xff] (!%p341_p9)  ;;  %v2784_v21 = vld [vmem:[%s5784_s1 + $0xc0] sm:$0xff] (!%p341_p9) }
  0x14   : > { %418 = vst [vmem:[#allocation6] sm:$0xf] (!%p341_p9), %v3989_v8  ;;  %419 = vst [vmem:[#allocation6 + $0x4] sm:$0xf] (!%p341_p9), %v3989_v8  ;;  %v450_v22 = vld [vmem:[%s5784_s1 + $0x30] sm:$0xff] (!%p341_p9)  ;;  %v451_v23 = vld [vmem:[%s5784_s1 + $0x38] sm:$0xff] (!%p341_p9)  ;;  %v3292_v24 = vpack.c.bf16 (!%p341_p9), %v2784_v21, %v2783_v20 }
  0x15   : > { %393 = vst.msk [vmem:[#allocation2 + $0x38] sm:$0xff] (!%p341_p9), %vm385_vm0, %v3989_v8  ;;  %386 = vst.msk [vmem:[#allocation2 + $0x8] sm:$0xff] (!%p341_p9), %vm385_vm0, %v3989_v8  ;;  %3287 = vmatpush1.bf16.msra.mxu0 (!%p341_p9), %v3286_v12  ;;  %v2785_v25 = vld [vmem:[%s5784_s1 + $0xc8] sm:$0xff] (!%p341_p9)  ;;  %v3316_v28 = vpack.c.bf16 (!%p341_p9), %v451_v23, %v450_v22  ;;  %v2786_v29 = vld [vmem:[%s5784_s1 + $0xd0] sm:$0xff] (!%p341_p9)  ;;  %vm675_vm3 = vcmask (!%p341_p9), 1046528   ;;  %vm399_vm4 = vcmask (!%p341_p9), 130048  }
  0x16   : > { %388 = vst.msk [vmem:[#allocation2 + $0x18] sm:$0xff] %vm385_vm0, %v3989_v8  ;;  %395 = vst.msk [vmem:[#allocation2 + $0x48] sm:$0xff] %vm385_vm0, %v3989_v8  ;;  %s380_s16 = scalar_select %p379_p10, %s4073_s21, 1  ;;  %3311 = vmatpush1.bf16.msra.mxu1 %v3310_v13  ;;  %3288 = vmatprep.subr.bf16.mxu0 %v3988_v3  ;;  %v452_v32 = vld [vmem:[%s5784_s1 + $0x40] sm:$0xff]  ;;  %v453_v33 = vld [vmem:[%s5784_s1 + $0x48] sm:$0xff]  ;;  %v3295_v35 = vpack.c.bf16 %v2786_v29, %v2785_v25  ;;  %vm402_vm5 = vcmask 122880  }
  0x17   : > { %391 = vst.msk [vmem:[#allocation2 + $0x28] sm:$0x1] %vm390_vm1, %v3989_v8  ;;  %397 = vst.msk [vmem:[#allocation2 + $0x58] sm:$0x1] %vm390_vm1, %v3989_v8  ;;  %3312 = vmatprep.subr.bf16.mxu1 %v3988_v3  ;;  %v3319_v36 = vpack.c.bf16 %v453_v33, %v452_v32  ;;  %v2787_v37 = vld [vmem:[%s5784_s1 + $0xd8] sm:$0xff]  ;;  %v2788_v38 = vld [vmem:[%s5784_s1 + $0xe0] sm:$0xff] }
  0x18   : > { %s3141_s15 = sshll.u32 %s380_s16, 5  ;;  %v454_v39 = vld [vmem:[%s5784_s1 + $0x50] sm:$0xff]  ;;  %v455_v40 = vld [vmem:[%s5784_s1 + $0x58] sm:$0xff]  ;;  %v3298_v41 = vpack.c.bf16 %v2788_v38, %v2787_v37  ;;  %v2789_v43 = vld [vmem:[%s5784_s1 + $0xe8] sm:$0xff]  ;;  %400 = vst.msk [vmem:[#allocation3 + $0x8] sm:$0xff] %vm399_vm4, %v3989_v8  ;;  %vm409_vm6 = vcmask 258048  }
  0x19   : > { %s4180_s19 = scalar_lea.vmem %s5783_s0, %s3141_s15  ;;  %3290 = vmatpush1.bf16.msra.mxu0 %v3289_v18  ;;  %v3322_v42 = vpack.c.bf16 %v455_v40, %v454_v39  ;;  %v2790_v44 = vld [vmem:[%s5784_s1 + $0xf0] sm:$0xff]  ;;  %v456_v45 = vld [vmem:[%s5784_s1 + $0x60] sm:$0xff]  ;;  %v457_v46 = vld [vmem:[%s5784_s1 + $0x68] sm:$0xff]  ;;  %405 = vst.msk [vmem:[#allocation3 + $0x28] sm:$0xff] %vm399_vm4, %v3989_v8  ;;  %vm1429_vm7 = vcmask 261120   ;;  %vm413_vm8 = vcmask 1042432  }
  0x1a   : > { %v4186_v27 = vld [vmem:[%s4180_s19] sm:$0xff]  ;;  %3314 = vmatpush1.bf16.msra.mxu1 %v3313_v19  ;;  %3291 = vmatprep.subr.bf16.mxu0 %v3988_v3  ;;  %v2775_v31 = vld [vmem:[%s4180_s19 + $0x10] sm:$0xff]  ;;  %v4232_v47 = vld [vmem:[%s4180_s19 + $0x8] sm:$0xff]  ;;  %v3301_v48 = vpack.c.bf16 %v2790_v44, %v2789_v43  ;;  %v3325_v49 = vpack.c.bf16 %v457_v46, %v456_v45  ;;  %403 = vst.msk [vmem:[#allocation3 + $0x18] sm:$0x1] %vm402_vm5, %v3989_v8  ;;  %vm414_vm9 = vcmask 522244  }
  0x1b   : > { %423 = vst [vmem:[#allocation2 + $0x30] sm:$0xff] %v4186_v27  ;;  %3315 = vmatprep.subr.bf16.mxu1 %v3988_v3  ;;  %v431_v34 = vrot.slane %v2775_v31, 7  ;;  %v2791_v50 = vld [vmem:[%s5784_s1 + $0xf8] sm:$0xff]  ;;  %v2792_v51 = vld [vmem:[%s5784_s1 + $0x100] sm:$0xff]  ;;  %v458_v53 = vld [vmem:[%s5784_s1 + $0x70] sm:$0xff]  ;;  %vm1855_vm11 = vcmask 523264  }
  0x1c   : > { %v462_v26 = vld [vmem:[#allocation2 + $0x38] sm:$0xff]  ;;  %v441_v30 = vld [vmem:[#allocation2 + $0x8] sm:$0xff]  ;;  %v3304_v56 = vpack.c.bf16 %v2792_v51, %v2791_v50  ;;  %v2798_v59 = vld [vmem:[%s5784_s1 + $0x110] sm:$0xff]  ;;  %407 = vst.msk [vmem:[#allocation3 + $0x38] sm:$0x1] %vm402_vm5, %v3989_v8  ;;  %s377_s25 = sand.u32 1, %s3978_s18  }
  0x1d   : > { %2794 = vmatprep.mubr.msk.f32.mxu0 %vm385_vm0, %v462_v26  ;;  %2796 = vmatprep.mubr.msk.f32.mxu1 %vm385_vm0, %v441_v30  ;;  %437 = vst [vmem:[#allocation2] sm:$0xfe] %v431_v34  ;;  %v2776_v52 = vld [vmem:[%s4180_s19 + $0x18] sm:$0xff]  ;;  %v2793_v61 = vld [vmem:[%s5784_s1 + $0x108] sm:$0xff]  ;;  %v2818_v63 = vld [vmem:[%s5784_s1 + $0x1a0] sm:$0xff]  ;;  %s3138_s15 = sshll.u32 %s4073_s21, 4 }
  0x1e   : > { %3293 = vmatpush1.bf16.msra.mxu0 %v3292_v24  ;;  %3317 = vmatpush1.bf16.msra.mxu1 %v3316_v28  ;;  %v459_v54 = vld [vmem:[%s5784_s1 + $0x78] sm:$0xff]  ;;  %v432_v55 = vrot.slane %v2776_v52, 7  ;;  %v460_v0 = vld [vmem:[%s5784_s1 + $0x80] sm:$0xff]  ;;  %v646_v5 = vld [vmem:[#allocation2 + $0x8] sm:$0xfe]  ;;  %s378_s30 = scalar_lea.vmem [#allocation7], %s377_s25  ;;  %s5741_s19 = scalar_lea.hbm %s5794_s11, %s3138_s15 }
  0x1f   : > { %3294 = vmatprep.subr.bf16.mxu0 %v3988_v3  ;;  %3318 = vmatprep.subr.bf16.mxu1 %v3988_v3  ;;  %v3328_v58 = vpack.c.bf16 %v459_v54, %v458_v53  ;;  %v2799_v60 = vld [vmem:[%s5784_s1 + $0x118] sm:$0xff]  ;;  %v2800_v7 = vld [vmem:[%s5784_s1 + $0x120] sm:$0xff]  ;;  %v2801_v9 = vld [vmem:[%s5784_s1 + $0x128] sm:$0xff]  ;;  %v679_v14 = vrot.slane %v646_v5, 1  ;;  %v800_v5 = vrot.slane %v4232_v47, 1  ;;  %s2713_s12 = sshll.u32 %s378_s30, 4  ;;  %s5743_s12 = int_to_ptr.vmem [resolvable:$true] %s2713_s12 }
  0x20   : > { %v4249_v57 = vsel %vm430_vm2, %v431_v34, %v432_v55  ;;  %439 = vst [vmem:[#allocation2 + $0x20] sm:$0x1] %v432_v55  ;;  %v2817_v62 = vld [vmem:[%s5784_s1 + $0x198] sm:$0xff]  ;;  %v3331_v2 = vpack.c.bf16 %v2799_v60, %v2798_v59  ;;  %v2819_v11 = vld [vmem:[%s5784_s1 + $0x1a8] sm:$0xff]  ;;  %v2820_v12 = vld [vmem:[%s5784_s1 + $0x1b0] sm:$0xff]  ;;  %v3334_v16 = vpack.c.bf16 %v2801_v9, %v2800_v7  ;;  %s2701_s14 = scalar_lea.sflag [#allocation8], %s377_s25 }
  0x21   : > { %v4273_v4 = vld [vmem:[#allocation2 + $0x18] sm:$0xff]  ;;  %v3355_v6 = vpack.c.bf16 %v2818_v63, %v2817_v62  ;;  %v4289_v13 = vld [vmem:[#allocation2 + $0x48] sm:$0xff]  ;;  %v3358_v19 = vpack.c.bf16 %v2820_v12, %v2819_v11  ;;  %v2802_v20 = vld [vmem:[%s5784_s1 + $0x130] sm:$0xff]  ;;  %412 = vst.msk [vmem:[#allocation4 + $0x18] sm:$0x1f] %vm409_vm6, %v3989_v8  ;;  %s3924_s22 = scalar_lea.vmem %s5743_s12, 16 }
  0x22   : > { %3296 = vmatpush1.bf16.msra.mxu0 %v3295_v35  ;;  %3320 = vmatpush1.bf16.msra.mxu1 %v3319_v36  ;;  %v770_v10 = vld [vmem:[#allocation2 + $0x38] sm:$0xfe]  ;;  %v680_v15 = vrot.slane %v4273_v4, 1  ;;  %v803_v18 = vrot.slane %v4289_v13, 1  ;;  %v2822_v23 = vld [vmem:[%s5784_s1 + $0x1c0] sm:$0xff]  ;;  %v2805_v29 = vld [vmem:[%s5784_s1 + $0x148] sm:$0xff]  ;;  %p3925_p11 = scmp.ne.s32.totalorder %s5743_s12, %s3924_s22 }
  0x23   : > { %3297 = vmatprep.subr.bf16.mxu0 %v3988_v3  ;;  %3321 = vmatprep.subr.bf16.mxu1 %v3988_v3  ;;  %v802_v17 = vrot.slane %v770_v10, 1  ;;  %v2803_v21 = vld [vmem:[%s5784_s1 + $0x138] sm:$0xff]  ;;  %v2804_v28 = vld [vmem:[%s5784_s1 + $0x140] sm:$0xff]  ;;  %v2823_v30 = vld [vmem:[%s5784_s1 + $0x1c8] sm:$0xff]  ;;  %410 = vst.msk [vmem:[#allocation4 + $0x8] sm:$0x1f] %vm409_vm6, %v3989_v8 }
  0x24   : > { %v440_v1 = vld [vmem:[#allocation2] sm:$0xff]  ;;  %v2821_v22 = vld [vmem:[%s5784_s1 + $0x1b8] sm:$0xff]  ;;  %v681_v24 = vsel %vm675_vm3, %v679_v14, %v680_v15  ;;  %v3337_v25 = vpack.c.bf16 %v2803_v21, %v2802_v20  ;;  %v2824_v31 = vld [vmem:[%s5784_s1 + $0x1d0] sm:$0xff]  ;;  %v3340_v32 = vpack.c.bf16 %v2805_v29, %v2804_v28  ;;  %p3926_p12 = pnand %p3925_p11, %p4090_p5  ;;  %s3991_s21 = smov [#allocation7]  }
  0x25   : > { %v804_v26 = vsel %vm675_vm3, %v802_v17, %v803_v18  ;;  %v3364_v33 = vpack.c.bf16 %v2824_v31, %v2823_v30  ;;  %v2806_v34 = vld [vmem:[%s5784_s1 + $0x150] sm:$0xff]  ;;  %v2807_v35 = vld [vmem:[%s5784_s1 + $0x158] sm:$0xff]  ;;  %v2826_v37 = vld [vmem:[%s5784_s1 + $0x1e0] sm:$0xff]  ;;  %s3928_s24 = sshll.u32 %s3991_s21, 4  ;;  %s3929_s24 = int_to_ptr.vmem [resolvable:$false] %s3928_s24 }
  0x26   : > { %3299 = vmatpush1.bf16.msra.mxu0 %v3298_v41  ;;  %3323 = vmatpush1.bf16.msra.mxu1 %v3322_v42  ;;  %v2825_v36 = vld [vmem:[%s5784_s1 + $0x1d8] sm:$0xff]  ;;  %v3343_v38 = vpack.c.bf16 %v2807_v35, %v2806_v34  ;;  %v2808_v40 = vld [vmem:[%s5784_s1 + $0x160] sm:$0xff]  ;;  %v2809_v41 = vld [vmem:[%s5784_s1 + $0x168] sm:$0xff]  ;;  %p3927_p13 = pneg %p3926_p12  ;;  %s3930_s29 = scalar_lea.vmem %s3929_s24, 32 }
  0x27   : > { %3300 = vmatprep.subr.bf16.mxu0 %v3988_v3  ;;  %3324 = vmatprep.subr.bf16.mxu1 %v3988_v3  ;;  %v3367_v39 = vpack.c.bf16 %v2826_v37, %v2825_v36  ;;  %v2827_v42 = vld [vmem:[%s5784_s1 + $0x1e8] sm:$0xff]  ;;  %v2828_v43 = vld [vmem:[%s5784_s1 + $0x1f0] sm:$0xff]  ;;  %v3346_v44 = vpack.c.bf16 %v2809_v41, %v2808_v40  ;;  %v2830_v50 = vld [vmem:[%s5784_s1 + $0x200] sm:$0xff]  ;;  %p3931_p0 = scmp.lt.s32.totalorder %s5743_s12, %s3929_s24  ;;  %p3932_p1 = scmp.lt.s32.totalorder %s3930_s29, %s3924_s22 }
  0x28   : > { %v3370_v45 = vpack.c.bf16 %v2828_v43, %v2827_v42  ;;  %v2810_v46 = vld [vmem:[%s5784_s1 + $0x170] sm:$0xff]  ;;  %v2812_v53 = vld [vmem:[%s5784_s1 + $0x180] sm:$0xff]  ;;  %v2813_v54 = vld [vmem:[%s5784_s1 + $0x188] sm:$0xff] }
  0x29   : > { %v2831_v55 = vld [vmem:[%s5784_s1 + $0x208] sm:$0xff]  ;;  %v3352_v59 = vpack.c.bf16 %v2813_v54, %v2812_v53  ;;  %v769_v60 = vld [vmem:[#allocation2 + $0x30] sm:$0xfe]  ;;  %v774_v63 = vld [vmem:[#allocation2 + $0x58] sm:$0x1]  ;;  %p3933_p2 = por %p3932_p1, %p3931_p0 }
  0x2a   : > { %3302 = vmatpush1.bf16.msra.mxu0 %v3301_v48  ;;  %3326 = vmatpush1.bf16.msra.mxu1 %v3325_v49  ;;  %v2811_v48 = vld [vmem:[%s5784_s1 + $0x178] sm:$0xff]  ;;  %v649_v7 = vld [vmem:[#allocation2 + $0x20] sm:$0x1]  ;;  %v807_v9 = vrot.slane %v774_v63, 1  ;;  %v773_v10 = vld [vmem:[#allocation2 + $0x50] sm:$0x1] }
  0x2b   : > { %3303 = vmatprep.subr.bf16.mxu0 %v3988_v3  ;;  %3327 = vmatprep.subr.bf16.mxu1 %v3988_v3  ;;  %v2829_v49 = vld [vmem:[%s5784_s1 + $0x1f8] sm:$0xff]  ;;  %v3349_v51 = vpack.c.bf16 %v2811_v48, %v2810_v46  ;;  %v2814_v11 = vld [vmem:[%s5784_s1 + $0x190] sm:$0xff]  ;;  %v805_v17 = vrot.slane %v773_v10, 1  ;;  %v2843_v36 = vld [vmem:[%s5786_s3 + $0xc0] sm:$0xff]  ;;  %p3934_p3 = pnand %p3933_p2, %p3927_p13 }
  0x2c   : > { %v3373_v52 = vpack.c.bf16 %v2830_v50, %v2829_v49  ;;  %v2841_v30 = vld [vmem:[%s5786_s3 + $0xb0] sm:$0xff]  ;;  %v2842_v31 = vld [vmem:[%s5786_s3 + $0xb8] sm:$0xff]  ;;  %v2844_v37 = vld [vmem:[%s5786_s3 + $0xc8] sm:$0xff] }
  0x2d   : > { %v806_v21 = vsel %vm675_vm3, %v800_v5, %v805_v17  ;;  %v3385_v34 = vpack.c.bf16 %v2842_v31, %v2841_v30  ;;  %v3388_v40 = vpack.c.bf16 %v2844_v37, %v2843_v36  ;;  %v2845_v42 = vld [vmem:[%s5786_s3 + $0xd0] sm:$0xff]  ;;  %v2846_v43 = vld [vmem:[%s5786_s3 + $0xd8] sm:$0xff]  ;;  %v961_v46 = vld [vmem:[%s5786_s3 + $0x48] sm:$0xff] }
  0x2e   : > { %3305 = vmatpush1.bf16.msra.mxu0 %v3304_v56  ;;  %3329 = vmatpush1.bf16.msra.mxu1 %v3328_v58  ;;  %v2832_v56 = vld [vmem:[%s5784_s1 + $0x210] sm:$0xff]  ;;  %v645_v58 = vld [vmem:[#allocation2] sm:$0xfe]  ;;  %v2848_v50 = vld [vmem:[%s5786_s3 + $0xe8] sm:$0xff] }
  0x2f   : > { %521 = vmatprep.subr.mxu0 %v3989_v8  ;;  %602 = vmatprep.subr.mxu1 %v3989_v8  ;;  %v3376_v62 = vpack.c.bf16 %v2832_v56, %v2831_v55  ;;  %v2847_v49 = vld [vmem:[%s5786_s3 + $0xe0] sm:$0xff]  ;;  %v963_v53 = vld [vmem:[%s5786_s3 + $0x58] sm:$0xff]  ;;  %v2849_v55 = vld [vmem:[%s5786_s3 + $0xf0] sm:$0xff] }
  0x30   : > { %v2850_v56 = vld [vmem:[%s5786_s3 + $0xf8] sm:$0xff]  ;;  %v2852_v63 = vld [vmem:[%s5786_s3 + $0x108] sm:$0xff]  ;;  %vm415_vm10 = vmor %vm414_vm9, %vm413_vm8 }
  0x31   : > { %416 = vst.msk [vmem:[#allocation5] sm:$0x77] %vm415_vm10, %v3989_v8  ;;  %417 = vst.msk [vmem:[#allocation5 + $0x8] sm:$0x77] %vm415_vm10, %v3989_v8 }
  0x32   : > { %522 = vmatpush1.msra.mxu0 %v2793_v61  ;;  %603 = vmatpush1.msra.mxu1 %v460_v0  ;;  %v650_v61 = vld [vmem:[#allocation2 + $0x28] sm:$0x1]  ;;  %v676_v0 = vrot.slane %v645_v58, 1  ;;  %v964_v58 = vld [vmem:[%s5786_s3 + $0x60] sm:$0xff] }
  0x33   : > { %554 = vmatmul.mubr.f32.vlgmr.msra.gmra.mrb[0].mxu0 %v4186_v27  ;;  %3330 = vmatprep.subr.bf16.mxu0 %v3988_v3  ;;  %v3361_v27 = vpack.c.bf16 %v2822_v23, %v2821_v22  ;;  %v953_v22 = vld [vmem:[%s5786_s3 + $0x8] sm:$0xff]  ;;  %v2839_v23 = vld [vmem:[%s5786_s3 + $0xa0] sm:$0xff] }
  0x34   : > { %635 = vmatmul.mubr.f32.vlgmr.msra.gmra.mrb[0].mxu1 %v440_v1  ;;  %3332 = vmatpush1.bf16.msra.mxu0 %v3331_v2  ;;  %v677_v1 = vrot.slane %v4249_v57, 1  ;;  %v799_v2 = vrot.slane %v769_v60, 1  ;;  %v965_v60 = vld [vmem:[%s5786_s3 + $0x68] sm:$0xff] }
  0x35   : > { %3354 = vmatprep.subr.bf16.mxu1 %v3988_v3  ;;  %3333 = vmatprep.subr.bf16.mxu0 %v3988_v3 }
  0x36   : > { %3356 = vmatpush1.bf16.msra.mxu1 %v3355_v6  ;;  %2795 = vmatprep.mubr.msk.f32.mxu0 %vm385_vm0, %v4289_v13  ;;  %v684_v6 = vrot.slane %v650_v61, 1  ;;  %v678_v12 = vsel %vm675_vm3, %v676_v0, %v677_v1  ;;  %v801_v14 = vsel %vm675_vm3, %v799_v2, %v800_v5  ;;  %v2838_v13 = vld [vmem:[%s5786_s3 + $0x98] sm:$0xff]  ;;  %v3424_v61 = vpack.c.bf16 %v965_v60, %v964_v58  ;;  %v966_v0 = vld [vmem:[%s5786_s3 + $0x70] sm:$0xff]  ;;  %v1245_v58 = vld [vmem:[#allocation3 + $0x28] sm:$0xfe] }
  0x37   : > { %3357 = vmatprep.subr.bf16.mxu1 %v3988_v3  ;;  %559 = vmatmul.mubr.f32.gmra.mrb[2].mxu0 %v4232_v47  ;;  %v2833_v47 = vld [vmem:[%s5784_s1 + $0x218] sm:$0xff]  ;;  %v2858_v60 = vld [vmem:[%s5786_s3 + $0x128] sm:$0xff] }
  0x38   : > { %2797 = vmatprep.mubr.msk.f32.mxu1 %vm385_vm0, %v4273_v4  ;;  %3335 = vmatpush1.bf16.msra.mxu0 %v3334_v16  ;;  %v685_v16 = vsel %vm675_vm3, %v680_v15, %v684_v6  ;;  %v2837_v4 = vld [vmem:[%s5786_s3 + $0x90] sm:$0xff]  ;;  %v952_v15 = vld [vmem:[%s5786_s3] sm:$0xff]  ;;  %v967_v2 = vld [vmem:[%s5786_s3 + $0x78] sm:$0xff] }
  0x39   : > { %640 = vmatmul.mubr.f32.gmra.mrb[2].mxu1 %v4249_v57  ;;  %3336 = vmatprep.subr.bf16.mxu0 %v3988_v3  ;;  %v682_v57 = vrot.slane %v649_v7, 1  ;;  %v3427_v5 = vpack.c.bf16 %v967_v2, %v966_v0  ;;  %v2853_v6 = vld [vmem:[%s5786_s3 + $0x110] sm:$0xff]  ;;  %v2854_v7 = vld [vmem:[%s5786_s3 + $0x118] sm:$0xff] }
  0x3a   : > { %3359 = vmatpush1.bf16.msra.mxu1 %v3358_v19  ;;  %2815 = vmatprep.mubr.msk.f32.mxu0 %vm385_vm0, %v681_v24  ;;  %v808_v19 = vsel %vm675_vm3, %v803_v18, %v807_v9  ;;  %v3379_v18 = vpack.c.bf16 %v2838_v13, %v2837_v4  ;;  %v2840_v24 = vld [vmem:[%s5786_s3 + $0xa8] sm:$0xff]  ;;  %v968_v9 = vld [vmem:[%s5786_s3 + $0x80] sm:$0xff]  ;;  %v3403_v10 = vpack.c.bf16 %v2854_v7, %v2853_v6  ;;  %v2859_v7 = vld [vmem:[%s5786_s3 + $0x130] sm:$0xff] }
  0x3b   : > { %3360 = vmatprep.subr.bf16.mxu1 %v3988_v3  ;;  %2834 = vmatprep.mubr.msk.f32.mxu1 %vm385_vm0, %v804_v26  ;;  %v683_v20 = vsel %vm675_vm3, %v677_v1, %v682_v57  ;;  %v954_v26 = vld [vmem:[%s5786_s3 + $0x10] sm:$0xff]  ;;  %v3382_v28 = vpack.c.bf16 %v2840_v24, %v2839_v23  ;;  %v951_v57 = vld [vmem:[#allocation3 + $0x8] sm:$0xff] }
  0x3c   : > { %3338 = vmatpush1.bf16.msra.mxu0 %v3337_v25  ;;  %v3406_v25 = vpack.c.bf16 %v953_v22, %v952_v15 }
  0x3d   : > { %3339 = vmatprep.subr.bf16.mxu0 %v3988_v3 }
  0x3e   : > { %3362 = vmatpush1.bf16.msra.mxu1 %v3361_v27  ;;  %v955_v27 = vld [vmem:[%s5786_s3 + $0x18] sm:$0xff] }
  0x3f   : > { %3363 = vmatprep.subr.bf16.mxu1 %v3988_v3  ;;  %v3409_v29 = vpack.c.bf16 %v955_v27, %v954_v26  ;;  %v2836_v26 = vld [vmem:[%s5785_s2] ss:$0 sm:$0xff] }
  0x40   : > { %3341 = vmatpush1.bf16.msra.mxu0 %v3340_v32  ;;  %v956_v32 = vld [vmem:[%s5786_s3 + $0x20] sm:$0xff] }
  0x41   : > { %3342 = vmatprep.subr.bf16.mxu0 %v3988_v3 }
  0x42   : > { %3365 = vmatpush1.bf16.msra.mxu1 %v3364_v33  ;;  %v957_v33 = vld [vmem:[%s5786_s3 + $0x28] sm:$0xff] }
  0x43   : > { %3366 = vmatprep.subr.bf16.mxu1 %v3988_v3  ;;  %v3412_v35 = vpack.c.bf16 %v957_v33, %v956_v32 }
  0x44   : > { %3344 = vmatpush1.bf16.msra.mxu0 %v3343_v38  ;;  %v958_v38 = vld [vmem:[%s5786_s3 + $0x30] sm:$0xff] }
  0x45   : > { %3345 = vmatprep.subr.bf16.mxu0 %v3988_v3 }
  0x46   : > { %3368 = vmatpush1.bf16.msra.mxu1 %v3367_v39  ;;  %v959_v39 = vld [vmem:[%s5786_s3 + $0x38] sm:$0xff] }
  0x47   : > { %3369 = vmatprep.subr.bf16.mxu1 %v3988_v3  ;;  %v3415_v41 = vpack.c.bf16 %v959_v39, %v958_v38 }
  0x48   : > { %3347 = vmatpush1.bf16.msra.mxu0 %v3346_v44  ;;  %v960_v44 = vld [vmem:[%s5786_s3 + $0x40] sm:$0xff] }
  0x49   : > { %3348 = vmatprep.subr.bf16.mxu0 %v3988_v3  ;;  %v3418_v48 = vpack.c.bf16 %v961_v46, %v960_v44 }
  0x4a   : > { %3371 = vmatpush1.bf16.msra.mxu1 %v3370_v45  ;;  %v3391_v45 = vpack.c.bf16 %v2846_v43, %v2845_v42 }
  0x4b   : > { %3372 = vmatprep.subr.bf16.mxu1 %v3988_v3 }
  0x4c   : > { %3350 = vmatpush1.bf16.msra.mxu0 %v3349_v51  ;;  %v962_v51 = vld [vmem:[%s5786_s3 + $0x50] sm:$0xff] }
  0x4d   : > { %3351 = vmatprep.subr.bf16.mxu0 %v3988_v3  ;;  %v3421_v54 = vpack.c.bf16 %v963_v53, %v962_v51 }
  0x4e   : > { %3374 = vmatpush1.bf16.msra.mxu1 %v3373_v52  ;;  %v3394_v52 = vpack.c.bf16 %v2848_v50, %v2847_v49 }
  0x4f   : > { %3375 = vmatprep.subr.bf16.mxu1 %v3988_v3 }
  0x50   : > { %3353 = vmatpush1.bf16.msra.mxu0 %v3352_v59  ;;  %v3397_v59 = vpack.c.bf16 %v2850_v56, %v2849_v55  ;;  %v1138_v55 = vld [vmem:[#allocation3 + $0x8] sm:$0xfe]  ;;  %v1140_v56 = vld [vmem:[#allocation3 + $0x18] sm:$0x1] }
  0x51   : > { %724 = vmatprep.subr.mxu0 %v3989_v8  ;;  %v1168_v0 = vrot.slane %v1140_v56, 1  ;;  %v1246_v56 = vld [vmem:[#allocation3 + $0x30] sm:$0x1] }
  0x52   : > { %3377 = vmatpush1.bf16.msra.mxu1 %v3376_v62  ;;  %v2851_v62 = vld [vmem:[%s5786_s3 + $0x100] sm:$0xff] }
  0x53   : > { %847 = vmatprep.subr.mxu1 %v3989_v8  ;;  %v3400_v1 = vpack.c.bf16 %v2852_v63, %v2851_v62  ;;  %v2877_v62 = vld [vmem:[%s5786_s3 + $0x1b8] sm:$0xff]  ;;  %v1167_v63 = vrot.slane %v1138_v55, 1  ;;  %v1820_v8 = vld [vmem:[%s5790_s7 + $0x88] sm:$0xff] }
  0x54   : > { %725 = vmatpush1.msra.mxu0 %v2814_v11  ;;  %v969_v11 = vld [vmem:[%s5786_s3 + $0x88] sm:$0xff]  ;;  %v2893_v55 = vld [vmem:[%s5786_s3 + $0x238] sm:$0xff] }
  0x55   : > { %757 = vmatmul.mubr.f32.vlgmr.msra.gmra.mrb[4].mxu0 %v678_v12  ;;  %3378 = vmatprep.subr.bf16.mxu0 %v3988_v3  ;;  %v3430_v12 = vpack.c.bf16 %v969_v11, %v968_v9  ;;  %v2860_v9 = vld [vmem:[%s5786_s3 + $0x138] sm:$0xff]  ;;  %v2879_v11 = vld [vmem:[%s5786_s3 + $0x1c8] sm:$0xff] }
  0x56   : > { %848 = vmatpush1.msra.mxu1 %v2833_v47  ;;  %2816 = vmatprep.mubr.msk.f32.mxu0 %vm385_vm0, %v685_v16  ;;  %v971_v47 = vld [vmem:[#allocation3 + $0x28] sm:$0xff] }
  0x57   : > { %880 = vmatmul.mubr.f32.vlgmr.msra.gmra.mrb[4].mxu1 %v801_v14  ;;  %3405 = vmatprep.subr.bf16.mxu1 %v3988_v3 }
  0x58   : > { %2835 = vmatprep.mubr.msk.f32.mxu1 %vm385_vm0, %v808_v19  ;;  %3380 = vmatpush1.bf16.msra.mxu0 %v3379_v18 }
  0x59   : > { %762 = vmatmul.mubr.f32.gmra.mrb[6].mxu0 %v683_v20  ;;  %3407 = vmatpush1.bf16.msra.mxu1 %v3406_v25 }
  0x5a   : > { %3381 = vmatprep.subr.bf16.mxu0 %v3988_v3  ;;  %3408 = vmatprep.subr.bf16.mxu1 %v3988_v3 }
  0x5b   : > { %885 = vmatmul.mubr.f32.gmra.mrb[6].mxu1 %v806_v21  ;;  %2855 = vmatprep.mubr.msk.f32.mxu0 %vm399_vm4, %v971_v47 }
  0x5c   : > { %3383 = vmatpush1.bf16.msra.mxu0 %v3382_v28  ;;  %2856 = vmatprep.mubr.msk.f32.mxu1 %vm399_vm4, %v951_v57  ;;  %v1169_v57 = vsel %vm675_vm3, %v1167_v63, %v1168_v0 }
  0x5d   : > { %3410 = vmatpush1.bf16.msra.mxu1 %v3409_v29  ;;  %3384 = vmatprep.subr.bf16.mxu0 %v3988_v3 }
  0x5e   : > { %3411 = vmatprep.subr.bf16.mxu1 %v3988_v3 }
  0x60   : > { %3386 = vmatpush1.bf16.msra.mxu0 %v3385_v34 }
  0x61   : > { %3413 = vmatpush1.bf16.msra.mxu1 %v3412_v35  ;;  %3387 = vmatprep.subr.bf16.mxu0 %v3988_v3 }
  0x62   : > { %3414 = vmatprep.subr.bf16.mxu1 %v3988_v3 }
  0x64   : > { %3389 = vmatpush1.bf16.msra.mxu0 %v3388_v40 }
  0x65   : > { %3416 = vmatpush1.bf16.msra.mxu1 %v3415_v41  ;;  %3390 = vmatprep.subr.bf16.mxu0 %v3988_v3 }
  0x66   : > { %3417 = vmatprep.subr.bf16.mxu1 %v3988_v3 }
  0x68   : > { %3392 = vmatpush1.bf16.msra.mxu0 %v3391_v45 }
  0x69   : > { %3419 = vmatpush1.bf16.msra.mxu1 %v3418_v48  ;;  %3393 = vmatprep.subr.bf16.mxu0 %v3988_v3 }
  0x6a   : > { %3420 = vmatprep.subr.bf16.mxu1 %v3988_v3 }
  0x6c   : > { %3395 = vmatpush1.bf16.msra.mxu0 %v3394_v52 }
  0x6d   : > { %3422 = vmatpush1.bf16.msra.mxu1 %v3421_v54  ;;  %3396 = vmatprep.subr.bf16.mxu0 %v3988_v3  ;;  %v2857_v54 = vld [vmem:[%s5786_s3 + $0x120] sm:$0xff] }
  0x6e   : > { %3423 = vmatprep.subr.bf16.mxu1 %v3988_v3 }
  0x70   : > { %3398 = vmatpush1.bf16.msra.mxu0 %v3397_v59  ;;  %v1247_v59 = vld [vmem:[#allocation3 + $0x38] sm:$0x1] }
  0x71   : > { %3425 = vmatpush1.bf16.msra.mxu1 %v3424_v61  ;;  %3399 = vmatprep.subr.bf16.mxu0 %v3988_v3  ;;  %v2876_v61 = vld [vmem:[%s5786_s3 + $0x1b0] sm:$0xff]  ;;  %v1275_v2 = vrot.slane %v1247_v59, 1 }
  0x72   : > { %3426 = vmatprep.subr.bf16.mxu1 %v3988_v3  ;;  %v3460_v6 = vpack.c.bf16 %v2877_v62, %v2876_v61 }
  0x74   : > { %3401 = vmatpush1.bf16.msra.mxu0 %v3400_v1  ;;  %v1274_v1 = vrot.slane %v1245_v58, 1 }
  0x75   : > { %3428 = vmatpush1.bf16.msra.mxu1 %v3427_v5  ;;  %3402 = vmatprep.subr.bf16.mxu0 %v3988_v3  ;;  %v3433_v5 = vpack.c.bf16 %v2858_v60, %v2857_v54  ;;  %v2892_v54 = vld [vmem:[%s5786_s3 + $0x230] sm:$0xff] }
  0x76   : > { %3429 = vmatprep.subr.bf16.mxu1 %v3988_v3  ;;  %v3484_v62 = vpack.c.bf16 %v2893_v55, %v2892_v54  ;;  %v2912_v54 = vld [vmem:[%s5788_s5 + $0x120] sm:$0xff]  ;;  %v2913_v55 = vld [vmem:[%s5788_s5 + $0x128] sm:$0xff] }
  0x78   : > { %3404 = vmatpush1.bf16.msra.mxu0 %v3403_v10  ;;  %v2878_v10 = vld [vmem:[%s5786_s3 + $0x1c0] sm:$0xff] }
  0x79   : > { %3431 = vmatpush1.bf16.msra.mxu1 %v3430_v12  ;;  %3432 = vmatprep.subr.bf16.mxu0 %v3988_v3 }
  0x7a   : > { %3459 = vmatprep.subr.bf16.mxu1 %v3988_v3 }
 0x106   : > { %v555_v14 = vpop.f32.mrb[0].mxu0 }
 0x107   : > { %v557_v16 = vpop.f32.mrb[1].mxu0  ;;  %v636_v17 = vpop.f32.mrb[0].mxu1 }
 0x108   : > { %v637_v19 = vadd.f32 %v636_v17, %v555_v14  ;;  %v638_v20 = vpop.f32.mrb[1].mxu1  ;;  %v1276_v14 = vsel %vm675_vm3, %v1274_v1, %v1275_v2  ;;  %v3436_v16 = vpack.c.bf16 %v2860_v9, %v2859_v7  ;;  %v3463_v17 = vpack.c.bf16 %v2879_v11, %v2878_v10  ;;  %v2896_v7 = vld [vmem:[%s5788_s5 + $0xa0] sm:$0xff]  ;;  %v2897_v9 = vld [vmem:[%s5788_s5 + $0xa8] sm:$0xff] }
 0x109   : > { %v2862_v20 = vld [vmem:[%s5786_s3 + $0x148] sm:$0xff]  ;;  %v1272_v2 = vrot.slane %v1246_v56, 1  ;;  %v1386_v10 = vld [vmem:[%s5788_s5] sm:$0xff]  ;;  %v3487_v11 = vpack.c.bf16 %v2897_v9, %v2896_v7 }
 0x10a   : > { %v560_v21 = vpop.f32.mrb[2].mxu0  ;;  %v1402_v56 = vld [vmem:[%s5788_s5 + $0x80] sm:$0xff] }
 0x10b   : > { %v562_v4 = vpop.f32.mrb[3].mxu0 }
 0x10c   : > { %v641_v13 = vpop.f32.mrb[2].mxu1  ;;  %v2881_v4 = vld [vmem:[%s5786_s3 + $0x1d8] sm:$0xff] }
 0x10d   : > { %v642_v15 = vadd.f32 %v641_v13, %v560_v21  ;;  %v643_v18 = vpop.f32.mrb[3].mxu1  ;;  %v2880_v21 = vld [vmem:[%s5786_s3 + $0x1d0] sm:$0xff] }
 0x10e   : > { %v2863_v18 = vld [vmem:[%s5786_s3 + $0x150] sm:$0xff] }
 0x128   : > { %v758_v22 = vpop.f32.mrb[4].mxu0 }
 0x129   : > { %v767_v23 = vadd.f32 %v758_v22, %v637_v19  ;;  %v760_v24 = vpop.f32.mrb[5].mxu0  ;;  %v2861_v19 = vld [vmem:[%s5786_s3 + $0x140] sm:$0xff]  ;;  %v2864_v22 = vld [vmem:[%s5786_s3 + $0x158] sm:$0xff] }
 0x12a   : > { %v881_v25 = vpop.f32.mrb[4].mxu1  ;;  %v3439_v13 = vpack.c.bf16 %v2862_v20, %v2861_v19  ;;  %v2883_v24 = vld [vmem:[%s5786_s3 + $0x1e8] sm:$0xff] }
 0x12b   : > { %v883_v27 = vpop.f32.mrb[5].mxu1  ;;  %v890_v28 = vadd.f32 %v881_v25, %v767_v23  ;;  %v2882_v23 = vld [vmem:[%s5786_s3 + $0x1e0] sm:$0xff]  ;;  %v3442_v25 = vpack.c.bf16 %v2864_v22, %v2863_v18 }
 0x12c   : > { %v763_v29 = vpop.f32.mrb[6].mxu0  ;;  %v2865_v27 = vld [vmem:[%s5786_s3 + $0x160] sm:$0xff] }
 0x12d   : > { %v899_v30 = vadd.f32 %v2836_v26, %v890_v28  ;;  %v768_v31 = vadd.f32 %v763_v29, %v642_v15  ;;  %v765_v32 = vpop.f32.mrb[7].mxu0  ;;  %v3466_v15 = vpack.c.bf16 %v2881_v4, %v2880_v21  ;;  %v2866_v28 = vld [vmem:[%s5786_s3 + $0x168] sm:$0xff]  ;;  %v2884_v29 = vld [vmem:[%s5786_s3 + $0x1f0] sm:$0xff]  ;;  %v2900_v21 = vld [vmem:[%s5788_s5 + $0xc0] sm:$0xff] }
 0x12e   : > { %v886_v33 = vpop.f32.mrb[6].mxu1  ;;  %v2901_v4 = vld [vmem:[%s5788_s5 + $0xc8] sm:$0xff] }
 0x12f   : > { %v888_v34 = vpop.f32.mrb[7].mxu1  ;;  %v901_v35 = vmax.f32 %v899_v30, 0.0  ;;  %v891_v36 = vadd.f32 %v886_v33, %v768_v31  ;;  %v2885_v30 = vld [vmem:[%s5786_s3 + $0x1f8] sm:$0xff]  ;;  %v3445_v31 = vpack.c.bf16 %v2866_v28, %v2865_v27  ;;  %v2867_v33 = vld [vmem:[%s5786_s3 + $0x170] sm:$0xff]  ;;  %v3493_v18 = vpack.c.bf16 %v2901_v4, %v2900_v21 }
 0x130   : > { %v3472_v32 = vpack.c.bf16 %v2885_v30, %v2884_v29  ;;  %v2868_v34 = vld [vmem:[%s5786_s3 + $0x178] sm:$0xff]  ;;  %v2904_v29 = vld [vmem:[%s5788_s5 + $0xe0] sm:$0xff]  ;;  %v2905_v30 = vld [vmem:[%s5788_s5 + $0xe8] sm:$0xff] }
 0x131   : > { %904 = vst [vmem:[#allocation3 + $0x20] sm:$0x1] %v901_v35  ;;  %v906_v37 = vrot.slane %v901_v35, 1  ;;  %v909_v38 = vrot.slane %v901_v35, 2  ;;  %v912_v39 = vrot.slane %v901_v35, 3  ;;  %v915_v40 = vrot.slane %v901_v35, 4 }
 0x132   : > { %v918_v41 = vrot.slane %v901_v35, 5  ;;  %v921_v42 = vrot.slane %v901_v35, 6  ;;  %v924_v43 = vrot.slane %v901_v35, 7  ;;  %v900_v44 = vadd.f32 %v2836_v26, %v891_v36  ;;  %v2886_v35 = vld [vmem:[%s5786_s3 + $0x200] sm:$0xff]  ;;  %v2887_v36 = vld [vmem:[%s5786_s3 + $0x208] sm:$0xff] }
 0x133   : > { %908 = vst [vmem:[#allocation3 + $0x1] sm:$0x1] %v906_v37  ;;  %911 = vst [vmem:[#allocation3 + $0x21] sm:$0x1] %v909_v38  ;;  %v3469_v26 = vpack.c.bf16 %v2883_v24, %v2882_v23  ;;  %v3448_v37 = vpack.c.bf16 %v2868_v34, %v2867_v33  ;;  %v3475_v38 = vpack.c.bf16 %v2887_v36, %v2886_v35  ;;  %v2902_v23 = vld [vmem:[%s5788_s5 + $0xd0] sm:$0xff]  ;;  %v2903_v24 = vld [vmem:[%s5788_s5 + $0xd8] sm:$0xff] }
 0x134   : > { %914 = vst [vmem:[#allocation3 + $0x2] sm:$0x1] %v912_v39  ;;  %917 = vst [vmem:[#allocation3 + $0x22] sm:$0x1] %v915_v40  ;;  %v902_v45 = vmax.f32 %v900_v44, 0.0  ;;  %v2869_v39 = vld [vmem:[%s5786_s3 + $0x180] sm:$0xff]  ;;  %v3496_v27 = vpack.c.bf16 %v2903_v24, %v2902_v23  ;;  %v3499_v33 = vpack.c.bf16 %v2905_v30, %v2904_v29 }
 0x135   : > { %920 = vst [vmem:[#allocation3 + $0x3] sm:$0x1] %v918_v41  ;;  %923 = vst [vmem:[#allocation3 + $0x23] sm:$0x1] %v921_v42  ;;  %v2870_v40 = vld [vmem:[%s5786_s3 + $0x188] sm:$0xff]  ;;  %v2888_v41 = vld [vmem:[%s5786_s3 + $0x210] sm:$0xff] }
 0x136   : > { %926 = vst [vmem:[#allocation3 + $0x4] sm:$0x1] %v924_v43  ;;  %927 = vst [vmem:[#allocation3 + $0x24] sm:$0x1] %v902_v45  ;;  %v929_v46 = vrot.slane %v902_v45, 1  ;;  %v932_v48 = vrot.slane %v902_v45, 2  ;;  %v3451_v43 = vpack.c.bf16 %v2870_v40, %v2869_v39 }
 0x137   : > { %v935_v49 = vrot.slane %v902_v45, 3  ;;  %v938_v50 = vrot.slane %v902_v45, 4  ;;  %v941_v51 = vrot.slane %v902_v45, 5  ;;  %v944_v52 = vrot.slane %v902_v45, 6  ;;  %v2889_v42 = vld [vmem:[%s5786_s3 + $0x218] sm:$0xff]  ;;  %v2906_v35 = vld [vmem:[%s5788_s5 + $0xf0] sm:$0xff] }
 0x138   : > { %v947_v53 = vrot.slane %v902_v45, 7  ;;  %931 = vst [vmem:[#allocation3 + $0x5] sm:$0x1] %v929_v46  ;;  %934 = vst [vmem:[#allocation3 + $0x25] sm:$0x1] %v932_v48  ;;  %v3478_v44 = vpack.c.bf16 %v2889_v42, %v2888_v41  ;;  %v2871_v45 = vld [vmem:[%s5786_s3 + $0x190] sm:$0xff] }
 0x139   : > { %937 = vst [vmem:[#allocation3 + $0x6] sm:$0x1] %v935_v49  ;;  %940 = vst [vmem:[#allocation3 + $0x26] sm:$0x1] %v938_v50  ;;  %v2872_v46 = vld [vmem:[%s5786_s3 + $0x198] sm:$0xff]  ;;  %v2890_v48 = vld [vmem:[%s5786_s3 + $0x220] sm:$0xff] }
 0x13a   : > { %943 = vst [vmem:[#allocation3 + $0x7] sm:$0x1] %v941_v51  ;;  %946 = vst [vmem:[#allocation3 + $0x27] sm:$0x1] %v944_v52  ;;  %v2891_v49 = vld [vmem:[%s5786_s3 + $0x228] sm:$0xff]  ;;  %v3454_v50 = vpack.c.bf16 %v2872_v46, %v2871_v45  ;;  %v2873_v52 = vld [vmem:[%s5786_s3 + $0x1a0] sm:$0xff] }
 0x13b   : > { %949 = vst [vmem:[#allocation3 + $0x10] sm:$0x1] %v947_v53  ;;  %v3481_v51 = vpack.c.bf16 %v2891_v49, %v2890_v48  ;;  %v2874_v53 = vld [vmem:[%s5786_s3 + $0x1a8] sm:$0xff]  ;;  %v2907_v36 = vld [vmem:[%s5788_s5 + $0xf8] sm:$0xff]  ;;  %v2908_v41 = vld [vmem:[%s5788_s5 + $0x100] sm:$0xff] }
 0x13c   : > { %v3457_v61 = vpack.c.bf16 %v2874_v53, %v2873_v52  ;;  %v3502_v39 = vpack.c.bf16 %v2907_v36, %v2906_v35  ;;  %v2909_v42 = vld [vmem:[%s5788_s5 + $0x108] sm:$0xff]  ;;  %v2910_v48 = vld [vmem:[%s5788_s5 + $0x110] sm:$0xff]  ;;  %v2911_v49 = vld [vmem:[%s5788_s5 + $0x118] sm:$0xff] }
 0x13d   : > { %v1399_v45 = vld [vmem:[%s5788_s5 + $0x68] sm:$0xff]  ;;  %v1401_v52 = vld [vmem:[%s5788_s5 + $0x78] sm:$0xff]  ;;  %v2941_v36 = vld [vmem:[%s5788_s5 + $0x1f0] sm:$0xff] }
 0x13e   : > { %v2940_v29 = vld [vmem:[%s5788_s5 + $0x1e8] sm:$0xff]  ;;  %v2921_v35 = vld [vmem:[%s5788_s5 + $0x158] sm:$0xff] }
 0x13f   : > { %v1577_v30 = vld [vmem:[#allocation4 + $0x8] sm:$0x1e] }
 0x141   : > { %v970_v12 = vld [vmem:[#allocation3 + $0x20] sm:$0xff] }
 0x142   : > { %v950_v47 = vld [vmem:[#allocation3] sm:$0xff]  ;;  %1059 = vmatmul.mubr.f32.vlgmr.msra.gmra.mrb[8].mxu0 %v970_v12  ;;  %v1139_v59 = vld [vmem:[#allocation3 + $0x10] sm:$0x1]  ;;  %v1387_v12 = vld [vmem:[%s5788_s5 + $0x8] sm:$0xff] }
 0x143   : > { %1132 = vmatmul.mubr.f32.vlgmr.msra.gmra.mrb[8].mxu1 %v950_v47  ;;  %3434 = vmatpush1.bf16.msra.mxu0 %v3433_v5  ;;  %v1137_v58 = vld [vmem:[#allocation3] sm:$0xfe]  ;;  %v1165_v0 = vrot.slane %v1139_v59, 1  ;;  %v2898_v47 = vld [vmem:[%s5788_s5 + $0xb0] sm:$0xff]  ;;  %v1403_v59 = vld [vmem:[%s5788_s5 + $0x88] sm:$0xff] }
 0x144   : > { %3461 = vmatpush1.bf16.msra.mxu1 %v3460_v6  ;;  %3435 = vmatprep.subr.bf16.mxu0 %v3988_v3  ;;  %v1244_v60 = vld [vmem:[#allocation3 + $0x20] sm:$0xfe]  ;;  %v1164_v63 = vrot.slane %v1137_v58, 1  ;;  %v3511_v58 = vpack.c.bf16 %v2913_v55, %v2912_v54  ;;  %v2946_v54 = vld [vmem:[%s5788_s5 + $0x218] sm:$0xff] }
 0x145   : > { %3462 = vmatprep.subr.bf16.mxu1 %v3988_v3  ;;  %2875 = vmatprep.mubr.msk.f32.mxu0 %vm399_vm4, %v1169_v57  ;;  %v1271_v1 = vrot.slane %v1244_v60, 1  ;;  %v2899_v57 = vld [vmem:[%s5788_s5 + $0xb8] sm:$0xff]  ;;  %v3541_v60 = vpack.c.bf16 %v1403_v59, %v1402_v56  ;;  %v2927_v59 = vld [vmem:[%s5788_s5 + $0x188] sm:$0xff] }
 0x146   : > { %2894 = vmatprep.mubr.msk.f32.mxu1 %vm399_vm4, %v1276_v14  ;;  %v1166_v5 = vsel %vm675_vm3, %v1164_v63, %v1165_v0  ;;  %v3517_v14 = vpack.c.bf16 %v1387_v12, %v1386_v10  ;;  %v3490_v19 = vpack.c.bf16 %v2899_v57, %v2898_v47  ;;  %v1404_v63 = vld [vmem:[%s5788_s5 + $0x90] sm:$0xff] }
 0x147   : > { %3437 = vmatpush1.bf16.msra.mxu0 %v3436_v16  ;;  %v1273_v6 = vsel %vm675_vm3, %v1271_v1, %v1272_v2  ;;  %v1388_v16 = vld [vmem:[%s5788_s5 + $0x10] sm:$0xff]  ;;  %v1405_v1 = vld [vmem:[%s5788_s5 + $0x98] sm:$0xff] }
 0x148   : > { %3464 = vmatpush1.bf16.msra.mxu1 %v3463_v17  ;;  %3438 = vmatprep.subr.bf16.mxu0 %v3988_v3  ;;  %v1389_v17 = vld [vmem:[%s5788_s5 + $0x18] sm:$0xff]  ;;  %v3544_v2 = vpack.c.bf16 %v1405_v1, %v1404_v63 }
 0x149   : > { %3465 = vmatprep.subr.bf16.mxu1 %v3988_v3  ;;  %v3520_v20 = vpack.c.bf16 %v1389_v17, %v1388_v16  ;;  %v2929_v1 = vld [vmem:[%s5788_s5 + $0x198] sm:$0xff] }
 0x14b   : > { %3440 = vmatpush1.bf16.msra.mxu0 %v3439_v13  ;;  %v1390_v13 = vld [vmem:[%s5788_s5 + $0x20] sm:$0xff] }
 0x14c   : > { %3467 = vmatpush1.bf16.msra.mxu1 %v3466_v15  ;;  %3441 = vmatprep.subr.bf16.mxu0 %v3988_v3  ;;  %v1391_v15 = vld [vmem:[%s5788_s5 + $0x28] sm:$0xff] }
 0x14d   : > { %3468 = vmatprep.subr.bf16.mxu1 %v3988_v3  ;;  %v3523_v22 = vpack.c.bf16 %v1391_v15, %v1390_v13 }
 0x14f   : > { %3443 = vmatpush1.bf16.msra.mxu0 %v3442_v25  ;;  %v1392_v25 = vld [vmem:[%s5788_s5 + $0x30] sm:$0xff] }
 0x150   : > { %3470 = vmatpush1.bf16.msra.mxu1 %v3469_v26  ;;  %3444 = vmatprep.subr.bf16.mxu0 %v3988_v3  ;;  %v1393_v26 = vld [vmem:[%s5788_s5 + $0x38] sm:$0xff] }
 0x151   : > { %3471 = vmatprep.subr.bf16.mxu1 %v3988_v3  ;;  %v3526_v28 = vpack.c.bf16 %v1393_v26, %v1392_v25  ;;  %v2918_v26 = vld [vmem:[%s5788_s5 + $0x140] sm:$0xff] }
 0x153   : > { %3446 = vmatpush1.bf16.msra.mxu0 %v3445_v31  ;;  %v1394_v31 = vld [vmem:[%s5788_s5 + $0x40] sm:$0xff] }
 0x154   : > { %3473 = vmatpush1.bf16.msra.mxu1 %v3472_v32  ;;  %3447 = vmatprep.subr.bf16.mxu0 %v3988_v3  ;;  %v1395_v32 = vld [vmem:[%s5788_s5 + $0x48] sm:$0xff] }
 0x155   : > { %3474 = vmatprep.subr.bf16.mxu1 %v3988_v3  ;;  %v3529_v34 = vpack.c.bf16 %v1395_v32, %v1394_v31  ;;  %v1678_v31 = vld [vmem:[#allocation4 + $0x18] sm:$0x1e] }
 0x157   : > { %3449 = vmatpush1.bf16.msra.mxu0 %v3448_v37  ;;  %v1396_v37 = vld [vmem:[%s5788_s5 + $0x50] sm:$0xff] }
 0x158   : > { %3476 = vmatpush1.bf16.msra.mxu1 %v3475_v38  ;;  %3450 = vmatprep.subr.bf16.mxu0 %v3988_v3  ;;  %v1397_v38 = vld [vmem:[%s5788_s5 + $0x58] sm:$0xff] }
 0x159   : > { %3477 = vmatprep.subr.bf16.mxu1 %v3988_v3  ;;  %v3532_v40 = vpack.c.bf16 %v1397_v38, %v1396_v37  ;;  %v2942_v37 = vld [vmem:[%s5788_s5 + $0x1f8] sm:$0xff] }
 0x15b   : > { %3452 = vmatpush1.bf16.msra.mxu0 %v3451_v43  ;;  %v1398_v43 = vld [vmem:[%s5788_s5 + $0x60] sm:$0xff] }
 0x15c   : > { %3479 = vmatpush1.bf16.msra.mxu1 %v3478_v44  ;;  %3453 = vmatprep.subr.bf16.mxu0 %v3988_v3  ;;  %v3505_v44 = vpack.c.bf16 %v2909_v42, %v2908_v41  ;;  %v3535_v46 = vpack.c.bf16 %v1399_v45, %v1398_v43  ;;  %v1703_v41 = vrot.slane %v1678_v31, 1  ;;  %v3580_v43 = vpack.c.bf16 %v2942_v37, %v2941_v36  ;;  %v2923_v45 = vld [vmem:[%s5788_s5 + $0x168] sm:$0xff]  ;;  %v1803_v36 = vld [vmem:[%s5790_s7] sm:$0xff] }
 0x15d   : > { %3480 = vmatprep.subr.bf16.mxu1 %v3988_v3 }
 0x15f   : > { %3455 = vmatpush1.bf16.msra.mxu0 %v3454_v50  ;;  %v1400_v50 = vld [vmem:[%s5788_s5 + $0x70] sm:$0xff] }
 0x160   : > { %3482 = vmatpush1.bf16.msra.mxu1 %v3481_v51  ;;  %3456 = vmatprep.subr.bf16.mxu0 %v3988_v3  ;;  %v3508_v51 = vpack.c.bf16 %v2911_v49, %v2910_v48  ;;  %v3538_v53 = vpack.c.bf16 %v1401_v52, %v1400_v50  ;;  %v2944_v48 = vld [vmem:[%s5788_s5 + $0x208] sm:$0xff]  ;;  %v2925_v52 = vld [vmem:[%s5788_s5 + $0x178] sm:$0xff] }
 0x161   : > { %3483 = vmatprep.subr.bf16.mxu1 %v3988_v3 }
 0x163   : > { %3458 = vmatpush1.bf16.msra.mxu0 %v3457_v61  ;;  %v2914_v61 = vld [vmem:[%s5788_s5 + $0x130] sm:$0xff] }
 0x164   : > { %3485 = vmatpush1.bf16.msra.mxu1 %v3484_v62  ;;  %3486 = vmatprep.subr.bf16.mxu0 %v3988_v3  ;;  %v2915_v62 = vld [vmem:[%s5788_s5 + $0x138] sm:$0xff] }
 0x165   : > { %3516 = vmatprep.subr.bf16.mxu1 %v3988_v3  ;;  %v3514_v0 = vpack.c.bf16 %v2915_v62, %v2914_v61  ;;  %v2948_v61 = vld [vmem:[%s5788_s5 + $0x228] sm:$0xff] }
 0x166   : > { %1238 = vmatmul.mubr.f32.vlgmr.msra.gmra.mrb[10].mxu0 %v1166_v5  ;;  %v1407_v5 = vld [vmem:[#allocation4 + $0x18] sm:$0xf] }
 0x167   : > { %1345 = vmatmul.mubr.f32.vlgmr.msra.gmra.mrb[10].mxu1 %v1273_v6  ;;  %3488 = vmatpush1.bf16.msra.mxu0 %v3487_v11  ;;  %v1385_v6 = vld [vmem:[#allocation4 + $0x8] sm:$0xf] }
 0x168   : > { %3518 = vmatpush1.bf16.msra.mxu1 %v3517_v14  ;;  %3489 = vmatprep.subr.bf16.mxu0 %v3988_v3 }
 0x169   : > { %3519 = vmatprep.subr.bf16.mxu1 %v3988_v3  ;;  %2916 = vmatprep.mubr.msk.f32.mxu0 %vm1429_vm7, %v1407_v5  ;;  %v2950_v5 = vld [vmem:[%s5788_s5 + $0x238] sm:$0xff] }
 0x16a   : > { %2917 = vmatprep.mubr.msk.f32.mxu1 %vm1429_vm7, %v1385_v6 }
 0x16b   : > { %3491 = vmatpush1.bf16.msra.mxu0 %v3490_v19  ;;  %v2895_v19 = vld [vmem:[%s5787_s4] ss:$0 sm:$0xff] }
 0x16c   : > { %3521 = vmatpush1.bf16.msra.mxu1 %v3520_v20  ;;  %3492 = vmatprep.subr.bf16.mxu0 %v3988_v3 }
 0x16d   : > { %3522 = vmatprep.subr.bf16.mxu1 %v3988_v3 }
 0x16f   : > { %3494 = vmatpush1.bf16.msra.mxu0 %v3493_v18 }
 0x170   : > { %3524 = vmatpush1.bf16.msra.mxu1 %v3523_v22  ;;  %3495 = vmatprep.subr.bf16.mxu0 %v3988_v3 }
 0x171   : > { %3525 = vmatprep.subr.bf16.mxu1 %v3988_v3 }
 0x173   : > { %3497 = vmatpush1.bf16.msra.mxu0 %v3496_v27  ;;  %v2919_v27 = vld [vmem:[%s5788_s5 + $0x148] sm:$0xff] }
 0x174   : > { %3527 = vmatpush1.bf16.msra.mxu1 %v3526_v28  ;;  %3498 = vmatprep.subr.bf16.mxu0 %v3988_v3  ;;  %v2939_v28 = vld [vmem:[%s5788_s5 + $0x1e0] sm:$0xff]  ;;  %v3547_v32 = vpack.c.bf16 %v2919_v27, %v2918_v26  ;;  %v2957_v26 = vld [vmem:[%s5788_s5 + $0x270] sm:$0xff]  ;;  %v2958_v27 = vld [vmem:[%s5788_s5 + $0x278] sm:$0xff] }
 0x175   : > { %3528 = vmatprep.subr.bf16.mxu1 %v3988_v3 }
 0x177   : > { %3500 = vmatpush1.bf16.msra.mxu0 %v3499_v33  ;;  %v3577_v33 = vpack.c.bf16 %v2940_v29, %v2939_v28  ;;  %v3604_v29 = vpack.c.bf16 %v2958_v27, %v2957_v26  ;;  %v2983_v26 = vld [vmem:[%s5790_s7 + $0x158] sm:$0xff]  ;;  %v1821_v27 = vld [vmem:[%s5790_s7 + $0x90] sm:$0xff] }
 0x178   : > { %3530 = vmatpush1.bf16.msra.mxu1 %v3529_v34  ;;  %3501 = vmatprep.subr.bf16.mxu0 %v3988_v3  ;;  %v2920_v34 = vld [vmem:[%s5788_s5 + $0x150] sm:$0xff] }
 0x179   : > { %3531 = vmatprep.subr.bf16.mxu1 %v3988_v3  ;;  %v3550_v42 = vpack.c.bf16 %v2921_v35, %v2920_v34  ;;  %v2964_v34 = vld [vmem:[%s5790_s7 + $0xc0] sm:$0xff]  ;;  %v2965_v35 = vld [vmem:[%s5790_s7 + $0xc8] sm:$0xff] }
 0x17a   : > { %v3607_v37 = vpack.c.bf16 %v2965_v35, %v2964_v34  ;;  %v1824_v35 = vld [vmem:[%s5790_s7 + $0xa8] sm:$0xff] }
 0x17b   : > { %3503 = vmatpush1.bf16.msra.mxu0 %v3502_v39 }
 0x17c   : > { %3533 = vmatpush1.bf16.msra.mxu1 %v3532_v40  ;;  %3504 = vmatprep.subr.bf16.mxu0 %v3988_v3  ;;  %v1602_v40 = vrot.slane %v1577_v30, 1 }
 0x17d   : > { %3534 = vmatprep.subr.bf16.mxu1 %v3988_v3 }
 0x17f   : > { %3506 = vmatpush1.bf16.msra.mxu0 %v3505_v44  ;;  %v2922_v44 = vld [vmem:[%s5788_s5 + $0x160] sm:$0xff] }
 0x180   : > { %3536 = vmatpush1.bf16.msra.mxu1 %v3535_v46  ;;  %3507 = vmatprep.subr.bf16.mxu0 %v3988_v3  ;;  %v2943_v46 = vld [vmem:[%s5788_s5 + $0x200] sm:$0xff]  ;;  %v3553_v49 = vpack.c.bf16 %v2923_v45, %v2922_v44 }
 0x181   : > { %3537 = vmatprep.subr.bf16.mxu1 %v3988_v3  ;;  %v3583_v50 = vpack.c.bf16 %v2944_v48, %v2943_v46  ;;  %v2968_v46 = vld [vmem:[%s5790_s7 + $0xe0] sm:$0xff]  ;;  %v2969_v48 = vld [vmem:[%s5790_s7 + $0xe8] sm:$0xff] }
 0x183   : > { %3509 = vmatpush1.bf16.msra.mxu0 %v3508_v51  ;;  %v2924_v51 = vld [vmem:[%s5788_s5 + $0x170] sm:$0xff] }
 0x184   : > { %3539 = vmatpush1.bf16.msra.mxu1 %v3538_v53  ;;  %3510 = vmatprep.subr.bf16.mxu0 %v3988_v3  ;;  %v2945_v53 = vld [vmem:[%s5788_s5 + $0x210] sm:$0xff]  ;;  %v3556_v55 = vpack.c.bf16 %v2925_v52, %v2924_v51  ;;  %v3613_v51 = vpack.c.bf16 %v2969_v48, %v2968_v46 }
 0x185   : > { %3540 = vmatprep.subr.bf16.mxu1 %v3988_v3  ;;  %v3586_v56 = vpack.c.bf16 %v2946_v54, %v2945_v53  ;;  %v2970_v53 = vld [vmem:[%s5790_s7 + $0xf0] sm:$0xff]  ;;  %v2971_v54 = vld [vmem:[%s5790_s7 + $0xf8] sm:$0xff] }
 0x187   : > { %3512 = vmatpush1.bf16.msra.mxu0 %v3511_v58  ;;  %v2926_v58 = vld [vmem:[%s5788_s5 + $0x180] sm:$0xff] }
 0x188   : > { %3542 = vmatpush1.bf16.msra.mxu1 %v3541_v60  ;;  %3513 = vmatprep.subr.bf16.mxu0 %v3988_v3  ;;  %v2947_v60 = vld [vmem:[%s5788_s5 + $0x220] sm:$0xff]  ;;  %v3559_v62 = vpack.c.bf16 %v2927_v59, %v2926_v58  ;;  %v3616_v58 = vpack.c.bf16 %v2971_v54, %v2970_v53 }
 0x189   : > { %3543 = vmatprep.subr.bf16.mxu1 %v3988_v3  ;;  %v3589_v63 = vpack.c.bf16 %v2948_v61, %v2947_v60  ;;  %v2972_v60 = vld [vmem:[%s5790_s7 + $0x100] sm:$0xff]  ;;  %v2973_v61 = vld [vmem:[%s5790_s7 + $0x108] sm:$0xff] }
 0x18a   : > { %v2960_v54 = vld [vmem:[%s5789_s6] ss:$0 sm:$0xff] }
 0x18b   : > { %3515 = vmatpush1.bf16.msra.mxu0 %v3514_v0  ;;  %v2928_v0 = vld [vmem:[%s5788_s5 + $0x190] sm:$0xff] }
 0x18c   : > { %3545 = vmatpush1.bf16.msra.mxu1 %v3544_v2  ;;  %3546 = vmatprep.subr.bf16.mxu0 %v3988_v3  ;;  %v2949_v2 = vld [vmem:[%s5788_s5 + $0x230] sm:$0xff]  ;;  %v3562_v6 = vpack.c.bf16 %v2929_v1, %v2928_v0  ;;  %v3619_v0 = vpack.c.bf16 %v2973_v61, %v2972_v60 }
 0x18d   : > { %3576 = vmatprep.subr.bf16.mxu1 %v3988_v3 }
 0x215   : > { %v1060_v7 = vpop.f32.mrb[8].mxu0 }
 0x216   : > { %v1133_v9 = vpop.f32.mrb[8].mxu1  ;;  %v1062_v11 = vpop.f32.mrb[9].mxu0 }
 0x217   : > { %v1134_v10 = vadd.f32 %v1133_v9, %v1060_v7  ;;  %v1135_v12 = vpop.f32.mrb[9].mxu1  ;;  %v3592_v7 = vpack.c.bf16 %v2950_v5, %v2949_v2  ;;  %v2930_v9 = vld [vmem:[%s5788_s5 + $0x1a0] sm:$0xff]  ;;  %v2974_v2 = vld [vmem:[%s5790_s7 + $0x110] sm:$0xff]  ;;  %v2975_v5 = vld [vmem:[%s5790_s7 + $0x118] sm:$0xff] }
 0x218   : > { %v2951_v11 = vld [vmem:[%s5788_s5 + $0x240] sm:$0xff]  ;;  %v2952_v12 = vld [vmem:[%s5788_s5 + $0x248] sm:$0xff] }
 0x239   : > { %v1239_v47 = vpop.f32.mrb[10].mxu0 }
 0x23a   : > { %v1346_v57 = vpop.f32.mrb[10].mxu1  ;;  %v1243_v14 = vadd.f32 %v1239_v47, %v1134_v10  ;;  %v1241_v16 = vpop.f32.mrb[11].mxu0  ;;  %v2931_v10 = vld [vmem:[%s5788_s5 + $0x1a8] sm:$0xff] }
 0x23b   : > { %v1348_v17 = vpop.f32.mrb[11].mxu1  ;;  %v3565_v47 = vpack.c.bf16 %v2931_v10, %v2930_v9  ;;  %v2933_v16 = vld [vmem:[%s5788_s5 + $0x1b8] sm:$0xff]  ;;  %v3622_v9 = vpack.c.bf16 %v2975_v5, %v2974_v2 }
 0x23c   : > { %v1350_v20 = vadd.f32 %v1346_v57, %v1243_v14  ;;  %v3595_v57 = vpack.c.bf16 %v2952_v12, %v2951_v11  ;;  %v2932_v14 = vld [vmem:[%s5788_s5 + $0x1b0] sm:$0xff]  ;;  %v2976_v11 = vld [vmem:[%s5790_s7 + $0x120] sm:$0xff]  ;;  %v2977_v12 = vld [vmem:[%s5790_s7 + $0x128] sm:$0xff] }
 0x23d   : > { %v2953_v17 = vld [vmem:[%s5788_s5 + $0x250] sm:$0xff] }
 0x23e   : > { %v1358_v21 = vadd.f32 %v2895_v19, %v1350_v20  ;;  %v2954_v19 = vld [vmem:[%s5788_s5 + $0x258] sm:$0xff]  ;;  %v3568_v20 = vpack.c.bf16 %v2933_v16, %v2932_v14  ;;  %v3625_v14 = vpack.c.bf16 %v2977_v12, %v2976_v11 }
 0x240   : > { %v1359_v4 = vmax.f32 %v1358_v21, 0.0  ;;  %v3598_v21 = vpack.c.bf16 %v2954_v19, %v2953_v17  ;;  %v2978_v17 = vld [vmem:[%s5790_s7 + $0x130] sm:$0xff]  ;;  %v2979_v19 = vld [vmem:[%s5790_s7 + $0x138] sm:$0xff] }
 0x242   : > { %1361 = vst [vmem:[#allocation4 + $0x10] sm:$0x1] %v1359_v4  ;;  %v1363_v13 = vrot.slane %v1359_v4, 1  ;;  %v1366_v15 = vrot.slane %v1359_v4, 2  ;;  %v1369_v18 = vrot.slane %v1359_v4, 3  ;;  %v1372_v22 = vrot.slane %v1359_v4, 4 }
 0x243   : > { %v1375_v23 = vrot.slane %v1359_v4, 5  ;;  %v1378_v24 = vrot.slane %v1359_v4, 6  ;;  %v1381_v25 = vrot.slane %v1359_v4, 7  ;;  %v2934_v4 = vld [vmem:[%s5788_s5 + $0x1c0] sm:$0xff] }
 0x244   : > { %1365 = vst [vmem:[#allocation4 + $0x1] sm:$0x1] %v1363_v13  ;;  %1368 = vst [vmem:[#allocation4 + $0x11] sm:$0x1] %v1366_v15  ;;  %v2935_v13 = vld [vmem:[%s5788_s5 + $0x1c8] sm:$0xff]  ;;  %v2955_v15 = vld [vmem:[%s5788_s5 + $0x260] sm:$0xff] }
 0x245   : > { %1371 = vst [vmem:[#allocation4 + $0x2] sm:$0x1] %v1369_v18  ;;  %1374 = vst [vmem:[#allocation4 + $0x12] sm:$0x1] %v1372_v22  ;;  %v2956_v18 = vld [vmem:[%s5788_s5 + $0x268] sm:$0xff]  ;;  %v3571_v22 = vpack.c.bf16 %v2935_v13, %v2934_v4  ;;  %v1818_v4 = vld [vmem:[%s5790_s7 + $0x78] sm:$0xff] }
 0x246   : > { %1377 = vst [vmem:[#allocation4 + $0x3] sm:$0x1] %v1375_v23  ;;  %1380 = vst [vmem:[#allocation4 + $0x13] sm:$0x1] %v1378_v24  ;;  %v3601_v23 = vpack.c.bf16 %v2956_v18, %v2955_v15  ;;  %v2936_v24 = vld [vmem:[%s5788_s5 + $0x1d0] sm:$0xff]  ;;  %v2980_v15 = vld [vmem:[%s5790_s7 + $0x140] sm:$0xff] }
 0x247   : > { %1383 = vst [vmem:[#allocation4 + $0x4] sm:$0x1] %v1381_v25  ;;  %v2937_v25 = vld [vmem:[%s5788_s5 + $0x1d8] sm:$0xff]  ;;  %v2981_v18 = vld [vmem:[%s5790_s7 + $0x148] sm:$0xff] }
 0x248   : > { %v3574_v28 = vpack.c.bf16 %v2937_v25, %v2936_v24  ;;  %v2982_v25 = vld [vmem:[%s5790_s7 + $0x150] sm:$0xff] }
 0x24d   : > { %v1406_v38 = vld [vmem:[#allocation4 + $0x10] sm:$0xf]  ;;  %v1384_v39 = vld [vmem:[#allocation4] sm:$0xf] }
 0x24e   : > { %1498 = vmatmul.mubr.f32.vlgmr.msra.gmra.mrb[12].mxu0 %v1406_v38  ;;  %1571 = vmatmul.mubr.f32.vlgmr.msra.gmra.mrb[12].mxu1 %v1384_v39  ;;  %v1576_v30 = vld [vmem:[#allocation4] sm:$0x1e]  ;;  %v1677_v31 = vld [vmem:[#allocation4 + $0x10] sm:$0x1e]  ;;  %v1804_v38 = vld [vmem:[%s5790_s7 + $0x8] sm:$0xff] }
 0x24f   : > { %3548 = vmatpush1.bf16.msra.mxu0 %v3547_v32  ;;  %3578 = vmatpush1.bf16.msra.mxu1 %v3577_v33  ;;  %v1601_v32 = vrot.slane %v1576_v30, 1  ;;  %v1702_v33 = vrot.slane %v1677_v31, 1  ;;  %v2966_v39 = vld [vmem:[%s5790_s7 + $0xd0] sm:$0xff]  ;;  %v2984_v31 = vld [vmem:[%s5790_s7 + $0x160] sm:$0xff] }
 0x250   : > { %3549 = vmatprep.subr.bf16.mxu0 %v3988_v3  ;;  %3579 = vmatprep.subr.bf16.mxu1 %v3988_v3 }
 0x251   : > { %2938 = vmatprep.mubr.msk.f32.mxu0 %vm1429_vm7, %v1602_v40  ;;  %2959 = vmatprep.mubr.msk.f32.mxu1 %vm1429_vm7, %v1703_v41  ;;  %v2967_v40 = vld [vmem:[%s5790_s7 + $0xd8] sm:$0xff]  ;;  %v3643_v41 = vpack.c.bf16 %v1804_v38, %v1803_v36  ;;  %v2986_v36 = vld [vmem:[%s5790_s7 + $0x170] sm:$0xff] }
 0x252   : > { %v3610_v44 = vpack.c.bf16 %v2967_v40, %v2966_v39  ;;  %v1825_v39 = vld [vmem:[%s5790_s7 + $0xb0] sm:$0xff]  ;;  %v1826_v40 = vld [vmem:[%s5790_s7 + $0xb8] sm:$0xff] }
 0x253   : > { %3551 = vmatpush1.bf16.msra.mxu0 %v3550_v42  ;;  %3581 = vmatpush1.bf16.msra.mxu1 %v3580_v43  ;;  %v1805_v42 = vld [vmem:[%s5790_s7 + $0x10] sm:$0xff]  ;;  %v1806_v43 = vld [vmem:[%s5790_s7 + $0x18] sm:$0xff] }
 0x254   : > { %3552 = vmatprep.subr.bf16.mxu0 %v3988_v3  ;;  %3582 = vmatprep.subr.bf16.mxu1 %v3988_v3  ;;  %v3646_v45 = vpack.c.bf16 %v1806_v43, %v1805_v42  ;;  %v3676_v42 = vpack.c.bf16 %v1826_v40, %v1825_v39  ;;  %v3025_v39 = vld [vmem:[%s5790_s7 + $0x290] sm:$0xff]  ;;  %v3026_v40 = vld [vmem:[%s5790_s7 + $0x298] sm:$0xff] }
 0x257   : > { %3554 = vmatpush1.bf16.msra.mxu0 %v3553_v49  ;;  %3584 = vmatpush1.bf16.msra.mxu1 %v3583_v50  ;;  %v1807_v49 = vld [vmem:[%s5790_s7 + $0x20] sm:$0xff]  ;;  %v1808_v50 = vld [vmem:[%s5790_s7 + $0x28] sm:$0xff] }
 0x258   : > { %3555 = vmatprep.subr.bf16.mxu0 %v3988_v3  ;;  %3585 = vmatprep.subr.bf16.mxu1 %v3988_v3  ;;  %v3649_v52 = vpack.c.bf16 %v1808_v50, %v1807_v49 }
 0x25b   : > { %3557 = vmatpush1.bf16.msra.mxu0 %v3556_v55  ;;  %3587 = vmatpush1.bf16.msra.mxu1 %v3586_v56  ;;  %v1809_v55 = vld [vmem:[%s5790_s7 + $0x30] sm:$0xff]  ;;  %v1810_v56 = vld [vmem:[%s5790_s7 + $0x38] sm:$0xff] }
 0x25c   : > { %3558 = vmatprep.subr.bf16.mxu0 %v3988_v3  ;;  %3588 = vmatprep.subr.bf16.mxu1 %v3988_v3  ;;  %v3652_v59 = vpack.c.bf16 %v1810_v56, %v1809_v55 }
 0x25f   : > { %3560 = vmatpush1.bf16.msra.mxu0 %v3559_v62  ;;  %3590 = vmatpush1.bf16.msra.mxu1 %v3589_v63  ;;  %v1811_v62 = vld [vmem:[%s5790_s7 + $0x40] sm:$0xff]  ;;  %v1812_v63 = vld [vmem:[%s5790_s7 + $0x48] sm:$0xff] }
 0x260   : > { %3561 = vmatprep.subr.bf16.mxu0 %v3988_v3  ;;  %3591 = vmatprep.subr.bf16.mxu1 %v3988_v3  ;;  %v3655_v1 = vpack.c.bf16 %v1812_v63, %v1811_v62  ;;  %v2990_v62 = vld [vmem:[%s5790_s7 + $0x180] sm:$0xff]  ;;  %v2991_v63 = vld [vmem:[%s5790_s7 + $0x188] sm:$0xff] }
 0x263   : > { %3563 = vmatpush1.bf16.msra.mxu0 %v3562_v6  ;;  %3593 = vmatpush1.bf16.msra.mxu1 %v3592_v7  ;;  %v1813_v6 = vld [vmem:[%s5790_s7 + $0x50] sm:$0xff]  ;;  %v1814_v7 = vld [vmem:[%s5790_s7 + $0x58] sm:$0xff] }
 0x264   : > { %3564 = vmatprep.subr.bf16.mxu0 %v3988_v3  ;;  %3594 = vmatprep.subr.bf16.mxu1 %v3988_v3  ;;  %v3658_v10 = vpack.c.bf16 %v1814_v7, %v1813_v6  ;;  %v3679_v6 = vpack.c.bf16 %v2991_v63, %v2990_v62  ;;  %v3008_v63 = vld [vmem:[%s5790_s7 + $0x210] sm:$0xff] }
 0x267   : > { %3566 = vmatpush1.bf16.msra.mxu0 %v3565_v47  ;;  %3596 = vmatpush1.bf16.msra.mxu1 %v3595_v57  ;;  %v1815_v47 = vld [vmem:[%s5790_s7 + $0x60] sm:$0xff]  ;;  %v1816_v57 = vld [vmem:[%s5790_s7 + $0x68] sm:$0xff] }
 0x268   : > { %3567 = vmatprep.subr.bf16.mxu0 %v3988_v3  ;;  %3597 = vmatprep.subr.bf16.mxu1 %v3988_v3  ;;  %v3661_v16 = vpack.c.bf16 %v1816_v57, %v1815_v47  ;;  %v2992_v57 = vld [vmem:[%s5790_s7 + $0x190] sm:$0xff] }
 0x26b   : > { %3569 = vmatpush1.bf16.msra.mxu0 %v3568_v20  ;;  %3599 = vmatpush1.bf16.msra.mxu1 %v3598_v21  ;;  %v1817_v20 = vld [vmem:[%s5790_s7 + $0x70] sm:$0xff]  ;;  %v3628_v21 = vpack.c.bf16 %v2979_v19, %v2978_v17  ;;  %v3018_v19 = vld [vmem:[%s5790_s7 + $0x258] sm:$0xff] }
 0x26c   : > { %3570 = vmatprep.subr.bf16.mxu0 %v3988_v3  ;;  %3600 = vmatprep.subr.bf16.mxu1 %v3988_v3  ;;  %v3664_v13 = vpack.c.bf16 %v1818_v4, %v1817_v20  ;;  %v3017_v17 = vld [vmem:[%s5790_s7 + $0x250] sm:$0xff] }
 0x26f   : > { %3572 = vmatpush1.bf16.msra.mxu0 %v3571_v22  ;;  %3602 = vmatpush1.bf16.msra.mxu1 %v3601_v23  ;;  %v3631_v22 = vpack.c.bf16 %v2981_v18, %v2980_v15  ;;  %v1819_v23 = vld [vmem:[%s5790_s7 + $0x80] sm:$0xff]  ;;  %v2995_v18 = vld [vmem:[%s5790_s7 + $0x1a8] sm:$0xff] }
 0x270   : > { %3573 = vmatprep.subr.bf16.mxu0 %v3988_v3  ;;  %3603 = vmatprep.subr.bf16.mxu1 %v3988_v3  ;;  %v3667_v24 = vpack.c.bf16 %v1820_v8, %v1819_v23  ;;  %v2994_v15 = vld [vmem:[%s5790_s7 + $0x1a0] sm:$0xff]  ;;  %v3020_v23 = vld [vmem:[%s5790_s7 + $0x268] sm:$0xff] }
 0x271   : > { %v3685_v8 = vpack.c.bf16 %v2995_v18, %v2994_v15  ;;  %v3058_v18 = vld [vmem:[%s5792_s9 + $0x180] sm:$0xff] }
 0x273   : > { %3575 = vmatpush1.bf16.msra.mxu0 %v3574_v28  ;;  %3605 = vmatpush1.bf16.msra.mxu1 %v3604_v29  ;;  %v3634_v28 = vpack.c.bf16 %v2983_v26, %v2982_v25  ;;  %v1822_v29 = vld [vmem:[%s5790_s7 + $0x98] sm:$0xff]  ;;  %v2996_v25 = vld [vmem:[%s5790_s7 + $0x1b0] sm:$0xff] }
 0x274   : > { %3606 = vmatprep.subr.bf16.mxu0 %v3988_v3  ;;  %3642 = vmatprep.subr.bf16.mxu1 %v3988_v3  ;;  %v3670_v30 = vpack.c.bf16 %v1822_v29, %v1821_v27  ;;  %v2997_v26 = vld [vmem:[%s5790_s7 + $0x1b8] sm:$0xff]  ;;  %v3021_v27 = vld [vmem:[%s5790_s7 + $0x270] sm:$0xff] }
 0x275   : > { %v3688_v29 = vpack.c.bf16 %v2997_v26, %v2996_v25  ;;  %v2234_v26 = vld [vmem:[%s5792_s9] sm:$0xff] }
 0x276   : > { %1671 = vmatmul.mubr.f32.vlgmr.msra.gmra.mrb[14].mxu0 %v1601_v32  ;;  %1772 = vmatmul.mubr.f32.vlgmr.msra.gmra.mrb[14].mxu1 %v1702_v33  ;;  %v2985_v32 = vld [vmem:[%s5790_s7 + $0x168] sm:$0xff]  ;;  %v1823_v33 = vld [vmem:[%s5790_s7 + $0xa0] sm:$0xff] }
 0x277   : > { %3608 = vmatpush1.bf16.msra.mxu0 %v3607_v37  ;;  %3644 = vmatpush1.bf16.msra.mxu1 %v3643_v41  ;;  %v3637_v34 = vpack.c.bf16 %v2985_v32, %v2984_v31  ;;  %v2987_v37 = vld [vmem:[%s5790_s7 + $0x178] sm:$0xff]  ;;  %v3673_v38 = vpack.c.bf16 %v1824_v35, %v1823_v33  ;;  %v2998_v31 = vld [vmem:[%s5790_s7 + $0x1c0] sm:$0xff]  ;;  %v2999_v32 = vld [vmem:[%s5790_s7 + $0x1c8] sm:$0xff] }
 0x278   : > { %3609 = vmatprep.subr.bf16.mxu0 %v3988_v3  ;;  %3645 = vmatprep.subr.bf16.mxu1 %v3988_v3  ;;  %v3640_v41 = vpack.c.bf16 %v2987_v37, %v2986_v36  ;;  %v3023_v33 = vld [vmem:[%s5790_s7 + $0x280] sm:$0xff]  ;;  %v3691_v35 = vpack.c.bf16 %v2999_v32, %v2998_v31  ;;  %v3000_v37 = vld [vmem:[%s5790_s7 + $0x1d0] sm:$0xff]  ;;  %v3045_v32 = vld [vmem:[%s5792_s9 + $0x118] sm:$0xff] }
 0x279   : > { %v3044_v31 = vld [vmem:[%s5792_s9 + $0x110] sm:$0xff] }
 0x27b   : > { %3611 = vmatpush1.bf16.msra.mxu0 %v3610_v44  ;;  %3647 = vmatpush1.bf16.msra.mxu1 %v3646_v45 }
 0x27c   : > { %3612 = vmatprep.subr.bf16.mxu0 %v3988_v3  ;;  %3648 = vmatprep.subr.bf16.mxu1 %v3988_v3 }
 0x27f   : > { %3614 = vmatpush1.bf16.msra.mxu0 %v3613_v51  ;;  %3650 = vmatpush1.bf16.msra.mxu1 %v3649_v52 }
 0x280   : > { %3615 = vmatprep.subr.bf16.mxu0 %v3988_v3  ;;  %3651 = vmatprep.subr.bf16.mxu1 %v3988_v3 }
 0x283   : > { %3617 = vmatpush1.bf16.msra.mxu0 %v3616_v58  ;;  %3653 = vmatpush1.bf16.msra.mxu1 %v3652_v59 }
 0x284   : > { %3618 = vmatprep.subr.bf16.mxu0 %v3988_v3  ;;  %3654 = vmatprep.subr.bf16.mxu1 %v3988_v3 }
 0x287   : > { %3620 = vmatpush1.bf16.msra.mxu0 %v3619_v0  ;;  %3656 = vmatpush1.bf16.msra.mxu1 %v3655_v1  ;;  %v3015_v0 = vld [vmem:[%s5790_s7 + $0x240] sm:$0xff]  ;;  %v3016_v1 = vld [vmem:[%s5790_s7 + $0x248] sm:$0xff] }
 0x288   : > { %3621 = vmatprep.subr.bf16.mxu0 %v3988_v3  ;;  %3657 = vmatprep.subr.bf16.mxu1 %v3988_v3  ;;  %v3715_v11 = vpack.c.bf16 %v3016_v1, %v3015_v0  ;;  %v3009_v0 = vld [vmem:[%s5790_s7 + $0x218] sm:$0xff]  ;;  %v3033_v1 = vld [vmem:[%s5790_s7 + $0x2d0] sm:$0xff] }
 0x28b   : > { %3623 = vmatpush1.bf16.msra.mxu0 %v3622_v9  ;;  %3659 = vmatpush1.bf16.msra.mxu1 %v3658_v10 }
 0x28c   : > { %3624 = vmatprep.subr.bf16.mxu0 %v3988_v3  ;;  %3660 = vmatprep.subr.bf16.mxu1 %v3988_v3 }
 0x28f   : > { %3626 = vmatpush1.bf16.msra.mxu0 %v3625_v14  ;;  %3662 = vmatpush1.bf16.msra.mxu1 %v3661_v16  ;;  %v2993_v16 = vld [vmem:[%s5790_s7 + $0x198] sm:$0xff] }
 0x290   : > { %3627 = vmatprep.subr.bf16.mxu0 %v3988_v3  ;;  %3663 = vmatprep.subr.bf16.mxu1 %v3988_v3  ;;  %v3682_v4 = vpack.c.bf16 %v2993_v16, %v2992_v57  ;;  %v3012_v16 = vld [vmem:[%s5790_s7 + $0x230] sm:$0xff] }
 0x293   : > { %3629 = vmatpush1.bf16.msra.mxu0 %v3628_v21  ;;  %3665 = vmatpush1.bf16.msra.mxu1 %v3664_v13  ;;  %v3718_v13 = vpack.c.bf16 %v3018_v19, %v3017_v17  ;;  %v3013_v17 = vld [vmem:[%s5790_s7 + $0x238] sm:$0xff]  ;;  %v3037_v19 = vld [vmem:[%s5790_s7 + $0x2f0] sm:$0xff] }
 0x294   : > { %3630 = vmatprep.subr.bf16.mxu0 %v3988_v3  ;;  %3666 = vmatprep.subr.bf16.mxu1 %v3988_v3 }
 0x297   : > { %3632 = vmatpush1.bf16.msra.mxu0 %v3631_v22  ;;  %3668 = vmatpush1.bf16.msra.mxu1 %v3667_v24  ;;  %v3019_v22 = vld [vmem:[%s5790_s7 + $0x260] sm:$0xff] }
 0x298   : > { %3633 = vmatprep.subr.bf16.mxu0 %v3988_v3  ;;  %3669 = vmatprep.subr.bf16.mxu1 %v3988_v3  ;;  %v3721_v24 = vpack.c.bf16 %v3020_v23, %v3019_v22  ;;  %v3059_v22 = vld [vmem:[%s5792_s9 + $0x188] sm:$0xff] }
 0x299   : > { %v3750_v23 = vpack.c.bf16 %v3059_v22, %v3058_v18  ;;  %v3053_v18 = vld [vmem:[%s5792_s9 + $0x158] sm:$0xff]  ;;  %v2260_v22 = vld [vmem:[%s5792_s9 + $0xd0] sm:$0xff] }
 0x29b   : > { %3635 = vmatpush1.bf16.msra.mxu0 %v3634_v28  ;;  %3671 = vmatpush1.bf16.msra.mxu1 %v3670_v30  ;;  %v3022_v28 = vld [vmem:[%s5790_s7 + $0x278] sm:$0xff] }
 0x29c   : > { %3636 = vmatprep.subr.bf16.mxu0 %v3988_v3  ;;  %3672 = vmatprep.subr.bf16.mxu1 %v3988_v3  ;;  %v3724_v30 = vpack.c.bf16 %v3022_v28, %v3021_v27  ;;  %v2235_v27 = vld [vmem:[%s5792_s9 + $0x8] sm:$0xff]  ;;  %v3060_v28 = vld [vmem:[%s5792_s9 + $0x190] sm:$0xff] }
 0x29f   : > { %3638 = vmatpush1.bf16.msra.mxu0 %v3637_v34  ;;  %3674 = vmatpush1.bf16.msra.mxu1 %v3673_v38  ;;  %v3024_v34 = vld [vmem:[%s5790_s7 + $0x288] sm:$0xff]  ;;  %v3001_v38 = vld [vmem:[%s5790_s7 + $0x1d8] sm:$0xff] }
 0x2a0   : > { %3639 = vmatprep.subr.bf16.mxu0 %v3988_v3  ;;  %3675 = vmatprep.subr.bf16.mxu1 %v3988_v3  ;;  %v3727_v36 = vpack.c.bf16 %v3024_v34, %v3023_v33  ;;  %v3756_v34 = vpack.c.bf16 %v3045_v32, %v3044_v31  ;;  %v2262_v31 = vld [vmem:[%s5792_s9 + $0xe0] sm:$0xff] }
 0x2a3   : > { %3641 = vmatpush1.bf16.msra.mxu0 %v3640_v41  ;;  %3677 = vmatpush1.bf16.msra.mxu1 %v3676_v42  ;;  %v3694_v41 = vpack.c.bf16 %v3001_v38, %v3000_v37  ;;  %v3730_v42 = vpack.c.bf16 %v3026_v40, %v3025_v39  ;;  %v2236_v37 = vld [vmem:[%s5792_s9 + $0x10] sm:$0xff]  ;;  %v2237_v39 = vld [vmem:[%s5792_s9 + $0x18] sm:$0xff]  ;;  %v3062_v40 = vld [vmem:[%s5792_s9 + $0x1a0] sm:$0xff] }
 0x2a4   : > { %3678 = vmatprep.subr.bf16.mxu0 %v3988_v3  ;;  %3714 = vmatprep.subr.bf16.mxu1 %v3988_v3 }
 0x321   : > { %v1499_v43 = vpop.f32.mrb[12].mxu0  ;;  %v1572_v44 = vpop.f32.mrb[12].mxu1 }
 0x322   : > { %v1573_v45 = vadd.f32 %v1572_v44, %v1499_v43  ;;  %v1501_v46 = vpop.f32.mrb[13].mxu0  ;;  %v1574_v48 = vpop.f32.mrb[13].mxu1  ;;  %v3002_v43 = vld [vmem:[%s5790_s7 + $0x1e0] sm:$0xff]  ;;  %v3003_v44 = vld [vmem:[%s5790_s7 + $0x1e8] sm:$0xff] }
 0x323   : > { %v3028_v46 = vld [vmem:[%s5790_s7 + $0x2a8] sm:$0xff]  ;;  %v3697_v48 = vpack.c.bf16 %v3003_v44, %v3002_v43  ;;  %v3046_v44 = vld [vmem:[%s5792_s9 + $0x120] sm:$0xff] }
 0x349   : > { %v1672_v49 = vpop.f32.mrb[14].mxu0  ;;  %v1773_v50 = vpop.f32.mrb[14].mxu1 }
 0x34a   : > { %v1676_v51 = vadd.f32 %v1672_v49, %v1573_v45  ;;  %v1674_v52 = vpop.f32.mrb[15].mxu0  ;;  %v1775_v53 = vpop.f32.mrb[15].mxu1  ;;  %v3027_v45 = vld [vmem:[%s5790_s7 + $0x2a0] sm:$0xff] }
 0x34b   : > { %v3733_v49 = vpack.c.bf16 %v3028_v46, %v3027_v45  ;;  %v3029_v52 = vld [vmem:[%s5790_s7 + $0x2b0] sm:$0xff]  ;;  %v3030_v53 = vld [vmem:[%s5790_s7 + $0x2b8] sm:$0xff]  ;;  %v3047_v45 = vld [vmem:[%s5792_s9 + $0x128] sm:$0xff] }
 0x34c   : > { %v1777_v55 = vadd.f32 %v1773_v50, %v1676_v51  ;;  %v3004_v50 = vld [vmem:[%s5790_s7 + $0x1f0] sm:$0xff]  ;;  %v3005_v51 = vld [vmem:[%s5790_s7 + $0x1f8] sm:$0xff]  ;;  %v2254_v46 = vld [vmem:[%s5792_s9 + $0xa0] sm:$0xff] }
 0x34e   : > { %v1785_v56 = vadd.f32 %v2960_v54, %v1777_v55  ;;  %v3700_v54 = vpack.c.bf16 %v3005_v51, %v3004_v50  ;;  %v3736_v55 = vpack.c.bf16 %v3030_v53, %v3029_v52  ;;  %v2239_v50 = vld [vmem:[%s5792_s9 + $0x28] sm:$0xff]  ;;  %v3760_v51 = vpack.c.bf16 %v3047_v45, %v3046_v44  ;;  %v3064_v53 = vld [vmem:[%s5792_s9 + $0x1b0] sm:$0xff] }
 0x34f   : > { %v2264_v44 = vld [vmem:[%s5792_s9 + $0xf0] sm:$0xff] }
 0x350   : > { %v1786_v58 = vmax.f32 %v1785_v56, 0.0  ;;  %v3006_v56 = vld [vmem:[%s5790_s7 + $0x200] sm:$0xff] }
 0x352   : > { %1788 = vst [vmem:[#allocation5 + $0x8] sm:$0x1] %v1786_v58  ;;  %v2961_v59 = vrot.slane %v1786_v58, 9  ;;  %v2962_v60 = vrot.slane %v1786_v58, 10  ;;  %v2963_v61 = vrot.slane %v1786_v58, 11  ;;  %v3007_v58 = vld [vmem:[%s5790_s7 + $0x208] sm:$0xff] }
 0x354   : > { %1793 = vst [vmem:[#allocation5 + $0x1] sm:$0x1] %v2961_v59  ;;  %1797 = vst [vmem:[#allocation5 + $0x9] sm:$0x1] %v2962_v60  ;;  %v3031_v59 = vld [vmem:[%s5790_s7 + $0x2c0] sm:$0xff]  ;;  %v3032_v60 = vld [vmem:[%s5790_s7 + $0x2c8] sm:$0xff] }
 0x355   : > { %1801 = vst [vmem:[#allocation5 + $0x2] sm:$0x1] %v2963_v61  ;;  %v3703_v61 = vpack.c.bf16 %v3007_v58, %v3006_v56  ;;  %v3739_v62 = vpack.c.bf16 %v3032_v60, %v3031_v59  ;;  %v3048_v58 = vld [vmem:[%s5792_s9 + $0x130] sm:$0xff]  ;;  %v3049_v59 = vld [vmem:[%s5792_s9 + $0x138] sm:$0xff] }
 0x356   : > { %v2256_v60 = vld [vmem:[%s5792_s9 + $0xb0] sm:$0xff] }
 0x35b   : > { %v1827_v2 = vld [vmem:[#allocation5 + $0x8] sm:$0x33]  ;;  %v1802_v5 = vld [vmem:[#allocation5] sm:$0x33] }
 0x35c   : > { %v5161_v7 = vld [vmem:[#allocation5] sm:$0x66]  ;;  %v1854_v9 = vcombine.high %v1827_v2, %v1827_v2  ;;  %v1929_v10 = vcombine.high %v1802_v5, %v1802_v5  ;;  %v5165_v47 = vld [vmem:[#allocation5 + $0x8] sm:$0x66] }
 0x35d   : > { %v2029_v12 = vcombine.high %v5161_v7, %v5161_v7  ;;  %v2133_v14 = vcombine.high %v5165_v47, %v5165_v47  ;;  %v2134_v15 = vrot.slane %v5165_v47, 1  ;;  %v2250_v47 = vld [vmem:[%s5792_s9 + $0x80] sm:$0xff] }
 0x35e   : > { %2988 = vmatprep.mubr.msk.f32.mxu0 %vm1855_vm11, %v1854_v9  ;;  %2989 = vmatprep.mubr.msk.f32.mxu1 %vm1855_vm11, %v1929_v10  ;;  %v3010_v9 = vld [vmem:[%s5790_s7 + $0x220] sm:$0xff]  ;;  %v3011_v10 = vld [vmem:[%s5790_s7 + $0x228] sm:$0xff] }
 0x35f   : > { %v2031_v20 = vrot.slane %v2029_v12, 1  ;;  %1923 = vmatmul.mubr.f32.vlgmr.msra.gmra.mrb[16].mxu0 %v1827_v2  ;;  %1997 = vmatmul.mubr.f32.vlgmr.msra.gmra.mrb[16].mxu1 %v1802_v5  ;;  %v2135_v21 = vrot.slane %v2133_v14, 1  ;;  %v3034_v2 = vld [vmem:[%s5790_s7 + $0x2d8] sm:$0xff]  ;;  %v3706_v5 = vpack.c.bf16 %v3009_v0, %v3008_v63  ;;  %v3036_v12 = vld [vmem:[%s5790_s7 + $0x2e8] sm:$0xff]  ;;  %v3709_v57 = vpack.c.bf16 %v3011_v10, %v3010_v9  ;;  %v2240_v63 = vld [vmem:[%s5792_s9 + $0x30] sm:$0xff] }
 0x360   : > { %3680 = vmatpush1.bf16.msra.mxu0 %v3679_v6  ;;  %3716 = vmatpush1.bf16.msra.mxu1 %v3715_v11  ;;  %v3742_v6 = vpack.c.bf16 %v3034_v2, %v3033_v1  ;;  %v3035_v11 = vld [vmem:[%s5790_s7 + $0x2e0] sm:$0xff]  ;;  %v2241_v0 = vld [vmem:[%s5792_s9 + $0x38] sm:$0xff] }
 0x361   : > { %3014 = vmatprep.mubr.msk.f32.mxu0 %vm1855_vm11, %v2031_v20  ;;  %3039 = vmatprep.mubr.msk.f32.mxu1 %vm1855_vm11, %v2135_v21  ;;  %v3745_v14 = vpack.c.bf16 %v3036_v12, %v3035_v11  ;;  %v3038_v20 = vld [vmem:[%s5790_s7 + $0x2f8] sm:$0xff]  ;;  %v3712_v21 = vpack.c.bf16 %v3013_v17, %v3012_v16  ;;  %v3796_v2 = vpack.c.bf16 %v2241_v0, %v2240_v63  ;;  %v3050_v10 = vld [vmem:[%s5792_s9 + $0x140] sm:$0xff]  ;;  %v3051_v11 = vld [vmem:[%s5792_s9 + $0x148] sm:$0xff] }
 0x362   : > { %3681 = vmatprep.subr.bf16.mxu0 %v3988_v3  ;;  %3717 = vmatprep.subr.bf16.mxu1 %v3988_v3  ;;  %v2258_v12 = vld [vmem:[%s5792_s9 + $0xc0] sm:$0xff]  ;;  %v2243_v17 = vld [vmem:[%s5792_s9 + $0x48] sm:$0xff] }
 0x363   : > { %v2242_v16 = vld [vmem:[%s5792_s9 + $0x40] sm:$0xff] }
 0x364   : > { %3683 = vmatpush1.bf16.msra.mxu0 %v3682_v4  ;;  %3719 = vmatpush1.bf16.msra.mxu1 %v3718_v13  ;;  %v3748_v4 = vpack.c.bf16 %v3038_v20, %v3037_v19  ;;  %v2030_v13 = vrot.slane %v5161_v7, 1  ;;  %v3043_v7 = vld [vmem:[%s5792_s9 + $0x108] sm:$0xff]  ;;  %v3800_v20 = vpack.c.bf16 %v2243_v17, %v2242_v16  ;;  %v3106_v0 = vld [vmem:[%s5792_s9 + $0x300] sm:$0xff] }
 0x365   : > { %3684 = vmatprep.subr.bf16.mxu0 %v3988_v3  ;;  %3720 = vmatprep.subr.bf16.mxu1 %v3988_v3  ;;  %v3110_v16 = vld [vmem:[%s5792_s9 + $0x320] sm:$0xff]  ;;  %v3111_v17 = vld [vmem:[%s5792_s9 + $0x328] sm:$0xff] }
 0x368   : > { %3686 = vmatpush1.bf16.msra.mxu0 %v3685_v8  ;;  %3722 = vmatpush1.bf16.msra.mxu1 %v3721_v24  ;;  %v2251_v8 = vld [vmem:[%s5792_s9 + $0x88] sm:$0xff] }
 0x369   : > { %3687 = vmatprep.subr.bf16.mxu0 %v3988_v3  ;;  %3723 = vmatprep.subr.bf16.mxu1 %v3988_v3  ;;  %v3782_v25 = vpack.c.bf16 %v2251_v8, %v2250_v47  ;;  %v2245_v47 = vld [vmem:[%s5792_s9 + $0x58] sm:$0xff] }
 0x36c   : > { %3689 = vmatpush1.bf16.msra.mxu0 %v3688_v29  ;;  %3725 = vmatpush1.bf16.msra.mxu1 %v3724_v30  ;;  %v3784_v29 = vpack.c.bf16 %v2235_v27, %v2234_v26  ;;  %v3061_v30 = vld [vmem:[%s5792_s9 + $0x198] sm:$0xff]  ;;  %v3071_v26 = vld [vmem:[%s5792_s9 + $0x1e8] sm:$0xff]  ;;  %v2225_v27 = vlaneseq }
 0x36d   : > { %3690 = vmatprep.subr.bf16.mxu0 %v3988_v3  ;;  %3726 = vmatprep.subr.bf16.mxu1 %v3988_v3  ;;  %v3754_v33 = vpack.c.bf16 %v3061_v30, %v3060_v28  ;;  %v3055_v30 = vld [vmem:[%s5792_s9 + $0x168] sm:$0xff] }
 0x370   : > { %3692 = vmatpush1.bf16.msra.mxu0 %v3691_v35  ;;  %3728 = vmatpush1.bf16.msra.mxu1 %v3727_v36  ;;  %v2252_v35 = vld [vmem:[%s5792_s9 + $0x90] sm:$0xff]  ;;  %v2253_v36 = vld [vmem:[%s5792_s9 + $0x98] sm:$0xff] }
 0x371   : > { %3693 = vmatprep.subr.bf16.mxu0 %v3988_v3  ;;  %3729 = vmatprep.subr.bf16.mxu1 %v3988_v3  ;;  %v3786_v38 = vpack.c.bf16 %v2253_v36, %v2252_v35  ;;  %v2247_v35 = vld [vmem:[%s5792_s9 + $0x68] sm:$0xff] }
 0x374   : > { %3695 = vmatpush1.bf16.msra.mxu0 %v3694_v41  ;;  %3731 = vmatpush1.bf16.msra.mxu1 %v3730_v42  ;;  %v3063_v41 = vld [vmem:[%s5792_s9 + $0x1a8] sm:$0xff]  ;;  %v3788_v42 = vpack.c.bf16 %v2237_v39, %v2236_v37  ;;  %v3073_v39 = vld [vmem:[%s5792_s9 + $0x1f8] sm:$0xff] }
 0x375   : > { %3696 = vmatprep.subr.bf16.mxu0 %v3988_v3  ;;  %3732 = vmatprep.subr.bf16.mxu1 %v3988_v3  ;;  %v3758_v43 = vpack.c.bf16 %v3063_v41, %v3062_v40  ;;  %v5503_v40 = vshrl.u32 %v2225_v27, 7  ;;  %v3116_v27 = vld [vmem:[%s5792_s9 + $0x350] sm:$0xff] }
 0x378   : > { %3698 = vmatpush1.bf16.msra.mxu0 %v3697_v48  ;;  %3734 = vmatpush1.bf16.msra.mxu1 %v3733_v49  ;;  %v2255_v48 = vld [vmem:[%s5792_s9 + $0xa8] sm:$0xff]  ;;  %v2238_v49 = vld [vmem:[%s5792_s9 + $0x20] sm:$0xff] }
 0x379   : > { %3699 = vmatprep.subr.bf16.mxu0 %v3988_v3  ;;  %3735 = vmatprep.subr.bf16.mxu1 %v3988_v3  ;;  %v3790_v52 = vpack.c.bf16 %v2255_v48, %v2254_v46  ;;  %v2265_v46 = vld [vmem:[%s5792_s9 + $0xf8] sm:$0xff]  ;;  %v2248_v48 = vld [vmem:[%s5792_s9 + $0x70] sm:$0xff] }
 0x37c   : > { %3701 = vmatpush1.bf16.msra.mxu0 %v3700_v54  ;;  %3737 = vmatpush1.bf16.msra.mxu1 %v3736_v55  ;;  %v3065_v54 = vld [vmem:[%s5792_s9 + $0x1b8] sm:$0xff]  ;;  %v3792_v55 = vpack.c.bf16 %v2239_v50, %v2238_v49  ;;  %v3810_v50 = vpack.c.bf16 %v2265_v46, %v2264_v44  ;;  %v2580_v44 = vld [vmem:[#allocation6 + $0x5] ss:$2 sm:$0x3] }
 0x37d   : > { %3702 = vmatprep.subr.bf16.mxu0 %v3988_v3  ;;  %3738 = vmatprep.subr.bf16.mxu1 %v3988_v3  ;;  %v3762_v56 = vpack.c.bf16 %v3065_v54, %v3064_v53  ;;  %v2249_v49 = vld [vmem:[%s5792_s9 + $0x78] sm:$0xff]  ;;  %v5527_v53 = vsub.s32 1, %v5503_v40  ;;  %v2233_v54 = vld [vmem:[#allocation6] ss:$2 sm:$0x3] }
 0x380   : > { %3704 = vmatpush1.bf16.msra.mxu0 %v3703_v61  ;;  %3740 = vmatpush1.bf16.msra.mxu1 %v3739_v62  ;;  %v3764_v61 = vpack.c.bf16 %v3049_v59, %v3048_v58  ;;  %v2257_v62 = vld [vmem:[%s5792_s9 + $0xb8] sm:$0xff]  ;;  %v2389_v58 = vrot.slane %v2233_v54, %v5527_v53 }
 0x381   : > { %3705 = vmatprep.subr.bf16.mxu0 %v3988_v3  ;;  %3741 = vmatprep.subr.bf16.mxu1 %v3988_v3  ;;  %v3794_v1 = vpack.c.bf16 %v2257_v62, %v2256_v60  ;;  %v3123_v62 = vld [vmem:[%s5792_s9 + $0x388] sm:$0xff] }
 0x384   : > { %3707 = vmatpush1.bf16.msra.mxu0 %v3706_v5  ;;  %3743 = vmatpush1.bf16.msra.mxu1 %v3742_v6  ;;  %v3066_v5 = vld [vmem:[%s5792_s9 + $0x1c0] sm:$0xff]  ;;  %v3067_v6 = vld [vmem:[%s5792_s9 + $0x1c8] sm:$0xff] }
 0x385   : > { %3708 = vmatprep.subr.bf16.mxu0 %v3988_v3  ;;  %3744 = vmatprep.subr.bf16.mxu1 %v3988_v3  ;;  %v3766_v9 = vpack.c.bf16 %v3067_v6, %v3066_v5  ;;  %v3124_v5 = vld [vmem:[%s5792_s9 + $0x390] sm:$0xff]  ;;  %v3125_v6 = vld [vmem:[%s5792_s9 + $0x398] sm:$0xff] }
 0x388   : > { %3710 = vmatpush1.bf16.msra.mxu0 %v3709_v57  ;;  %3746 = vmatpush1.bf16.msra.mxu1 %v3745_v14  ;;  %v3768_v57 = vpack.c.bf16 %v3051_v11, %v3050_v10  ;;  %v2259_v14 = vld [vmem:[%s5792_s9 + $0xc8] sm:$0xff]  ;;  %v3109_v10 = vld [vmem:[%s5792_s9 + $0x318] sm:$0xff]  ;;  %v3850_v11 = vpack.c.bf16 %v3125_v6, %v3124_v5 }
 0x389   : > { %3711 = vmatprep.subr.bf16.mxu0 %v3988_v3  ;;  %3747 = vmatprep.subr.bf16.mxu1 %v3988_v3  ;;  %v3042_v3 = vld [vmem:[%s5792_s9 + $0x100] sm:$0xff]  ;;  %v3798_v19 = vpack.c.bf16 %v2259_v14, %v2258_v12  ;;  %v3127_v14 = vld [vmem:[%s5792_s9 + $0x3a8] sm:$0xff] }
 0x38a   : > { %v3752_v24 = vpack.c.bf16 %v3043_v7, %v3042_v3  ;;  %v2244_v7 = vld [vmem:[%s5792_s9 + $0x50] sm:$0xff] }
 0x38c   : > { %3713 = vmatpush1.bf16.msra.mxu0 %v3712_v21  ;;  %3749 = vmatpush1.bf16.msra.mxu1 %v3748_v4  ;;  %v3068_v21 = vld [vmem:[%s5792_s9 + $0x1d0] sm:$0xff]  ;;  %v3069_v4 = vld [vmem:[%s5792_s9 + $0x1d8] sm:$0xff] }
 0x38d   : > { %3751 = vmatprep.subr.bf16.mxu0 %v3750_v23  ;;  %3783 = vmatprep.subr.bf16.mxu1 %v3782_v25  ;;  %v2261_v23 = vld [vmem:[%s5792_s9 + $0xd8] sm:$0xff]  ;;  %v3070_v25 = vld [vmem:[%s5792_s9 + $0x1e0] sm:$0xff] }
 0x38e   : > { %v3802_v8 = vpack.c.bf16 %v2261_v23, %v2260_v22  ;;  %v3774_v28 = vpack.c.bf16 %v3071_v26, %v3070_v25  ;;  %v3131_v23 = vld [vmem:[%s5792_s9 + $0x3c8] sm:$0xff]  ;;  %v3132_v25 = vld [vmem:[%s5792_s9 + $0x3d0] sm:$0xff]  ;;  %v3133_v26 = vld [vmem:[%s5792_s9 + $0x3d8] sm:$0xff] }
 0x38f   : > { %2100 = vmatmul.mubr.f32.vlgmr.msra.gmra.mrb[18].mxu0 %v2030_v13  ;;  %2204 = vmatmul.mubr.f32.vlgmr.msra.gmra.mrb[18].mxu1 %v2134_v15  ;;  %v3770_v13 = vpack.c.bf16 %v3069_v4, %v3068_v21  ;;  %v3052_v15 = vld [vmem:[%s5792_s9 + $0x150] sm:$0xff]  ;;  %v3129_v4 = vld [vmem:[%s5792_s9 + $0x3b8] sm:$0xff] }
 0x390   : > { %3753 = vmatpush3.bf16.msra.mxu0 %v3752_v24  ;;  %3785 = vmatpush3.bf16.msra.mxu1 %v3784_v29  ;;  %v3772_v3 = vpack.c.bf16 %v3053_v18, %v3052_v15  ;;  %v3804_v24 = vpack.c.bf16 %v2245_v47, %v2244_v7  ;;  %v3054_v29 = vld [vmem:[%s5792_s9 + $0x160] sm:$0xff]  ;;  %v3128_v21 = vld [vmem:[%s5792_s9 + $0x3b0] sm:$0xff]  ;;  %v3113_v15 = vld [vmem:[%s5792_s9 + $0x338] sm:$0xff] }
 0x391   : > { %3755 = vmatprep.subr.bf16.mxu0 %v3754_v33  ;;  %3787 = vmatprep.subr.bf16.mxu1 %v3786_v38  ;;  %v3776_v32 = vpack.c.bf16 %v3055_v30, %v3054_v29  ;;  %v2263_v33 = vld [vmem:[%s5792_s9 + $0xe8] sm:$0xff]  ;;  %v3072_v38 = vld [vmem:[%s5792_s9 + $0x1f0] sm:$0xff]  ;;  %v3858_v18 = vpack.c.bf16 %v3129_v4, %v3128_v21  ;;  %v3114_v7 = vld [vmem:[%s5792_s9 + $0x340] sm:$0xff]  ;;  %v3866_v29 = vpack.c.bf16 %v3133_v26, %v3132_v25 }
 0x392   : > { %v3806_v36 = vpack.c.bf16 %v2263_v33, %v2262_v31  ;;  %v3778_v41 = vpack.c.bf16 %v3073_v39, %v3072_v38  ;;  %2456 = vmatprep.mubr.f32.mxu1 %v2389_v58  ;;  %v3115_v47 = vld [vmem:[%s5792_s9 + $0x348] sm:$0xff]  ;;  %v3134_v31 = vld [vmem:[%s5792_s9 + $0x3e0] sm:$0xff]  ;;  %v3137_v38 = vld [vmem:[%s5792_s9 + $0x3f8] sm:$0xff] }
 0x393   : > { %v3118_v33 = vld [vmem:[%s5792_s9 + $0x360] sm:$0xff]  ;;  %v3120_v39 = vld [vmem:[%s5792_s9 + $0x370] sm:$0xff]  ;;  %v3077_v4 = vld [vmem:[%s5792_s9 + $0x218] sm:$0xff] }
 0x394   : > { %3757 = vmatpush3.bf16.msra.mxu0 %v3756_v34  ;;  %3789 = vmatpush3.bf16.msra.mxu1 %v3788_v42  ;;  %v2246_v34 = vld [vmem:[%s5792_s9 + $0x60] sm:$0xff]  ;;  %v3056_v42 = vld [vmem:[%s5792_s9 + $0x170] sm:$0xff] }
 0x395   : > { %3759 = vmatprep.subr.bf16.mxu0 %v3758_v43  ;;  %3791 = vmatprep.subr.bf16.mxu1 %v3790_v52  ;;  %v3808_v37 = vpack.c.bf16 %v2247_v35, %v2246_v34  ;;  %v3057_v43 = vld [vmem:[%s5792_s9 + $0x178] sm:$0xff]  ;;  %v5524_v52 = vsub.s32 0, %v5503_v40  ;;  %v3119_v34 = vld [vmem:[%s5792_s9 + $0x368] sm:$0xff]  ;;  %v3076_v21 = vld [vmem:[%s5792_s9 + $0x210] sm:$0xff] }
 0x396   : > { %v3780_v45 = vpack.c.bf16 %v3057_v43, %v3056_v42  ;;  %v3080_v26 = vld [vmem:[%s5792_s9 + $0x230] sm:$0xff] }
 0x397   : > { %v2385_v60 = vrot.slane %v2233_v54, %v5524_v52  ;;  %v2618_v46 = vrot.slane %v2580_v44, %v5524_v52 }
 0x398   : > { %3761 = vmatpush3.bf16.msra.mxu0 %v3760_v51  ;;  %3793 = vmatpush3.bf16.msra.mxu1 %v3792_v55  ;;  %v3812_v51 = vpack.c.bf16 %v2249_v49, %v2248_v48  ;;  %v3090_v55 = vld [vmem:[%s5792_s9 + $0x280] sm:$0xff] }
 0x399   : > { %3763 = vmatprep.subr.bf16.mxu0 %v3762_v56  ;;  %3795 = vmatprep.subr.bf16.mxu1 %v3794_v1  ;;  %v3091_v56 = vld [vmem:[%s5792_s9 + $0x288] sm:$0xff] }
 0x39a   : > { %v3814_v59 = vpack.c.bf16 %v3091_v56, %v3090_v55  ;;  %v3107_v1 = vld [vmem:[%s5792_s9 + $0x308] sm:$0xff]  ;;  %v3990_v55 = vmov 1983009808  }
 0x39b   : > { %v2223_v56 = vunpack.c.l.s4 %v3990_v55  ;;  %v3089_v55 = vld [vmem:[%s5792_s9 + $0x278] sm:$0xff] }
 0x39c   : > { %3765 = vmatpush3.bf16.msra.mxu0 %v3764_v61  ;;  %3797 = vmatpush3.bf16.msra.mxu1 %v3796_v2  ;;  %v3122_v61 = vld [vmem:[%s5792_s9 + $0x380] sm:$0xff]  ;;  %v3848_v2 = vpack.c.bf16 %v3107_v1, %v3106_v0 }
 0x39d   : > { %3767 = vmatprep.subr.bf16.mxu0 %v3766_v9  ;;  %3799 = vmatprep.subr.bf16.mxu1 %v3798_v19  ;;  %v3846_v63 = vpack.c.bf16 %v3123_v62, %v3122_v61  ;;  %v3108_v9 = vld [vmem:[%s5792_s9 + $0x310] sm:$0xff]  ;;  %v2224_v61 = vunpack.c.0.s8 %v2223_v56  ;;  %v3040_v0 = vld [vmem:[%s5791_s8] ss:$0 sm:$0xff] }
 0x39e   : > { %v3852_v12 = vpack.c.bf16 %v3109_v10, %v3108_v9 }
 0x39f   : > { %v2227_v5 = vsub.s32 %v2224_v61, %v5503_v40  ;;  %v3093_v40 = vld [vmem:[%s5792_s9 + $0x298] sm:$0xff] }
 0x3a0   : > { %3769 = vmatpush3.bf16.msra.mxu0 %v3768_v57  ;;  %3801 = vmatpush3.bf16.msra.mxu1 %v3800_v20  ;;  %v3126_v57 = vld [vmem:[%s5792_s9 + $0x3a0] sm:$0xff]  ;;  %v3856_v20 = vpack.c.bf16 %v3111_v17, %v3110_v16 }
 0x3a1   : > { %3771 = vmatprep.subr.bf16.mxu0 %v3770_v13  ;;  %3803 = vmatprep.subr.bf16.mxu1 %v3802_v8  ;;  %v3854_v19 = vpack.c.bf16 %v3127_v14, %v3126_v57  ;;  %v3112_v13 = vld [vmem:[%s5792_s9 + $0x330] sm:$0xff] }
 0x3a2   : > { %v3860_v22 = vpack.c.bf16 %v3113_v15, %v3112_v13  ;;  %v3092_v57 = vld [vmem:[%s5792_s9 + $0x290] sm:$0xff]  ;;  %v3094_v13 = vld [vmem:[%s5792_s9 + $0x2a0] sm:$0xff]  ;;  %v3095_v15 = vld [vmem:[%s5792_s9 + $0x2a8] sm:$0xff] }
 0x3a4   : > { %3773 = vmatpush3.bf16.msra.mxu0 %v3772_v3  ;;  %3805 = vmatpush3.bf16.msra.mxu1 %v3804_v24  ;;  %v3130_v3 = vld [vmem:[%s5792_s9 + $0x3c0] sm:$0xff]  ;;  %v3864_v24 = vpack.c.bf16 %v3115_v47, %v3114_v7  ;;  %v3079_v47 = vld [vmem:[%s5792_s9 + $0x228] sm:$0xff] }
 0x3a5   : > { %3775 = vmatprep.subr.bf16.mxu0 %v3774_v28  ;;  %3807 = vmatprep.subr.bf16.mxu1 %v3806_v36  ;;  %v3862_v8 = vpack.c.bf16 %v3131_v23, %v3130_v3  ;;  %v3117_v28 = vld [vmem:[%s5792_s9 + $0x358] sm:$0xff]  ;;  %v3872_v36 = vpack.c.bf16 %v3119_v34, %v3118_v33  ;;  %v3820_v3 = vpack.c.bf16 %v3077_v4, %v3076_v21  ;;  %v3078_v7 = vld [vmem:[%s5792_s9 + $0x220] sm:$0xff]  ;;  %v3083_v33 = vld [vmem:[%s5792_s9 + $0x248] sm:$0xff] }
 0x3a6   : > { %v3868_v30 = vpack.c.bf16 %v3117_v28, %v3116_v27  ;;  %v3822_v23 = vpack.c.bf16 %v3095_v15, %v3094_v13  ;;  %v3081_v27 = vld [vmem:[%s5792_s9 + $0x238] sm:$0xff]  ;;  %v3098_v28 = vld [vmem:[%s5792_s9 + $0x2c0] sm:$0xff]  ;;  %v3100_v34 = vld [vmem:[%s5792_s9 + $0x2d0] sm:$0xff] }
 0x3a8   : > { %3777 = vmatpush3.bf16.msra.mxu0 %v3776_v32  ;;  %3809 = vmatpush3.bf16.msra.mxu1 %v3808_v37  ;;  %v3135_v32 = vld [vmem:[%s5792_s9 + $0x3e8] sm:$0xff]  ;;  %v3136_v37 = vld [vmem:[%s5792_s9 + $0x3f0] sm:$0xff] }
 0x3a9   : > { %3779 = vmatprep.subr.bf16.mxu0 %v3778_v41  ;;  %3811 = vmatprep.subr.bf16.mxu1 %v3810_v50  ;;  %v3870_v35 = vpack.c.bf16 %v3135_v32, %v3134_v31  ;;  %v3121_v41 = vld [vmem:[%s5792_s9 + $0x378] sm:$0xff]  ;;  %v3874_v42 = vpack.c.bf16 %v3137_v38, %v3136_v37  ;;  %v3082_v32 = vld [vmem:[%s5792_s9 + $0x240] sm:$0xff]  ;;  %v3084_v38 = vld [vmem:[%s5792_s9 + $0x250] sm:$0xff] }
 0x3aa   : > { %v3876_v43 = vpack.c.bf16 %v3121_v41, %v3120_v39  ;;  %v3085_v39 = vld [vmem:[%s5792_s9 + $0x258] sm:$0xff]  ;;  %v3102_v41 = vld [vmem:[%s5792_s9 + $0x2e0] sm:$0xff] }
 0x3ac   : > { %3781 = vmatpush3.bf16.msra.mxu0 %v3780_v45  ;;  %3813 = vmatpush3.bf16.msra.mxu1 %v3812_v51  ;;  %v2622_v45 = vrot.slane %v2580_v44, %v5527_v53 }
 0x3ad   : > { %3815 = vmatprep.subr.bf16.mxu0 %v3814_v59  ;;  %3847 = vmatprep.subr.bf16.mxu1 %v3846_v63 }
 0x3af   : > { %2457 = vmatmul.mubr.f32.vlgmr.msra.gmra.mrb[20].mxu1 %v2385_v60 }
 0x3b0   : > { %3849 = vmatpush3.bf16.msra.mxu1 %v3848_v2  ;;  %2689 = vmatprep.mubr.f32.mxu1 %v2622_v45  ;;  %v3086_v45 = vld [vmem:[%s5792_s9 + $0x260] sm:$0xff] }
 0x3b1   : > { %3851 = vmatprep.subr.bf16.mxu1 %v3850_v11  ;;  %v3074_v11 = vld [vmem:[%s5792_s9 + $0x200] sm:$0xff] }
 0x3b4   : > { %3853 = vmatpush3.bf16.msra.mxu1 %v3852_v12  ;;  %v3075_v12 = vld [vmem:[%s5792_s9 + $0x208] sm:$0xff] }
 0x3b5   : > { %3855 = vmatprep.subr.bf16.mxu1 %v3854_v19  ;;  %v3816_v19 = vpack.c.bf16 %v3075_v12, %v3074_v11 }
 0x3b8   : > { %3857 = vmatpush3.bf16.msra.mxu1 %v3856_v20  ;;  %v3818_v20 = vpack.c.bf16 %v3093_v40, %v3092_v57 }
 0x3b9   : > { %3859 = vmatprep.subr.bf16.mxu1 %v3858_v18 }
 0x3bc   : > { %3861 = vmatpush3.bf16.msra.mxu1 %v3860_v22 }
 0x3bd   : > { %3863 = vmatprep.subr.bf16.mxu1 %v3862_v8  ;;  %v3096_v8 = vld [vmem:[%s5792_s9 + $0x2b0] sm:$0xff] }
 0x3c0   : > { %3865 = vmatpush3.bf16.msra.mxu1 %v3864_v24  ;;  %v3824_v24 = vpack.c.bf16 %v3079_v47, %v3078_v7 }
 0x3c1   : > { %3867 = vmatprep.subr.bf16.mxu1 %v3866_v29  ;;  %v3099_v29 = vld [vmem:[%s5792_s9 + $0x2c8] sm:$0xff] }
 0x3c2   : > { %v3830_v31 = vpack.c.bf16 %v3099_v29, %v3098_v28 }
 0x3c4   : > { %3869 = vmatpush3.bf16.msra.mxu1 %v3868_v30  ;;  %v3828_v30 = vpack.c.bf16 %v3081_v27, %v3080_v26 }
 0x3c5   : > { %3871 = vmatprep.subr.bf16.mxu1 %v3870_v35  ;;  %v3101_v35 = vld [vmem:[%s5792_s9 + $0x2d8] sm:$0xff] }
 0x3c6   : > { %v3834_v37 = vpack.c.bf16 %v3101_v35, %v3100_v34 }
 0x3c8   : > { %3873 = vmatpush3.bf16.msra.mxu1 %v3872_v36  ;;  %v3832_v36 = vpack.c.bf16 %v3083_v33, %v3082_v32 }
 0x3c9   : > { %3875 = vmatprep.subr.bf16.mxu1 %v3874_v42  ;;  %v3103_v42 = vld [vmem:[%s5792_s9 + $0x2e8] sm:$0xff] }
 0x3ca   : > { %v3838_v44 = vpack.c.bf16 %v3103_v42, %v3102_v41 }
 0x3cc   : > { %3877 = vmatpush3.bf16.msra.mxu1 %v3876_v43  ;;  %v3836_v43 = vpack.c.bf16 %v3085_v39, %v3084_v38 }
 0x3cf   : > { %2690 = vmatmul.mubr.f32.vlgmr.msra.gmra.mrb[22].mxu1 %v2618_v46  ;;  %v3087_v46 = vld [vmem:[%s5792_s9 + $0x268] sm:$0xff] }
 0x432   : > { %v1924_v48 = vpop.f32.mrb[16].mxu0  ;;  %v1998_v49 = vpop.f32.mrb[16].mxu1 }
 0x433   : > { %v1999_v50 = vadd.f32 %v1998_v49, %v1924_v48  ;;  %v1926_v51 = vpop.f32.mrb[17].mxu0  ;;  %v2000_v54 = vpop.f32.mrb[17].mxu1  ;;  %v3104_v48 = vld [vmem:[%s5792_s9 + $0x2f0] sm:$0xff]  ;;  %v3105_v49 = vld [vmem:[%s5792_s9 + $0x2f8] sm:$0xff] }
 0x434   : > { %v3842_v51 = vpack.c.bf16 %v3105_v49, %v3104_v48  ;;  %v3088_v54 = vld [vmem:[%s5792_s9 + $0x270] sm:$0xff] }
 0x435   : > { %v3844_v56 = vpack.c.bf16 %v3089_v55, %v3088_v54 }
 0x462   : > { %v2101_v58 = vpop.f32.mrb[18].mxu0  ;;  %v2205_v59 = vpop.f32.mrb[18].mxu1 }
 0x463   : > { %v2105_v60 = vadd.f32 %v2101_v58, %v1999_v50  ;;  %v2103_v62 = vpop.f32.mrb[19].mxu0  ;;  %v2207_v63 = vpop.f32.mrb[19].mxu1  ;;  %v3840_v50 = vpack.c.bf16 %v3087_v46, %v3086_v45 }
 0x465   : > { %v2209_v1 = vadd.f32 %v2205_v59, %v2105_v60 }
 0x467   : > { %v2217_v2 = vadd.f32 %v3040_v0, %v2209_v1 }
 0x469   : > { %v2218_v6 = vmax.f32 %v2217_v2, 0.0 }
 0x46b   : > { %2220 = vst [vmem:[#allocation6 + $0x4] sm:$0x1] %v2218_v6  ;;  %v2228_v9 = vrot.slane %v2218_v6, %v2227_v5 }
 0x46d   : > { %v3041_v10 = vrot.slane %v2228_v9, 9 }
 0x46f   : > { %2232 = vst [vmem:[#allocation6 + $0x1] sm:$0x1] %v3041_v10 }
 0x472   : > { %v2266_v14 = vld [vmem:[#allocation6 + $0x4] ss:$2 sm:$0x3] }
 0x473   : > { %v2304_v16 = vrot.slane %v2266_v14, %v5524_v52  ;;  %v2308_v17 = vrot.slane %v2266_v14, %v5527_v53 }
 0x475   : > { %2375 = vmatprep.mubr.f32.mxu0 %v2308_v17 }
 0x476   : > { %2376 = vmatmul.mubr.f32.vlgmr.msra.gmra.mrb[20].mxu0 %v2304_v16  ;;  %v2463_v18 = vld [vmem:[#allocation6 + $0x1] ss:$2 sm:$0x3] }
 0x477   : > { %3817 = vmatpush3.bf16.msra.mxu0 %v3816_v19  ;;  %v2505_v22 = vrot.slane %v2463_v18, %v5527_v53  ;;  %v3097_v53 = vld [vmem:[%s5792_s9 + $0x2b8] sm:$0xff]  ;;  %v2501_v58 = vrot.slane %v2463_v18, %v5524_v52  ;;  %v2696_v52 = vld [vmem:[%s5793_s10] sm:$0x1] }
 0x478   : > { %3819 = vmatprep.subr.bf16.mxu0 %v3818_v20  ;;  %v3826_v25 = vpack.c.bf16 %v3097_v53, %v3096_v8 }
 0x479   : > { %2572 = vmatprep.mubr.f32.mxu0 %v2505_v22 }
 0x47b   : > { %3821 = vmatpush3.bf16.msra.mxu0 %v3820_v3 }
 0x47c   : > { %3823 = vmatprep.subr.bf16.mxu0 %v3822_v23 }
 0x47f   : > { %3825 = vmatpush3.bf16.msra.mxu0 %v3824_v24 }
 0x480   : > { %3827 = vmatprep.subr.bf16.mxu0 %v3826_v25 }
 0x482   : > { %v3209_v59 = vpop.f32.mrb[20].mxu1 }
 0x483   : > { %3829 = vmatpush3.bf16.msra.mxu0 %v3828_v30  ;;  %v3210_v60 = vpop.f32.mrb[21].mxu1 }
 0x484   : > { %3831 = vmatprep.subr.bf16.mxu0 %v3830_v31  ;;  %v3211_v61 = vadd.f32 %v3210_v60, %v3209_v59 }
 0x487   : > { %3833 = vmatpush3.bf16.msra.mxu0 %v3832_v36 }
 0x488   : > { %3835 = vmatprep.subr.bf16.mxu0 %v3834_v37 }
 0x48b   : > { %3837 = vmatpush3.bf16.msra.mxu0 %v3836_v43 }
 0x48c   : > { %3839 = vmatprep.subr.bf16.mxu0 %v3838_v44 }
 0x48f   : > { %3841 = vmatpush3.bf16.msra.mxu0 %v3840_v50 }
 0x490   : > { %3843 = vmatprep.subr.bf16.mxu0 %v3842_v51 }
 0x493   : > { %3845 = vmatpush3.bf16.msra.mxu0 %v3844_v56 }
 0x496   : > { %2573 = vmatmul.mubr.f32.vlgmr.msra.gmra.mrb[22].mxu0 %v2501_v58 }
 0x4a2   : > { %v3279_v62 = vpop.f32.mrb[22].mxu1 }
 0x4a3   : > { %v3280_v63 = vpop.f32.mrb[23].mxu1 }
 0x4a4   : > { %v3281_v0 = vadd.f32 %v3280_v63, %v3279_v62 }
 0x549   : > { %v3174_v1 = vpop.f32.mrb[20].mxu0 }
 0x54a   : > { %v3175_v2 = vpop.f32.mrb[21].mxu0 }
 0x54b   : > { %v3176_v5 = vadd.f32 %v3175_v2, %v3174_v1 }
 0x54d   : > { %v2459_v6 = vadd.f32 %v3211_v61, %v3176_v5 }
 0x569   : > { %v3244_v9 = vpop.f32.mrb[22].mxu0 }
 0x56a   : > { %v3245_v10 = vpop.f32.mrb[23].mxu0 }
 0x56b   : > { %v3246_v11 = vadd.f32 %v3245_v10, %v3244_v9 }
 0x56d   : > { %v2578_v12 = vadd.f32 %v3246_v11, %v2459_v6 }
 0x56f   : > { %v2695_v57 = vadd.f32 %v3281_v0, %v2578_v12 }
 0x571   : > { %v2697_v40 = vadd.f32 %v2696_v52, %v2695_v57 }
 0x573   : > { %v2698_v14 = vmax.f32 %v2697_v40, 0.0 }
 0x575   : > { %2699 = vst [vmem:[%s378_s30] sm:$0x1] %v2698_v14 }
 0x576   : > { %3937 = shalt.err (!%p3934_p3)
}
 0x577   : > { %s3938_s25 = scalar_lea.hbm %s5741_s19, 16  ;;  %s3942_s30 = scalar_lea.hbm %s5794_s11, 32 }
 0x578   : > { %p3939_p4 = scmp.ne.s32.totalorder %s5741_s19, %s3938_s25  ;;  %p3943_p9 = scmp.lt.u32.totalorder %s5741_s19, %s5794_s11 }
 0x579   : > { %p3944_p10 = scmp.lt.u32.totalorder %s3942_s30, %s3938_s25  ;;  %p3946_p12 = scmp.lt.u32.totalorder %s3938_s25, %s5741_s19 }
 0x57a   : > { %p3940_p7 = pnand %p3939_p4, %p4090_p5 }
 0x57b   : > { %p3945_p11 = por %p3944_p10, %p3943_p9 }
 0x57c   : > { %p3941_p8 = pneg %p3940_p7 }
 0x57d   : > { %p3947_p13 = por %p3946_p12, %p3945_p11 }
 0x57f   : > { %p3948_p0 = pnand %p3947_p13, %p3941_p8 }
 0x581   : > { %3951 = shalt.err (!%p3948_p0)
}
 0x582   : > { %3878 = dma.vmem_to_hbm [thread:$0]  (%p4090_p5), %s5743_s12, 16, %s5741_s19, %s2701_s14  }
 0x583 PF: > { %p3884_p1 = scmp.ge.s32.totalorder %s3986_s20, 2  ;;  %s2725_s22 = sand.u32 1, %s3974_s17  }
 0x584   : > { %s2726_s21 = scalar_lea.sflag [#allocation8], %s2725_s22 }
 0x585   : > { %p3881_p2 = pnand %p3884_p1, %p4094_p6 }
 0x587   : > { %3969 = dma.done.wait (!%p3881_p2), %s2726_s21, 16  }
 0x588   : > { %3971 = vsyncadd (!%p3881_p2), %s2726_s21, 4294967280  ;;  %s5800_s24 = sld [smem:[#allocation10_spill]]  ;;  %s5801_s19 = sld [smem:[#allocation11_spill]] }
 0x589   : > { %p21_p3 = scmp.ge.s32.totalorder %s4077_s23, 4   ;;  %s5802_s17 = smov %s3978_s18 }
 0x58a   : > { %s5804_s20 = smov %s4077_s23 }
 0x58b   :  { %23 = sbr.rel (!%p21_p3) target bundleno = 3 (0x3), region = 122 }
 0x58e   : > { %s5803_s18 = smov %s5800_s24 }
 0x592   :  { %2730 = vsyncpa [#allocation8], 1 }
 0x593   :  { %2732 = vsyncpa [#allocation8 + $0x1], 1 }

</bundles_post_ra>
